<compile_context>
chip_gen: v7x
topology: tpu7x:2x2x1
jax: 0.10.0
libtpu: 0.0.40
codegen_flags: <defaults>
</compile_context>

<pallas_src>
import functools

import jax
import jax.numpy as jnp
from jax.experimental import pallas as pl
from jax.experimental.pallas import tpu as pltpu

HIDDEN_SIZE = 100
INPUT_SIZE = 4 * 4 * 32      # 512
LAYER_SIZE = 2
NUM_CLASSES = 2

HPAD = 128                   # hidden padded to a full lane register
GPAD = 4 * HPAD              # 512 gate columns, one lane-aligned slab per gate
OUT_PAD = 128                # FC output lanes (first NUM_CLASSES columns valid)


# ----------------------------------------------------------------------------
# Fused Pallas kernel: 2 LSTM layers + FC head, single invocation.
# ----------------------------------------------------------------------------
def fused_lstm_kernel(x_ref,        # (T*Bp, In)     time-major flattened input
                      wih0_ref,     # (In, GPAD)
                      whh0_ref,     # (HPAD, GPAD)
                      b0_ref,       # (1, GPAD)
                      wih1_ref,     # (HPAD, GPAD)
                      whh1_ref,     # (HPAD, GPAD)
                      b1_ref,       # (1, GPAD)
                      wfc_ref,      # (HPAD, OUT_PAD)
                      bfc_ref,      # (1, OUT_PAD)
                      out_ref,      # (Bp, OUT_PAD)
                      xp_scr,       # (T*Bp, GPAD)   hoisted input projection
                      hseq_scr,     # (T*Bp, HPAD)   layer-0 hidden sequence
                      h_scr,        # (Bp, HPAD)
                      c_scr):       # (Bp, HPAD)
    tb = x_ref.shape[0]
    bp = h_scr.shape[0]
    t_steps = tb // bp

    def run_layer(whh_ref, store_seq):
        h_scr[...] = jnp.zeros_like(h_scr)
        c_scr[...] = jnp.zeros_like(c_scr)

        def step(t, carry):
            row = pl.multiple_of(t * bp, bp)
            # Only the recurrent term is on the serial path; x @ W_ih + b was
            # precomputed into xp_scr with one large MXU matmul.
            gates = xp_scr[pl.ds(row, bp), :] + jnp.dot(
                h_scr[...], whh_ref[...], preferred_element_type=jnp.float32)
            i_g = jax.nn.sigmoid(gates[:, 0 * HPAD:1 * HPAD])
            f_g = jax.nn.sigmoid(gates[:, 1 * HPAD:2 * HPAD])
            g_g = jnp.tanh(gates[:, 2 * HPAD:3 * HPAD])
            o_g = jax.nn.sigmoid(gates[:, 3 * HPAD:4 * HPAD])
            c_new = f_g * c_scr[...] + i_g * g_g
            h_new = o_g * jnp.tanh(c_new)
            h_scr[...] = h_new
            c_scr[...] = c_new
            if store_seq:
                hseq_scr[pl.ds(row, bp), :] = h_new
            return carry

        jax.lax.fori_loop(0, t_steps, step, 0, unroll=True)

    # ---- layer 0: hoisted input projection, then recurrence ----------------
    xp_scr[...] = jnp.dot(x_ref[...], wih0_ref[...],
                          preferred_element_type=jnp.float32) + b0_ref[...]
    run_layer(whh0_ref, store_seq=True)

    # ---- layer 1: projection over the whole layer-0 output sequence --------
    xp_scr[...] = jnp.dot(hseq_scr[...], wih1_ref[...],
                          preferred_element_type=jnp.float32) + b1_ref[...]
    run_layer(whh1_ref, store_seq=False)

    # ---- FC head on the final hidden state (== out[:, -1, :] of layer 2) ---
    out_ref[...] = jnp.dot(h_scr[...], wfc_ref[...],
                           preferred_element_type=jnp.float32) + bfc_ref[...]


# ----------------------------------------------------------------------------
# pallas_call wrapper
# ----------------------------------------------------------------------------
def _fused_lstm_call(x2d, kp, b_pad):
    tb, in_dim = x2d.shape
    grid_spec = pltpu.PrefetchScalarGridSpec(
        num_scalar_prefetch=0,
        grid=(1,),
        in_specs=[
            pl.BlockSpec((tb, in_dim), lambda i: (0, 0)),
            pl.BlockSpec((in_dim, GPAD), lambda i: (0, 0)),
            pl.BlockSpec((HPAD, GPAD), lambda i: (0, 0)),
            pl.BlockSpec((1, GPAD), lambda i: (0, 0)),
            pl.BlockSpec((HPAD, GPAD), lambda i: (0, 0)),
            pl.BlockSpec((HPAD, GPAD), lambda i: (0, 0)),
            pl.BlockSpec((1, GPAD), lambda i: (0, 0)),
            pl.BlockSpec((HPAD, OUT_PAD), lambda i: (0, 0)),
            pl.BlockSpec((1, OUT_PAD), lambda i: (0, 0)),
        ],
        out_specs=pl.BlockSpec((b_pad, OUT_PAD), lambda i: (0, 0)),
        scratch_shapes=[
            pltpu.VMEM((tb, GPAD), jnp.float32),      # hoisted gate projection
            pltpu.VMEM((tb, HPAD), jnp.float32),      # layer-0 hidden sequence
            pltpu.VMEM((b_pad, HPAD), jnp.float32),   # h
            pltpu.VMEM((b_pad, HPAD), jnp.float32),   # c
        ],
    )
    return pl.pallas_call(
        fused_lstm_kernel,
        out_shape=jax.ShapeDtypeStruct((b_pad, OUT_PAD), jnp.float32),
        grid_spec=grid_spec,
        compiler_params=pltpu.CompilerParams(
            dimension_semantics=("arbitrary",)),
    )(x2d, kp["wih0"], kp["whh0"], kp["b0"],
      kp["wih1"], kp["whh1"], kp["b1"], kp["wfc"], kp["bfc"])


@jax.jit
def lstm_model_forward(x, kparams):
    """x: (batch, seq, input_size) — same layout as the PyTorch module."""
    B, T, _ = x.shape
    Bp = ((B + 7) // 8) * 8                       # pad batch to full sublanes
    x_tb = jnp.transpose(x, (1, 0, 2))            # (T, B, In) time-major
    if Bp != B:
        x_tb = jnp.pad(x_tb, ((0, 0), (0, Bp - B), (0, 0)))
    x2d = x_tb.reshape(T * Bp, x.shape[-1])       # time-major flat rows
    out = _fused_lstm_call(x2d, kparams, Bp)      # (Bp, OUT_PAD)
    return out[:B, :NUM_CLASSES]


# ----------------------------------------------------------------------------
# One-time weight preparation (kernel layout: transposed, padded, combined)
# ----------------------------------------------------------------------------
def _pad_gate_cols(w, h):
    """w: (rows, 4*h) with PyTorch [i|f|g|o] blocks -> (rows, 4*HPAD)."""
    rows = w.shape[0]
    w = w.reshape(rows, 4, h)
    w = jnp.pad(w, ((0, 0), (0, 0), (0, HPAD - h)))
    return w.reshape(rows, 4 * HPAD)


def prepare_params(params):
    """Transpose, combine biases, and zero-pad hidden(100->128) /
    gates(400->512) / FC-out(2->128). Call once, reuse every forward."""
    kp = {}
    for layer in range(LAYER_SIZE):
        w_ih = params[f"w_ih_l{layer}"]                       # (4H, in_dim)
        w_hh = params[f"w_hh_l{layer}"]                       # (4H, H)
        bias = params[f"b_ih_l{layer}"] + params[f"b_hh_l{layer}"]

        wih_t = _pad_gate_cols(jnp.transpose(w_ih), HIDDEN_SIZE)   # (in, GPAD)
        if layer > 0:  # input of layers >=1 is the (padded) hidden state
            wih_t = jnp.pad(wih_t, ((0, HPAD - HIDDEN_SIZE), (0, 0)))
        whh_t = _pad_gate_cols(jnp.transpose(w_hh), HIDDEN_SIZE)   # (H, GPAD)
        whh_t = jnp.pad(whh_t, ((0, HPAD - HIDDEN_SIZE), (0, 0)))  # (HPAD, GPAD)
        b_pad = _pad_gate_cols(bias.reshape(1, 4 * HIDDEN_SIZE), HIDDEN_SIZE)

        kp[f"wih{layer}"] = wih_t
        kp[f"whh{layer}"] = whh_t
        kp[f"b{layer}"] = b_pad

    wfc = jnp.transpose(params["fc_w"])                       # (H, C)
    wfc = jnp.pad(wfc, ((0, HPAD - HIDDEN_SIZE), (0, OUT_PAD - NUM_CLASSES)))
    bfc = jnp.pad(params["fc_b"].reshape(1, NUM_CLASSES),
                  ((0, 0), (0, OUT_PAD - NUM_CLASSES)))
    kp["wfc"] = wfc
    kp["bfc"] = bfc
    return kp


# ----------------------------------------------------------------------------
# Pure-JAX reference (correctness check only)
# ----------------------------------------------------------------------------
def lstm_reference(x, params):
    def cell(carry, x_t, w_ih, w_hh, b_ih, b_hh):
        h, c = carry
        gates = x_t @ w_ih.T + b_ih + h @ w_hh.T + b_hh
        H = h.shape[-1]
        i = jax.nn.sigmoid(gates[:, :H])
        f = jax.nn.sigmoid(gates[:, H:2 * H])
        g = jnp.tanh(gates[:, 2 * H:3 * H])
        o = jax.nn.sigmoid(gates[:, 3 * H:])
        c = f * c + i * g
        h = o * jnp.tanh(c)
        return (h, c), h

    B = x.shape[0]
    seq = jnp.transpose(x, (1, 0, 2))
    for layer in range(LAYER_SIZE):
        w_ih = params[f"w_ih_l{layer}"]
        w_hh = params[f"w_hh_l{layer}"]
        b_ih = params[f"b_ih_l{layer}"]
        b_hh = params[f"b_hh_l{layer}"]
        init = (jnp.zeros((B, HIDDEN_SIZE), jnp.float32),
                jnp.zeros((B, HIDDEN_SIZE), jnp.float32))
        _, seq = jax.lax.scan(
            functools.partial(cell, w_ih=w_ih, w_hh=w_hh, b_ih=b_ih, b_hh=b_hh),
            init, seq)
    h_last = seq[-1]
    return h_last @ params["fc_w"].T + params["fc_b"]


# ----------------------------------------------------------------------------
# Deterministic parameter init (matches PyTorch nn.LSTM / nn.Linear shapes)
# ----------------------------------------------------------------------------
def init_params(key):
    params = {}
    k = 1.0 / jnp.sqrt(HIDDEN_SIZE)
    keys = jax.random.split(key, 4 * LAYER_SIZE + 2)
    idx = 0
    for layer in range(LAYER_SIZE):
        in_dim = INPUT_SIZE if layer == 0 else HIDDEN_SIZE
        params[f"w_ih_l{layer}"] = jax.random.uniform(
            keys[idx], (4 * HIDDEN_SIZE, in_dim), jnp.float32, -k, k); idx += 1
        params[f"w_hh_l{layer}"] = jax.random.uniform(
            keys[idx], (4 * HIDDEN_SIZE, HIDDEN_SIZE), jnp.float32, -k, k); idx += 1
        params[f"b_ih_l{layer}"] = jax.random.uniform(
            keys[idx], (4 * HIDDEN_SIZE,), jnp.float32, -k, k); idx += 1
        params[f"b_hh_l{layer}"] = jax.random.uniform(
            keys[idx], (4 * HIDDEN_SIZE,), jnp.float32, -k, k); idx += 1
    kf = 1.0 / jnp.sqrt(HIDDEN_SIZE)
    params["fc_w"] = jax.random.uniform(
        keys[idx], (NUM_CLASSES, HIDDEN_SIZE), jnp.float32, -kf, kf); idx += 1
    params["fc_b"] = jax.random.uniform(
        keys[idx], (NUM_CLASSES,), jnp.float32, -kf, kf)
    return params


if __name__ == "__main__":
    key = jax.random.PRNGKey(0)
    pkey, xkey = jax.random.split(key)
    params = init_params(pkey)
    kparams = prepare_params(params)   # one-time kernel-layout weight prep

    batch, seq = 2, 8
    x = jax.random.normal(xkey, (batch, seq, INPUT_SIZE), jnp.float32)

    out = lstm_model_forward(x, kparams)
    out = jax.block_until_ready(out)

    ref = lstm_reference(x, params)
    assert out.shape == (batch, NUM_CLASSES)
    assert jnp.max(jnp.abs(out - ref)) < 1e-4, "mismatch vs reference"

    print("KERNEL_OK")
</pallas_src>

<mosaic_0001>
module attributes {stable_mosaic.version = 11 : i64} {
  func.func @fused_lstm_kernel(%arg0: i32, %arg1: memref<64x512xf32, #tpu.memory_space<vmem>>, %arg2: memref<512x512xf32, #tpu.memory_space<vmem>>, %arg3: memref<128x512xf32, #tpu.memory_space<vmem>>, %arg4: memref<1x512xf32, #tpu.memory_space<vmem>>, %arg5: memref<128x512xf32, #tpu.memory_space<vmem>>, %arg6: memref<128x512xf32, #tpu.memory_space<vmem>>, %arg7: memref<1x512xf32, #tpu.memory_space<vmem>>, %arg8: memref<128x128xf32, #tpu.memory_space<vmem>>, %arg9: memref<1x128xf32, #tpu.memory_space<vmem>>, %arg10: memref<8x128xf32, #tpu.memory_space<vmem>>, %arg11: memref<64x512xf32, #tpu.memory_space<vmem>>, %arg12: memref<64x128xf32, #tpu.memory_space<vmem>>, %arg13: memref<8x128xf32, #tpu.memory_space<vmem>>, %arg14: memref<8x128xf32, #tpu.memory_space<vmem>>) attributes {dimension_semantics = [#tpu.dimension_semantics<arbitrary>], iteration_bounds = array<i64: 1>, scalar_prefetch = 0 : i64, scratch_operands = 4 : i64, tpu.core_type = #tpu.core_type<tc>, window_params = [{pipeline_mode = #tpu.pipeline_mode<synchronous>, transform_indices = @transform_0, window_bounds = array<i64: 64, 512>}, {pipeline_mode = #tpu.pipeline_mode<synchronous>, transform_indices = @transform_1, window_bounds = array<i64: 512, 512>}, {pipeline_mode = #tpu.pipeline_mode<synchronous>, transform_indices = @transform_2, window_bounds = array<i64: 128, 512>}, {pipeline_mode = #tpu.pipeline_mode<synchronous>, transform_indices = @transform_3, window_bounds = array<i64: 1, 512>}, {pipeline_mode = #tpu.pipeline_mode<synchronous>, transform_indices = @transform_4, window_bounds = array<i64: 128, 512>}, {pipeline_mode = #tpu.pipeline_mode<synchronous>, transform_indices = @transform_5, window_bounds = array<i64: 128, 512>}, {pipeline_mode = #tpu.pipeline_mode<synchronous>, transform_indices = @transform_6, window_bounds = array<i64: 1, 512>}, {pipeline_mode = #tpu.pipeline_mode<synchronous>, transform_indices = @transform_7, window_bounds = array<i64: 128, 128>}, {pipeline_mode = #tpu.pipeline_mode<synchronous>, transform_indices = @transform_8, window_bounds = array<i64: 1, 128>}, {pipeline_mode = #tpu.pipeline_mode<synchronous>, transform_indices = @transform_9, window_bounds = array<i64: 8, 128>}]} {
    %c0 = arith.constant 0 : index
    %c0_0 = arith.constant 0 : index
    %0 = vector.load %arg1[%c0, %c0_0] : memref<64x512xf32, #tpu.memory_space<vmem>>, vector<64x512xf32>
    %c0_1 = arith.constant 0 : index
    %c0_2 = arith.constant 0 : index
    %1 = vector.load %arg2[%c0_1, %c0_2] : memref<512x512xf32, #tpu.memory_space<vmem>>, vector<512x512xf32>
    %cst = arith.constant dense<0.000000e+00> : vector<64x512xf32>
    %2 = tpu.matmul %0, %1, %cst {dimension_numbers = #tpu.dot_dimension_numbers<[1], [0], [0], [1], [0, 0, 1, 1], [], []>} : vector<64x512xf32>, vector<512x512xf32>, vector<64x512xf32> -> vector<64x512xf32>
    %c0_3 = arith.constant 0 : index
    %c0_4 = arith.constant 0 : index
    %3 = vector.load %arg4[%c0_3, %c0_4] : memref<1x512xf32, #tpu.memory_space<vmem>>, vector<1x512xf32>
    %4 = vector.broadcast %3 : vector<1x512xf32> to vector<64x512xf32>
    %5 = arith.addf %2, %4 : vector<64x512xf32>
    %c0_5 = arith.constant 0 : index
    %c0_6 = arith.constant 0 : index
    %6 = vector.load %arg11[%c0_5, %c0_6] : memref<64x512xf32, #tpu.memory_space<vmem>>, vector<64x512xf32>
    tpu.vector_store %arg11[%c0_5, %c0_6], %5 {strides = array<i32>} : memref<64x512xf32, #tpu.memory_space<vmem>>, vector<64x512xf32>,
    %cst_7 = arith.constant 0.000000e+00 : f32
    %7 = vector.broadcast %cst_7 : f32 to vector<8x128xf32>
    %c0_8 = arith.constant 0 : index
    %c0_9 = arith.constant 0 : index
    %8 = vector.load %arg13[%c0_8, %c0_9] : memref<8x128xf32, #tpu.memory_space<vmem>>, vector<8x128xf32>
    tpu.vector_store %arg13[%c0_8, %c0_9], %7 {strides = array<i32>} : memref<8x128xf32, #tpu.memory_space<vmem>>, vector<8x128xf32>,
    %cst_10 = arith.constant 0.000000e+00 : f32
    %9 = vector.broadcast %cst_10 : f32 to vector<8x128xf32>
    %c0_11 = arith.constant 0 : index
    %c0_12 = arith.constant 0 : index
    %10 = vector.load %arg14[%c0_11, %c0_12] : memref<8x128xf32, #tpu.memory_space<vmem>>, vector<8x128xf32>
    tpu.vector_store %arg14[%c0_11, %c0_12], %9 {strides = array<i32>} : memref<8x128xf32, #tpu.memory_space<vmem>>, vector<8x128xf32>,
    %c0_i32 = arith.constant 0 : i32
    %c8_i32 = arith.constant 8 : i32
    %11 = arith.muli %c0_i32, %c8_i32 : i32
    %12 = tpu.assume_multiple %11, 8 : i32
    %13 = arith.index_cast %12 : i32 to index
    %c0_13 = arith.constant 0 : index
    %14 = vector.load %arg11[%13, %c0_13] : memref<64x512xf32, #tpu.memory_space<vmem>>, vector<8x512xf32>
    %c0_14 = arith.constant 0 : index
    %c0_15 = arith.constant 0 : index
    %15 = vector.load %arg13[%c0_14, %c0_15] : memref<8x128xf32, #tpu.memory_space<vmem>>, vector<8x128xf32>
    %c0_16 = arith.constant 0 : index
    %c0_17 = arith.constant 0 : index
    %16 = vector.load %arg3[%c0_16, %c0_17] : memref<128x512xf32, #tpu.memory_space<vmem>>, vector<128x512xf32>
    %cst_18 = arith.constant dense<0.000000e+00> : vector<8x512xf32>
    %17 = tpu.matmul %15, %16, %cst_18 {dimension_numbers = #tpu.dot_dimension_numbers<[1], [0], [0], [1], [0, 0, 1, 1], [], []>} : vector<8x128xf32>, vector<128x512xf32>, vector<8x512xf32> -> vector<8x512xf32>
    %18 = arith.addf %14, %17 : vector<8x512xf32>
    %19 = vector.extract_strided_slice %18 {offsets = [0, 0], sizes = [8, 128], strides = [1, 1]} : vector<8x512xf32> to vector<8x128xf32>
    %20 = arith.negf %19 : vector<8x128xf32>
    %21 = math.exp %20 : vector<8x128xf32>
    %cst_19 = arith.constant 1.000000e+00 : f32
    %22 = vector.broadcast %cst_19 : f32 to vector<8x128xf32>
    %23 = arith.addf %22, %21 : vector<8x128xf32>
    %24 = arith.divf %22, %23 : vector<8x128xf32>
    %25 = vector.extract_strided_slice %18 {offsets = [0, 128], sizes = [8, 128], strides = [1, 1]} : vector<8x512xf32> to vector<8x128xf32>
    %26 = arith.negf %25 : vector<8x128xf32>
    %27 = math.exp %26 : vector<8x128xf32>
    %cst_20 = arith.constant 1.000000e+00 : f32
    %28 = vector.broadcast %cst_20 : f32 to vector<8x128xf32>
    %29 = arith.addf %28, %27 : vector<8x128xf32>
    %30 = arith.divf %28, %29 : vector<8x128xf32>
    %31 = vector.extract_strided_slice %18 {offsets = [0, 256], sizes = [8, 128], strides = [1, 1]} : vector<8x512xf32> to vector<8x128xf32>
    %32 = math.tanh %31 : vector<8x128xf32>
    %33 = vector.extract_strided_slice %18 {offsets = [0, 384], sizes = [8, 128], strides = [1, 1]} : vector<8x512xf32> to vector<8x128xf32>
    %34 = arith.negf %33 : vector<8x128xf32>
    %35 = math.exp %34 : vector<8x128xf32>
    %cst_21 = arith.constant 1.000000e+00 : f32
    %36 = vector.broadcast %cst_21 : f32 to vector<8x128xf32>
    %37 = arith.addf %36, %35 : vector<8x128xf32>
    %38 = arith.divf %36, %37 : vector<8x128xf32>
    %c0_22 = arith.constant 0 : index
    %c0_23 = arith.constant 0 : index
    %39 = vector.load %arg14[%c0_22, %c0_23] : memref<8x128xf32, #tpu.memory_space<vmem>>, vector<8x128xf32>
    %40 = arith.mulf %30, %39 : vector<8x128xf32>
    %41 = arith.mulf %24, %32 : vector<8x128xf32>
    %42 = arith.addf %40, %41 : vector<8x128xf32>
    %43 = math.tanh %42 : vector<8x128xf32>
    %44 = arith.mulf %38, %43 : vector<8x128xf32>
    %c0_24 = arith.constant 0 : index
    %c0_25 = arith.constant 0 : index
    %45 = vector.load %arg13[%c0_24, %c0_25] : memref<8x128xf32, #tpu.memory_space<vmem>>, vector<8x128xf32>
    tpu.vector_store %arg13[%c0_24, %c0_25], %44 {strides = array<i32>} : memref<8x128xf32, #tpu.memory_space<vmem>>, vector<8x128xf32>,
    %c0_26 = arith.constant 0 : index
    %c0_27 = arith.constant 0 : index
    %46 = vector.load %arg14[%c0_26, %c0_27] : memref<8x128xf32, #tpu.memory_space<vmem>>, vector<8x128xf32>
    tpu.vector_store %arg14[%c0_26, %c0_27], %42 {strides = array<i32>} : memref<8x128xf32, #tpu.memory_space<vmem>>, vector<8x128xf32>,
    %47 = arith.index_cast %12 : i32 to index
    %c0_28 = arith.constant 0 : index
    %48 = vector.load %arg12[%47, %c0_28] : memref<64x128xf32, #tpu.memory_space<vmem>>, vector<8x128xf32>
    tpu.vector_store %arg12[%47, %c0_28], %44 {strides = array<i32>} : memref<64x128xf32, #tpu.memory_space<vmem>>, vector<8x128xf32>,
    %c1_i32 = arith.constant 1 : i32
    %c8_i32_29 = arith.constant 8 : i32
    %49 = arith.muli %c1_i32, %c8_i32_29 : i32
    %50 = tpu.assume_multiple %49, 8 : i32
    %51 = arith.index_cast %50 : i32 to index
    %c0_30 = arith.constant 0 : index
    %52 = vector.load %arg11[%51, %c0_30] : memref<64x512xf32, #tpu.memory_space<vmem>>, vector<8x512xf32>
    %c0_31 = arith.constant 0 : index
    %c0_32 = arith.constant 0 : index
    %53 = vector.load %arg13[%c0_31, %c0_32] : memref<8x128xf32, #tpu.memory_space<vmem>>, vector<8x128xf32>
    %c0_33 = arith.constant 0 : index
    %c0_34 = arith.constant 0 : index
    %54 = vector.load %arg3[%c0_33, %c0_34] : memref<128x512xf32, #tpu.memory_space<vmem>>, vector<128x512xf32>
    %cst_35 = arith.constant dense<0.000000e+00> : vector<8x512xf32>
    %55 = tpu.matmul %53, %54, %cst_35 {dimension_numbers = #tpu.dot_dimension_numbers<[1], [0], [0], [1], [0, 0, 1, 1], [], []>} : vector<8x128xf32>, vector<128x512xf32>, vector<8x512xf32> -> vector<8x512xf32>
    %56 = arith.addf %52, %55 : vector<8x512xf32>
    %57 = vector.extract_strided_slice %56 {offsets = [0, 0], sizes = [8, 128], strides = [1, 1]} : vector<8x512xf32> to vector<8x128xf32>
    %58 = arith.negf %57 : vector<8x128xf32>
    %59 = math.exp %58 : vector<8x128xf32>
    %cst_36 = arith.constant 1.000000e+00 : f32
    %60 = vector.broadcast %cst_36 : f32 to vector<8x128xf32>
    %61 = arith.addf %60, %59 : vector<8x128xf32>
    %62 = arith.divf %60, %61 : vector<8x128xf32>
    %63 = vector.extract_strided_slice %56 {offsets = [0, 128], sizes = [8, 128], strides = [1, 1]} : vector<8x512xf32> to vector<8x128xf32>
    %64 = arith.negf %63 : vector<8x128xf32>
    %65 = math.exp %64 : vector<8x128xf32>
    %cst_37 = arith.constant 1.000000e+00 : f32
    %66 = vector.broadcast %cst_37 : f32 to vector<8x128xf32>
    %67 = arith.addf %66, %65 : vector<8x128xf32>
    %68 = arith.divf %66, %67 : vector<8x128xf32>
    %69 = vector.extract_strided_slice %56 {offsets = [0, 256], sizes = [8, 128], strides = [1, 1]} : vector<8x512xf32> to vector<8x128xf32>
    %70 = math.tanh %69 : vector<8x128xf32>
    %71 = vector.extract_strided_slice %56 {offsets = [0, 384], sizes = [8, 128], strides = [1, 1]} : vector<8x512xf32> to vector<8x128xf32>
    %72 = arith.negf %71 : vector<8x128xf32>
    %73 = math.exp %72 : vector<8x128xf32>
    %cst_38 = arith.constant 1.000000e+00 : f32
    %74 = vector.broadcast %cst_38 : f32 to vector<8x128xf32>
    %75 = arith.addf %74, %73 : vector<8x128xf32>
    %76 = arith.divf %74, %75 : vector<8x128xf32>
    %c0_39 = arith.constant 0 : index
    %c0_40 = arith.constant 0 : index
    %77 = vector.load %arg14[%c0_39, %c0_40] : memref<8x128xf32, #tpu.memory_space<vmem>>, vector<8x128xf32>
    %78 = arith.mulf %68, %77 : vector<8x128xf32>
    %79 = arith.mulf %62, %70 : vector<8x128xf32>
    %80 = arith.addf %78, %79 : vector<8x128xf32>
    %81 = math.tanh %80 : vector<8x128xf32>
    %82 = arith.mulf %76, %81 : vector<8x128xf32>
    %c0_41 = arith.constant 0 : index
    %c0_42 = arith.constant 0 : index
    %83 = vector.load %arg13[%c0_41, %c0_42] : memref<8x128xf32, #tpu.memory_space<vmem>>, vector<8x128xf32>
    tpu.vector_store %arg13[%c0_41, %c0_42], %82 {strides = array<i32>} : memref<8x128xf32, #tpu.memory_space<vmem>>, vector<8x128xf32>,
    %c0_43 = arith.constant 0 : index
    %c0_44 = arith.constant 0 : index
    %84 = vector.load %arg14[%c0_43, %c0_44] : memref<8x128xf32, #tpu.memory_space<vmem>>, vector<8x128xf32>
    tpu.vector_store %arg14[%c0_43, %c0_44], %80 {strides = array<i32>} : memref<8x128xf32, #tpu.memory_space<vmem>>, vector<8x128xf32>,
    %85 = arith.index_cast %50 : i32 to index
    %c0_45 = arith.constant 0 : index
    %86 = vector.load %arg12[%85, %c0_45] : memref<64x128xf32, #tpu.memory_space<vmem>>, vector<8x128xf32>
    tpu.vector_store %arg12[%85, %c0_45], %82 {strides = array<i32>} : memref<64x128xf32, #tpu.memory_space<vmem>>, vector<8x128xf32>,
    %c2_i32 = arith.constant 2 : i32
    %c8_i32_46 = arith.constant 8 : i32
    %87 = arith.muli %c2_i32, %c8_i32_46 : i32
    %88 = tpu.assume_multiple %87, 8 : i32
    %89 = arith.index_cast %88 : i32 to index
    %c0_47 = arith.constant 0 : index
    %90 = vector.load %arg11[%89, %c0_47] : memref<64x512xf32, #tpu.memory_space<vmem>>, vector<8x512xf32>
    %c0_48 = arith.constant 0 : index
    %c0_49 = arith.constant 0 : index
    %91 = vector.load %arg13[%c0_48, %c0_49] : memref<8x128xf32, #tpu.memory_space<vmem>>, vector<8x128xf32>
    %c0_50 = arith.constant 0 : index
    %c0_51 = arith.constant 0 : index
    %92 = vector.load %arg3[%c0_50, %c0_51] : memref<128x512xf32, #tpu.memory_space<vmem>>, vector<128x512xf32>
    %cst_52 = arith.constant dense<0.000000e+00> : vector<8x512xf32>
    %93 = tpu.matmul %91, %92, %cst_52 {dimension_numbers = #tpu.dot_dimension_numbers<[1], [0], [0], [1], [0, 0, 1, 1], [], []>} : vector<8x128xf32>, vector<128x512xf32>, vector<8x512xf32> -> vector<8x512xf32>
    %94 = arith.addf %90, %93 : vector<8x512xf32>
    %95 = vector.extract_strided_slice %94 {offsets = [0, 0], sizes = [8, 128], strides = [1, 1]} : vector<8x512xf32> to vector<8x128xf32>
    %96 = arith.negf %95 : vector<8x128xf32>
    %97 = math.exp %96 : vector<8x128xf32>
    %cst_53 = arith.constant 1.000000e+00 : f32
    %98 = vector.broadcast %cst_53 : f32 to vector<8x128xf32>
    %99 = arith.addf %98, %97 : vector<8x128xf32>
    %100 = arith.divf %98, %99 : vector<8x128xf32>
    %101 = vector.extract_strided_slice %94 {offsets = [0, 128], sizes = [8, 128], strides = [1, 1]} : vector<8x512xf32> to vector<8x128xf32>
    %102 = arith.negf %101 : vector<8x128xf32>
    %103 = math.exp %102 : vector<8x128xf32>
    %cst_54 = arith.constant 1.000000e+00 : f32
    %104 = vector.broadcast %cst_54 : f32 to vector<8x128xf32>
    %105 = arith.addf %104, %103 : vector<8x128xf32>
    %106 = arith.divf %104, %105 : vector<8x128xf32>
    %107 = vector.extract_strided_slice %94 {offsets = [0, 256], sizes = [8, 128], strides = [1, 1]} : vector<8x512xf32> to vector<8x128xf32>
    %108 = math.tanh %107 : vector<8x128xf32>
    %109 = vector.extract_strided_slice %94 {offsets = [0, 384], sizes = [8, 128], strides = [1, 1]} : vector<8x512xf32> to vector<8x128xf32>
    %110 = arith.negf %109 : vector<8x128xf32>
    %111 = math.exp %110 : vector<8x128xf32>
    %cst_55 = arith.constant 1.000000e+00 : f32
    %112 = vector.broadcast %cst_55 : f32 to vector<8x128xf32>
    %113 = arith.addf %112, %111 : vector<8x128xf32>
    %114 = arith.divf %112, %113 : vector<8x128xf32>
    %c0_56 = arith.constant 0 : index
    %c0_57 = arith.constant 0 : index
    %115 = vector.load %arg14[%c0_56, %c0_57] : memref<8x128xf32, #tpu.memory_space<vmem>>, vector<8x128xf32>
    %116 = arith.mulf %106, %115 : vector<8x128xf32>
    %117 = arith.mulf %100, %108 : vector<8x128xf32>
    %118 = arith.addf %116, %117 : vector<8x128xf32>
    %119 = math.tanh %118 : vector<8x128xf32>
    %120 = arith.mulf %114, %119 : vector<8x128xf32>
    %c0_58 = arith.constant 0 : index
    %c0_59 = arith.constant 0 : index
    %121 = vector.load %arg13[%c0_58, %c0_59] : memref<8x128xf32, #tpu.memory_space<vmem>>, vector<8x128xf32>
    tpu.vector_store %arg13[%c0_58, %c0_59], %120 {strides = array<i32>} : memref<8x128xf32, #tpu.memory_space<vmem>>, vector<8x128xf32>,
    %c0_60 = arith.constant 0 : index
    %c0_61 = arith.constant 0 : index
    %122 = vector.load %arg14[%c0_60, %c0_61] : memref<8x128xf32, #tpu.memory_space<vmem>>, vector<8x128xf32>
    tpu.vector_store %arg14[%c0_60, %c0_61], %118 {strides = array<i32>} : memref<8x128xf32, #tpu.memory_space<vmem>>, vector<8x128xf32>,
    %123 = arith.index_cast %88 : i32 to index
    %c0_62 = arith.constant 0 : index
    %124 = vector.load %arg12[%123, %c0_62] : memref<64x128xf32, #tpu.memory_space<vmem>>, vector<8x128xf32>
    tpu.vector_store %arg12[%123, %c0_62], %120 {strides = array<i32>} : memref<64x128xf32, #tpu.memory_space<vmem>>, vector<8x128xf32>,
    %c3_i32 = arith.constant 3 : i32
    %c8_i32_63 = arith.constant 8 : i32
    %125 = arith.muli %c3_i32, %c8_i32_63 : i32
    %126 = tpu.assume_multiple %125, 8 : i32
    %127 = arith.index_cast %126 : i32 to index
    %c0_64 = arith.constant 0 : index
    %128 = vector.load %arg11[%127, %c0_64] : memref<64x512xf32, #tpu.memory_space<vmem>>, vector<8x512xf32>
    %c0_65 = arith.constant 0 : index
    %c0_66 = arith.constant 0 : index
    %129 = vector.load %arg13[%c0_65, %c0_66] : memref<8x128xf32, #tpu.memory_space<vmem>>, vector<8x128xf32>
    %c0_67 = arith.constant 0 : index
    %c0_68 = arith.constant 0 : index
    %130 = vector.load %arg3[%c0_67, %c0_68] : memref<128x512xf32, #tpu.memory_space<vmem>>, vector<128x512xf32>
    %cst_69 = arith.constant dense<0.000000e+00> : vector<8x512xf32>
    %131 = tpu.matmul %129, %130, %cst_69 {dimension_numbers = #tpu.dot_dimension_numbers<[1], [0], [0], [1], [0, 0, 1, 1], [], []>} : vector<8x128xf32>, vector<128x512xf32>, vector<8x512xf32> -> vector<8x512xf32>
    %132 = arith.addf %128, %131 : vector<8x512xf32>
    %133 = vector.extract_strided_slice %132 {offsets = [0, 0], sizes = [8, 128], strides = [1, 1]} : vector<8x512xf32> to vector<8x128xf32>
    %134 = arith.negf %133 : vector<8x128xf32>
    %135 = math.exp %134 : vector<8x128xf32>
    %cst_70 = arith.constant 1.000000e+00 : f32
    %136 = vector.broadcast %cst_70 : f32 to vector<8x128xf32>
    %137 = arith.addf %136, %135 : vector<8x128xf32>
    %138 = arith.divf %136, %137 : vector<8x128xf32>
    %139 = vector.extract_strided_slice %132 {offsets = [0, 128], sizes = [8, 128], strides = [1, 1]} : vector<8x512xf32> to vector<8x128xf32>
    %140 = arith.negf %139 : vector<8x128xf32>
    %141 = math.exp %140 : vector<8x128xf32>
    %cst_71 = arith.constant 1.000000e+00 : f32
    %142 = vector.broadcast %cst_71 : f32 to vector<8x128xf32>
    %143 = arith.addf %142, %141 : vector<8x128xf32>
    %144 = arith.divf %142, %143 : vector<8x128xf32>
    %145 = vector.extract_strided_slice %132 {offsets = [0, 256], sizes = [8, 128], strides = [1, 1]} : vector<8x512xf32> to vector<8x128xf32>
    %146 = math.tanh %145 : vector<8x128xf32>
    %147 = vector.extract_strided_slice %132 {offsets = [0, 384], sizes = [8, 128], strides = [1, 1]} : vector<8x512xf32> to vector<8x128xf32>
    %148 = arith.negf %147 : vector<8x128xf32>
    %149 = math.exp %148 : vector<8x128xf32>
    %cst_72 = arith.constant 1.000000e+00 : f32
    %150 = vector.broadcast %cst_72 : f32 to vector<8x128xf32>
    %151 = arith.addf %150, %149 : vector<8x128xf32>
    %152 = arith.divf %150, %151 : vector<8x128xf32>
    %c0_73 = arith.constant 0 : index
    %c0_74 = arith.constant 0 : index
    %153 = vector.load %arg14[%c0_73, %c0_74] : memref<8x128xf32, #tpu.memory_space<vmem>>, vector<8x128xf32>
    %154 = arith.mulf %144, %153 : vector<8x128xf32>
    %155 = arith.mulf %138, %146 : vector<8x128xf32>
    %156 = arith.addf %154, %155 : vector<8x128xf32>
    %157 = math.tanh %156 : vector<8x128xf32>
    %158 = arith.mulf %152, %157 : vector<8x128xf32>
    %c0_75 = arith.constant 0 : index
    %c0_76 = arith.constant 0 : index
    %159 = vector.load %arg13[%c0_75, %c0_76] : memref<8x128xf32, #tpu.memory_space<vmem>>, vector<8x128xf32>
    tpu.vector_store %arg13[%c0_75, %c0_76], %158 {strides = array<i32>} : memref<8x128xf32, #tpu.memory_space<vmem>>, vector<8x128xf32>,
    %c0_77 = arith.constant 0 : index
    %c0_78 = arith.constant 0 : index
    %160 = vector.load %arg14[%c0_77, %c0_78] : memref<8x128xf32, #tpu.memory_space<vmem>>, vector<8x128xf32>
    tpu.vector_store %arg14[%c0_77, %c0_78], %156 {strides = array<i32>} : memref<8x128xf32, #tpu.memory_space<vmem>>, vector<8x128xf32>,
    %161 = arith.index_cast %126 : i32 to index
    %c0_79 = arith.constant 0 : index
    %162 = vector.load %arg12[%161, %c0_79] : memref<64x128xf32, #tpu.memory_space<vmem>>, vector<8x128xf32>
    tpu.vector_store %arg12[%161, %c0_79], %158 {strides = array<i32>} : memref<64x128xf32, #tpu.memory_space<vmem>>, vector<8x128xf32>,
    %c4_i32 = arith.constant 4 : i32
    %c8_i32_80 = arith.constant 8 : i32
    %163 = arith.muli %c4_i32, %c8_i32_80 : i32
    %164 = tpu.assume_multiple %163, 8 : i32
    %165 = arith.index_cast %164 : i32 to index
    %c0_81 = arith.constant 0 : index
    %166 = vector.load %arg11[%165, %c0_81] : memref<64x512xf32, #tpu.memory_space<vmem>>, vector<8x512xf32>
    %c0_82 = arith.constant 0 : index
    %c0_83 = arith.constant 0 : index
    %167 = vector.load %arg13[%c0_82, %c0_83] : memref<8x128xf32, #tpu.memory_space<vmem>>, vector<8x128xf32>
    %c0_84 = arith.constant 0 : index
    %c0_85 = arith.constant 0 : index
    %168 = vector.load %arg3[%c0_84, %c0_85] : memref<128x512xf32, #tpu.memory_space<vmem>>, vector<128x512xf32>
    %cst_86 = arith.constant dense<0.000000e+00> : vector<8x512xf32>
    %169 = tpu.matmul %167, %168, %cst_86 {dimension_numbers = #tpu.dot_dimension_numbers<[1], [0], [0], [1], [0, 0, 1, 1], [], []>} : vector<8x128xf32>, vector<128x512xf32>, vector<8x512xf32> -> vector<8x512xf32>
    %170 = arith.addf %166, %169 : vector<8x512xf32>
    %171 = vector.extract_strided_slice %170 {offsets = [0, 0], sizes = [8, 128], strides = [1, 1]} : vector<8x512xf32> to vector<8x128xf32>
    %172 = arith.negf %171 : vector<8x128xf32>
    %173 = math.exp %172 : vector<8x128xf32>
    %cst_87 = arith.constant 1.000000e+00 : f32
    %174 = vector.broadcast %cst_87 : f32 to vector<8x128xf32>
    %175 = arith.addf %174, %173 : vector<8x128xf32>
    %176 = arith.divf %174, %175 : vector<8x128xf32>
    %177 = vector.extract_strided_slice %170 {offsets = [0, 128], sizes = [8, 128], strides = [1, 1]} : vector<8x512xf32> to vector<8x128xf32>
    %178 = arith.negf %177 : vector<8x128xf32>
    %179 = math.exp %178 : vector<8x128xf32>
    %cst_88 = arith.constant 1.000000e+00 : f32
    %180 = vector.broadcast %cst_88 : f32 to vector<8x128xf32>
    %181 = arith.addf %180, %179 : vector<8x128xf32>
    %182 = arith.divf %180, %181 : vector<8x128xf32>
    %183 = vector.extract_strided_slice %170 {offsets = [0, 256], sizes = [8, 128], strides = [1, 1]} : vector<8x512xf32> to vector<8x128xf32>
    %184 = math.tanh %183 : vector<8x128xf32>
    %185 = vector.extract_strided_slice %170 {offsets = [0, 384], sizes = [8, 128], strides = [1, 1]} : vector<8x512xf32> to vector<8x128xf32>
    %186 = arith.negf %185 : vector<8x128xf32>
    %187 = math.exp %186 : vector<8x128xf32>
    %cst_89 = arith.constant 1.000000e+00 : f32
    %188 = vector.broadcast %cst_89 : f32 to vector<8x128xf32>
    %189 = arith.addf %188, %187 : vector<8x128xf32>
    %190 = arith.divf %188, %189 : vector<8x128xf32>
    %c0_90 = arith.constant 0 : index
    %c0_91 = arith.constant 0 : index
    %191 = vector.load %arg14[%c0_90, %c0_91] : memref<8x128xf32, #tpu.memory_space<vmem>>, vector<8x128xf32>
    %192 = arith.mulf %182, %191 : vector<8x128xf32>
    %193 = arith.mulf %176, %184 : vector<8x128xf32>
    %194 = arith.addf %192, %193 : vector<8x128xf32>
    %195 = math.tanh %194 : vector<8x128xf32>
    %196 = arith.mulf %190, %195 : vector<8x128xf32>
    %c0_92 = arith.constant 0 : index
    %c0_93 = arith.constant 0 : index
    %197 = vector.load %arg13[%c0_92, %c0_93] : memref<8x128xf32, #tpu.memory_space<vmem>>, vector<8x128xf32>
    tpu.vector_store %arg13[%c0_92, %c0_93], %196 {strides = array<i32>} : memref<8x128xf32, #tpu.memory_space<vmem>>, vector<8x128xf32>,
    %c0_94 = arith.constant 0 : index
    %c0_95 = arith.constant 0 : index
    %198 = vector.load %arg14[%c0_94, %c0_95] : memref<8x128xf32, #tpu.memory_space<vmem>>, vector<8x128xf32>
    tpu.vector_store %arg14[%c0_94, %c0_95], %194 {strides = array<i32>} : memref<8x128xf32, #tpu.memory_space<vmem>>, vector<8x128xf32>,
    %199 = arith.index_cast %164 : i32 to index
    %c0_96 = arith.constant 0 : index
    %200 = vector.load %arg12[%199, %c0_96] : memref<64x128xf32, #tpu.memory_space<vmem>>, vector<8x128xf32>
    tpu.vector_store %arg12[%199, %c0_96], %196 {strides = array<i32>} : memref<64x128xf32, #tpu.memory_space<vmem>>, vector<8x128xf32>,
    %c5_i32 = arith.constant 5 : i32
    %c8_i32_97 = arith.constant 8 : i32
    %201 = arith.muli %c5_i32, %c8_i32_97 : i32
    %202 = tpu.assume_multiple %201, 8 : i32
    %203 = arith.index_cast %202 : i32 to index
    %c0_98 = arith.constant 0 : index
    %204 = vector.load %arg11[%203, %c0_98] : memref<64x512xf32, #tpu.memory_space<vmem>>, vector<8x512xf32>
    %c0_99 = arith.constant 0 : index
    %c0_100 = arith.constant 0 : index
    %205 = vector.load %arg13[%c0_99, %c0_100] : memref<8x128xf32, #tpu.memory_space<vmem>>, vector<8x128xf32>
    %c0_101 = arith.constant 0 : index
    %c0_102 = arith.constant 0 : index
    %206 = vector.load %arg3[%c0_101, %c0_102] : memref<128x512xf32, #tpu.memory_space<vmem>>, vector<128x512xf32>
    %cst_103 = arith.constant dense<0.000000e+00> : vector<8x512xf32>
    %207 = tpu.matmul %205, %206, %cst_103 {dimension_numbers = #tpu.dot_dimension_numbers<[1], [0], [0], [1], [0, 0, 1, 1], [], []>} : vector<8x128xf32>, vector<128x512xf32>, vector<8x512xf32> -> vector<8x512xf32>
    %208 = arith.addf %204, %207 : vector<8x512xf32>
    %209 = vector.extract_strided_slice %208 {offsets = [0, 0], sizes = [8, 128], strides = [1, 1]} : vector<8x512xf32> to vector<8x128xf32>
    %210 = arith.negf %209 : vector<8x128xf32>
    %211 = math.exp %210 : vector<8x128xf32>
    %cst_104 = arith.constant 1.000000e+00 : f32
    %212 = vector.broadcast %cst_104 : f32 to vector<8x128xf32>
    %213 = arith.addf %212, %211 : vector<8x128xf32>
    %214 = arith.divf %212, %213 : vector<8x128xf32>
    %215 = vector.extract_strided_slice %208 {offsets = [0, 128], sizes = [8, 128], strides = [1, 1]} : vector<8x512xf32> to vector<8x128xf32>
    %216 = arith.negf %215 : vector<8x128xf32>
    %217 = math.exp %216 : vector<8x128xf32>
    %cst_105 = arith.constant 1.000000e+00 : f32
    %218 = vector.broadcast %cst_105 : f32 to vector<8x128xf32>
    %219 = arith.addf %218, %217 : vector<8x128xf32>
    %220 = arith.divf %218, %219 : vector<8x128xf32>
    %221 = vector.extract_strided_slice %208 {offsets = [0, 256], sizes = [8, 128], strides = [1, 1]} : vector<8x512xf32> to vector<8x128xf32>
    %222 = math.tanh %221 : vector<8x128xf32>
    %223 = vector.extract_strided_slice %208 {offsets = [0, 384], sizes = [8, 128], strides = [1, 1]} : vector<8x512xf32> to vector<8x128xf32>
    %224 = arith.negf %223 : vector<8x128xf32>
    %225 = math.exp %224 : vector<8x128xf32>
    %cst_106 = arith.constant 1.000000e+00 : f32
    %226 = vector.broadcast %cst_106 : f32 to vector<8x128xf32>
    %227 = arith.addf %226, %225 : vector<8x128xf32>
    %228 = arith.divf %226, %227 : vector<8x128xf32>
    %c0_107 = arith.constant 0 : index
    %c0_108 = arith.constant 0 : index
    %229 = vector.load %arg14[%c0_107, %c0_108] : memref<8x128xf32, #tpu.memory_space<vmem>>, vector<8x128xf32>
    %230 = arith.mulf %220, %229 : vector<8x128xf32>
    %231 = arith.mulf %214, %222 : vector<8x128xf32>
    %232 = arith.addf %230, %231 : vector<8x128xf32>
    %233 = math.tanh %232 : vector<8x128xf32>
    %234 = arith.mulf %228, %233 : vector<8x128xf32>
    %c0_109 = arith.constant 0 : index
    %c0_110 = arith.constant 0 : index
    %235 = vector.load %arg13[%c0_109, %c0_110] : memref<8x128xf32, #tpu.memory_space<vmem>>, vector<8x128xf32>
    tpu.vector_store %arg13[%c0_109, %c0_110], %234 {strides = array<i32>} : memref<8x128xf32, #tpu.memory_space<vmem>>, vector<8x128xf32>,
    %c0_111 = arith.constant 0 : index
    %c0_112 = arith.constant 0 : index
    %236 = vector.load %arg14[%c0_111, %c0_112] : memref<8x128xf32, #tpu.memory_space<vmem>>, vector<8x128xf32>
    tpu.vector_store %arg14[%c0_111, %c0_112], %232 {strides = array<i32>} : memref<8x128xf32, #tpu.memory_space<vmem>>, vector<8x128xf32>,
    %237 = arith.index_cast %202 : i32 to index
    %c0_113 = arith.constant 0 : index
    %238 = vector.load %arg12[%237, %c0_113] : memref<64x128xf32, #tpu.memory_space<vmem>>, vector<8x128xf32>
    tpu.vector_store %arg12[%237, %c0_113], %234 {strides = array<i32>} : memref<64x128xf32, #tpu.memory_space<vmem>>, vector<8x128xf32>,
    %c6_i32 = arith.constant 6 : i32
    %c8_i32_114 = arith.constant 8 : i32
    %239 = arith.muli %c6_i32, %c8_i32_114 : i32
    %240 = tpu.assume_multiple %239, 8 : i32
    %241 = arith.index_cast %240 : i32 to index
    %c0_115 = arith.constant 0 : index
    %242 = vector.load %arg11[%241, %c0_115] : memref<64x512xf32, #tpu.memory_space<vmem>>, vector<8x512xf32>
    %c0_116 = arith.constant 0 : index
    %c0_117 = arith.constant 0 : index
    %243 = vector.load %arg13[%c0_116, %c0_117] : memref<8x128xf32, #tpu.memory_space<vmem>>, vector<8x128xf32>
    %c0_118 = arith.constant 0 : index
    %c0_119 = arith.constant 0 : index
    %244 = vector.load %arg3[%c0_118, %c0_119] : memref<128x512xf32, #tpu.memory_space<vmem>>, vector<128x512xf32>
    %cst_120 = arith.constant dense<0.000000e+00> : vector<8x512xf32>
    %245 = tpu.matmul %243, %244, %cst_120 {dimension_numbers = #tpu.dot_dimension_numbers<[1], [0], [0], [1], [0, 0, 1, 1], [], []>} : vector<8x128xf32>, vector<128x512xf32>, vector<8x512xf32> -> vector<8x512xf32>
    %246 = arith.addf %242, %245 : vector<8x512xf32>
    %247 = vector.extract_strided_slice %246 {offsets = [0, 0], sizes = [8, 128], strides = [1, 1]} : vector<8x512xf32> to vector<8x128xf32>
    %248 = arith.negf %247 : vector<8x128xf32>
    %249 = math.exp %248 : vector<8x128xf32>
    %cst_121 = arith.constant 1.000000e+00 : f32
    %250 = vector.broadcast %cst_121 : f32 to vector<8x128xf32>
    %251 = arith.addf %250, %249 : vector<8x128xf32>
    %252 = arith.divf %250, %251 : vector<8x128xf32>
    %253 = vector.extract_strided_slice %246 {offsets = [0, 128], sizes = [8, 128], strides = [1, 1]} : vector<8x512xf32> to vector<8x128xf32>
    %254 = arith.negf %253 : vector<8x128xf32>
    %255 = math.exp %254 : vector<8x128xf32>
    %cst_122 = arith.constant 1.000000e+00 : f32
    %256 = vector.broadcast %cst_122 : f32 to vector<8x128xf32>
    %257 = arith.addf %256, %255 : vector<8x128xf32>
    %258 = arith.divf %256, %257 : vector<8x128xf32>
    %259 = vector.extract_strided_slice %246 {offsets = [0, 256], sizes = [8, 128], strides = [1, 1]} : vector<8x512xf32> to vector<8x128xf32>
    %260 = math.tanh %259 : vector<8x128xf32>
    %261 = vector.extract_strided_slice %246 {offsets = [0, 384], sizes = [8, 128], strides = [1, 1]} : vector<8x512xf32> to vector<8x128xf32>
    %262 = arith.negf %261 : vector<8x128xf32>
    %263 = math.exp %262 : vector<8x128xf32>
    %cst_123 = arith.constant 1.000000e+00 : f32
    %264 = vector.broadcast %cst_123 : f32 to vector<8x128xf32>
    %265 = arith.addf %264, %263 : vector<8x128xf32>
    %266 = arith.divf %264, %265 : vector<8x128xf32>
    %c0_124 = arith.constant 0 : index
    %c0_125 = arith.constant 0 : index
    %267 = vector.load %arg14[%c0_124, %c0_125] : memref<8x128xf32, #tpu.memory_space<vmem>>, vector<8x128xf32>
    %268 = arith.mulf %258, %267 : vector<8x128xf32>
    %269 = arith.mulf %252, %260 : vector<8x128xf32>
    %270 = arith.addf %268, %269 : vector<8x128xf32>
    %271 = math.tanh %270 : vector<8x128xf32>
    %272 = arith.mulf %266, %271 : vector<8x128xf32>
    %c0_126 = arith.constant 0 : index
    %c0_127 = arith.constant 0 : index
    %273 = vector.load %arg13[%c0_126, %c0_127] : memref<8x128xf32, #tpu.memory_space<vmem>>, vector<8x128xf32>
    tpu.vector_store %arg13[%c0_126, %c0_127], %272 {strides = array<i32>} : memref<8x128xf32, #tpu.memory_space<vmem>>, vector<8x128xf32>,
    %c0_128 = arith.constant 0 : index
    %c0_129 = arith.constant 0 : index
    %274 = vector.load %arg14[%c0_128, %c0_129] : memref<8x128xf32, #tpu.memory_space<vmem>>, vector<8x128xf32>
    tpu.vector_store %arg14[%c0_128, %c0_129], %270 {strides = array<i32>} : memref<8x128xf32, #tpu.memory_space<vmem>>, vector<8x128xf32>,
    %275 = arith.index_cast %240 : i32 to index
    %c0_130 = arith.constant 0 : index
    %276 = vector.load %arg12[%275, %c0_130] : memref<64x128xf32, #tpu.memory_space<vmem>>, vector<8x128xf32>
    tpu.vector_store %arg12[%275, %c0_130], %272 {strides = array<i32>} : memref<64x128xf32, #tpu.memory_space<vmem>>, vector<8x128xf32>,
    %c7_i32 = arith.constant 7 : i32
    %c8_i32_131 = arith.constant 8 : i32
    %277 = arith.muli %c7_i32, %c8_i32_131 : i32
    %278 = tpu.assume_multiple %277, 8 : i32
    %279 = arith.index_cast %278 : i32 to index
    %c0_132 = arith.constant 0 : index
    %280 = vector.load %arg11[%279, %c0_132] : memref<64x512xf32, #tpu.memory_space<vmem>>, vector<8x512xf32>
    %c0_133 = arith.constant 0 : index
    %c0_134 = arith.constant 0 : index
    %281 = vector.load %arg13[%c0_133, %c0_134] : memref<8x128xf32, #tpu.memory_space<vmem>>, vector<8x128xf32>
    %c0_135 = arith.constant 0 : index
    %c0_136 = arith.constant 0 : index
    %282 = vector.load %arg3[%c0_135, %c0_136] : memref<128x512xf32, #tpu.memory_space<vmem>>, vector<128x512xf32>
    %cst_137 = arith.constant dense<0.000000e+00> : vector<8x512xf32>
    %283 = tpu.matmul %281, %282, %cst_137 {dimension_numbers = #tpu.dot_dimension_numbers<[1], [0], [0], [1], [0, 0, 1, 1], [], []>} : vector<8x128xf32>, vector<128x512xf32>, vector<8x512xf32> -> vector<8x512xf32>
    %284 = arith.addf %280, %283 : vector<8x512xf32>
    %285 = vector.extract_strided_slice %284 {offsets = [0, 0], sizes = [8, 128], strides = [1, 1]} : vector<8x512xf32> to vector<8x128xf32>
    %286 = arith.negf %285 : vector<8x128xf32>
    %287 = math.exp %286 : vector<8x128xf32>
    %cst_138 = arith.constant 1.000000e+00 : f32
    %288 = vector.broadcast %cst_138 : f32 to vector<8x128xf32>
    %289 = arith.addf %288, %287 : vector<8x128xf32>
    %290 = arith.divf %288, %289 : vector<8x128xf32>
    %291 = vector.extract_strided_slice %284 {offsets = [0, 128], sizes = [8, 128], strides = [1, 1]} : vector<8x512xf32> to vector<8x128xf32>
    %292 = arith.negf %291 : vector<8x128xf32>
    %293 = math.exp %292 : vector<8x128xf32>
    %cst_139 = arith.constant 1.000000e+00 : f32
    %294 = vector.broadcast %cst_139 : f32 to vector<8x128xf32>
    %295 = arith.addf %294, %293 : vector<8x128xf32>
    %296 = arith.divf %294, %295 : vector<8x128xf32>
    %297 = vector.extract_strided_slice %284 {offsets = [0, 256], sizes = [8, 128], strides = [1, 1]} : vector<8x512xf32> to vector<8x128xf32>
    %298 = math.tanh %297 : vector<8x128xf32>
    %299 = vector.extract_strided_slice %284 {offsets = [0, 384], sizes = [8, 128], strides = [1, 1]} : vector<8x512xf32> to vector<8x128xf32>
    %300 = arith.negf %299 : vector<8x128xf32>
    %301 = math.exp %300 : vector<8x128xf32>
    %cst_140 = arith.constant 1.000000e+00 : f32
    %302 = vector.broadcast %cst_140 : f32 to vector<8x128xf32>
    %303 = arith.addf %302, %301 : vector<8x128xf32>
    %304 = arith.divf %302, %303 : vector<8x128xf32>
    %c0_141 = arith.constant 0 : index
    %c0_142 = arith.constant 0 : index
    %305 = vector.load %arg14[%c0_141, %c0_142] : memref<8x128xf32, #tpu.memory_space<vmem>>, vector<8x128xf32>
    %306 = arith.mulf %296, %305 : vector<8x128xf32>
    %307 = arith.mulf %290, %298 : vector<8x128xf32>
    %308 = arith.addf %306, %307 : vector<8x128xf32>
    %309 = math.tanh %308 : vector<8x128xf32>
    %310 = arith.mulf %304, %309 : vector<8x128xf32>
    %c0_143 = arith.constant 0 : index
    %c0_144 = arith.constant 0 : index
    %311 = vector.load %arg13[%c0_143, %c0_144] : memref<8x128xf32, #tpu.memory_space<vmem>>, vector<8x128xf32>
    tpu.vector_store %arg13[%c0_143, %c0_144], %310 {strides = array<i32>} : memref<8x128xf32, #tpu.memory_space<vmem>>, vector<8x128xf32>,
    %c0_145 = arith.constant 0 : index
    %c0_146 = arith.constant 0 : index
    %312 = vector.load %arg14[%c0_145, %c0_146] : memref<8x128xf32, #tpu.memory_space<vmem>>, vector<8x128xf32>
    tpu.vector_store %arg14[%c0_145, %c0_146], %308 {strides = array<i32>} : memref<8x128xf32, #tpu.memory_space<vmem>>, vector<8x128xf32>,
    %313 = arith.index_cast %278 : i32 to index
    %c0_147 = arith.constant 0 : index
    %314 = vector.load %arg12[%313, %c0_147] : memref<64x128xf32, #tpu.memory_space<vmem>>, vector<8x128xf32>
    tpu.vector_store %arg12[%313, %c0_147], %310 {strides = array<i32>} : memref<64x128xf32, #tpu.memory_space<vmem>>, vector<8x128xf32>,
    %c8_i32_148 = arith.constant 8 : i32
    %c0_149 = arith.constant 0 : index
    %c0_150 = arith.constant 0 : index
    %315 = vector.load %arg12[%c0_149, %c0_150] : memref<64x128xf32, #tpu.memory_space<vmem>>, vector<64x128xf32>
    %c0_151 = arith.constant 0 : index
    %c0_152 = arith.constant 0 : index
    %316 = vector.load %arg5[%c0_151, %c0_152] : memref<128x512xf32, #tpu.memory_space<vmem>>, vector<128x512xf32>
    %cst_153 = arith.constant dense<0.000000e+00> : vector<64x512xf32>
    %317 = tpu.matmul %315, %316, %cst_153 {dimension_numbers = #tpu.dot_dimension_numbers<[1], [0], [0], [1], [0, 0, 1, 1], [], []>} : vector<64x128xf32>, vector<128x512xf32>, vector<64x512xf32> -> vector<64x512xf32>
    %c0_154 = arith.constant 0 : index
    %c0_155 = arith.constant 0 : index
    %318 = vector.load %arg7[%c0_154, %c0_155] : memref<1x512xf32, #tpu.memory_space<vmem>>, vector<1x512xf32>
    %319 = vector.broadcast %318 : vector<1x512xf32> to vector<64x512xf32>
    %320 = arith.addf %317, %319 : vector<64x512xf32>
    %c0_156 = arith.constant 0 : index
    %c0_157 = arith.constant 0 : index
    %321 = vector.load %arg11[%c0_156, %c0_157] : memref<64x512xf32, #tpu.memory_space<vmem>>, vector<64x512xf32>
    tpu.vector_store %arg11[%c0_156, %c0_157], %320 {strides = array<i32>} : memref<64x512xf32, #tpu.memory_space<vmem>>, vector<64x512xf32>,
    %cst_158 = arith.constant 0.000000e+00 : f32
    %322 = vector.broadcast %cst_158 : f32 to vector<8x128xf32>
    %c0_159 = arith.constant 0 : index
    %c0_160 = arith.constant 0 : index
    %323 = vector.load %arg13[%c0_159, %c0_160] : memref<8x128xf32, #tpu.memory_space<vmem>>, vector<8x128xf32>
    tpu.vector_store %arg13[%c0_159, %c0_160], %322 {strides = array<i32>} : memref<8x128xf32, #tpu.memory_space<vmem>>, vector<8x128xf32>,
    %cst_161 = arith.constant 0.000000e+00 : f32
    %324 = vector.broadcast %cst_161 : f32 to vector<8x128xf32>
    %c0_162 = arith.constant 0 : index
    %c0_163 = arith.constant 0 : index
    %325 = vector.load %arg14[%c0_162, %c0_163] : memref<8x128xf32, #tpu.memory_space<vmem>>, vector<8x128xf32>
    tpu.vector_store %arg14[%c0_162, %c0_163], %324 {strides = array<i32>} : memref<8x128xf32, #tpu.memory_space<vmem>>, vector<8x128xf32>,
    %c0_i32_164 = arith.constant 0 : i32
    %c8_i32_165 = arith.constant 8 : i32
    %326 = arith.muli %c0_i32_164, %c8_i32_165 : i32
    %327 = tpu.assume_multiple %326, 8 : i32
    %328 = arith.index_cast %327 : i32 to index
    %c0_166 = arith.constant 0 : index
    %329 = vector.load %arg11[%328, %c0_166] : memref<64x512xf32, #tpu.memory_space<vmem>>, vector<8x512xf32>
    %c0_167 = arith.constant 0 : index
    %c0_168 = arith.constant 0 : index
    %330 = vector.load %arg13[%c0_167, %c0_168] : memref<8x128xf32, #tpu.memory_space<vmem>>, vector<8x128xf32>
    %c0_169 = arith.constant 0 : index
    %c0_170 = arith.constant 0 : index
    %331 = vector.load %arg6[%c0_169, %c0_170] : memref<128x512xf32, #tpu.memory_space<vmem>>, vector<128x512xf32>
    %cst_171 = arith.constant dense<0.000000e+00> : vector<8x512xf32>
    %332 = tpu.matmul %330, %331, %cst_171 {dimension_numbers = #tpu.dot_dimension_numbers<[1], [0], [0], [1], [0, 0, 1, 1], [], []>} : vector<8x128xf32>, vector<128x512xf32>, vector<8x512xf32> -> vector<8x512xf32>
    %333 = arith.addf %329, %332 : vector<8x512xf32>
    %334 = vector.extract_strided_slice %333 {offsets = [0, 0], sizes = [8, 128], strides = [1, 1]} : vector<8x512xf32> to vector<8x128xf32>
    %335 = arith.negf %334 : vector<8x128xf32>
    %336 = math.exp %335 : vector<8x128xf32>
    %cst_172 = arith.constant 1.000000e+00 : f32
    %337 = vector.broadcast %cst_172 : f32 to vector<8x128xf32>
    %338 = arith.addf %337, %336 : vector<8x128xf32>
    %339 = arith.divf %337, %338 : vector<8x128xf32>
    %340 = vector.extract_strided_slice %333 {offsets = [0, 128], sizes = [8, 128], strides = [1, 1]} : vector<8x512xf32> to vector<8x128xf32>
    %341 = arith.negf %340 : vector<8x128xf32>
    %342 = math.exp %341 : vector<8x128xf32>
    %cst_173 = arith.constant 1.000000e+00 : f32
    %343 = vector.broadcast %cst_173 : f32 to vector<8x128xf32>
    %344 = arith.addf %343, %342 : vector<8x128xf32>
    %345 = arith.divf %343, %344 : vector<8x128xf32>
    %346 = vector.extract_strided_slice %333 {offsets = [0, 256], sizes = [8, 128], strides = [1, 1]} : vector<8x512xf32> to vector<8x128xf32>
    %347 = math.tanh %346 : vector<8x128xf32>
    %348 = vector.extract_strided_slice %333 {offsets = [0, 384], sizes = [8, 128], strides = [1, 1]} : vector<8x512xf32> to vector<8x128xf32>
    %349 = arith.negf %348 : vector<8x128xf32>
    %350 = math.exp %349 : vector<8x128xf32>
    %cst_174 = arith.constant 1.000000e+00 : f32
    %351 = vector.broadcast %cst_174 : f32 to vector<8x128xf32>
    %352 = arith.addf %351, %350 : vector<8x128xf32>
    %353 = arith.divf %351, %352 : vector<8x128xf32>
    %c0_175 = arith.constant 0 : index
    %c0_176 = arith.constant 0 : index
    %354 = vector.load %arg14[%c0_175, %c0_176] : memref<8x128xf32, #tpu.memory_space<vmem>>, vector<8x128xf32>
    %355 = arith.mulf %345, %354 : vector<8x128xf32>
    %356 = arith.mulf %339, %347 : vector<8x128xf32>
    %357 = arith.addf %355, %356 : vector<8x128xf32>
    %358 = math.tanh %357 : vector<8x128xf32>
    %359 = arith.mulf %353, %358 : vector<8x128xf32>
    %c0_177 = arith.constant 0 : index
    %c0_178 = arith.constant 0 : index
    %360 = vector.load %arg13[%c0_177, %c0_178] : memref<8x128xf32, #tpu.memory_space<vmem>>, vector<8x128xf32>
    tpu.vector_store %arg13[%c0_177, %c0_178], %359 {strides = array<i32>} : memref<8x128xf32, #tpu.memory_space<vmem>>, vector<8x128xf32>,
    %c0_179 = arith.constant 0 : index
    %c0_180 = arith.constant 0 : index
    %361 = vector.load %arg14[%c0_179, %c0_180] : memref<8x128xf32, #tpu.memory_space<vmem>>, vector<8x128xf32>
    tpu.vector_store %arg14[%c0_179, %c0_180], %357 {strides = array<i32>} : memref<8x128xf32, #tpu.memory_space<vmem>>, vector<8x128xf32>,
    %c1_i32_181 = arith.constant 1 : i32
    %c8_i32_182 = arith.constant 8 : i32
    %362 = arith.muli %c1_i32_181, %c8_i32_182 : i32
    %363 = tpu.assume_multiple %362, 8 : i32
    %364 = arith.index_cast %363 : i32 to index
    %c0_183 = arith.constant 0 : index
    %365 = vector.load %arg11[%364, %c0_183] : memref<64x512xf32, #tpu.memory_space<vmem>>, vector<8x512xf32>
    %c0_184 = arith.constant 0 : index
    %c0_185 = arith.constant 0 : index
    %366 = vector.load %arg13[%c0_184, %c0_185] : memref<8x128xf32, #tpu.memory_space<vmem>>, vector<8x128xf32>
    %c0_186 = arith.constant 0 : index
    %c0_187 = arith.constant 0 : index
    %367 = vector.load %arg6[%c0_186, %c0_187] : memref<128x512xf32, #tpu.memory_space<vmem>>, vector<128x512xf32>
    %cst_188 = arith.constant dense<0.000000e+00> : vector<8x512xf32>
    %368 = tpu.matmul %366, %367, %cst_188 {dimension_numbers = #tpu.dot_dimension_numbers<[1], [0], [0], [1], [0, 0, 1, 1], [], []>} : vector<8x128xf32>, vector<128x512xf32>, vector<8x512xf32> -> vector<8x512xf32>
    %369 = arith.addf %365, %368 : vector<8x512xf32>
    %370 = vector.extract_strided_slice %369 {offsets = [0, 0], sizes = [8, 128], strides = [1, 1]} : vector<8x512xf32> to vector<8x128xf32>
    %371 = arith.negf %370 : vector<8x128xf32>
    %372 = math.exp %371 : vector<8x128xf32>
    %cst_189 = arith.constant 1.000000e+00 : f32
    %373 = vector.broadcast %cst_189 : f32 to vector<8x128xf32>
    %374 = arith.addf %373, %372 : vector<8x128xf32>
    %375 = arith.divf %373, %374 : vector<8x128xf32>
    %376 = vector.extract_strided_slice %369 {offsets = [0, 128], sizes = [8, 128], strides = [1, 1]} : vector<8x512xf32> to vector<8x128xf32>
    %377 = arith.negf %376 : vector<8x128xf32>
    %378 = math.exp %377 : vector<8x128xf32>
    %cst_190 = arith.constant 1.000000e+00 : f32
    %379 = vector.broadcast %cst_190 : f32 to vector<8x128xf32>
    %380 = arith.addf %379, %378 : vector<8x128xf32>
    %381 = arith.divf %379, %380 : vector<8x128xf32>
    %382 = vector.extract_strided_slice %369 {offsets = [0, 256], sizes = [8, 128], strides = [1, 1]} : vector<8x512xf32> to vector<8x128xf32>
    %383 = math.tanh %382 : vector<8x128xf32>
    %384 = vector.extract_strided_slice %369 {offsets = [0, 384], sizes = [8, 128], strides = [1, 1]} : vector<8x512xf32> to vector<8x128xf32>
    %385 = arith.negf %384 : vector<8x128xf32>
    %386 = math.exp %385 : vector<8x128xf32>
    %cst_191 = arith.constant 1.000000e+00 : f32
    %387 = vector.broadcast %cst_191 : f32 to vector<8x128xf32>
    %388 = arith.addf %387, %386 : vector<8x128xf32>
    %389 = arith.divf %387, %388 : vector<8x128xf32>
    %c0_192 = arith.constant 0 : index
    %c0_193 = arith.constant 0 : index
    %390 = vector.load %arg14[%c0_192, %c0_193] : memref<8x128xf32, #tpu.memory_space<vmem>>, vector<8x128xf32>
    %391 = arith.mulf %381, %390 : vector<8x128xf32>
    %392 = arith.mulf %375, %383 : vector<8x128xf32>
    %393 = arith.addf %391, %392 : vector<8x128xf32>
    %394 = math.tanh %393 : vector<8x128xf32>
    %395 = arith.mulf %389, %394 : vector<8x128xf32>
    %c0_194 = arith.constant 0 : index
    %c0_195 = arith.constant 0 : index
    %396 = vector.load %arg13[%c0_194, %c0_195] : memref<8x128xf32, #tpu.memory_space<vmem>>, vector<8x128xf32>
    tpu.vector_store %arg13[%c0_194, %c0_195], %395 {strides = array<i32>} : memref<8x128xf32, #tpu.memory_space<vmem>>, vector<8x128xf32>,
    %c0_196 = arith.constant 0 : index
    %c0_197 = arith.constant 0 : index
    %397 = vector.load %arg14[%c0_196, %c0_197] : memref<8x128xf32, #tpu.memory_space<vmem>>, vector<8x128xf32>
    tpu.vector_store %arg14[%c0_196, %c0_197], %393 {strides = array<i32>} : memref<8x128xf32, #tpu.memory_space<vmem>>, vector<8x128xf32>,
    %c2_i32_198 = arith.constant 2 : i32
    %c8_i32_199 = arith.constant 8 : i32
    %398 = arith.muli %c2_i32_198, %c8_i32_199 : i32
    %399 = tpu.assume_multiple %398, 8 : i32
    %400 = arith.index_cast %399 : i32 to index
    %c0_200 = arith.constant 0 : index
    %401 = vector.load %arg11[%400, %c0_200] : memref<64x512xf32, #tpu.memory_space<vmem>>, vector<8x512xf32>
    %c0_201 = arith.constant 0 : index
    %c0_202 = arith.constant 0 : index
    %402 = vector.load %arg13[%c0_201, %c0_202] : memref<8x128xf32, #tpu.memory_space<vmem>>, vector<8x128xf32>
    %c0_203 = arith.constant 0 : index
    %c0_204 = arith.constant 0 : index
    %403 = vector.load %arg6[%c0_203, %c0_204] : memref<128x512xf32, #tpu.memory_space<vmem>>, vector<128x512xf32>
    %cst_205 = arith.constant dense<0.000000e+00> : vector<8x512xf32>
    %404 = tpu.matmul %402, %403, %cst_205 {dimension_numbers = #tpu.dot_dimension_numbers<[1], [0], [0], [1], [0, 0, 1, 1], [], []>} : vector<8x128xf32>, vector<128x512xf32>, vector<8x512xf32> -> vector<8x512xf32>
    %405 = arith.addf %401, %404 : vector<8x512xf32>
    %406 = vector.extract_strided_slice %405 {offsets = [0, 0], sizes = [8, 128], strides = [1, 1]} : vector<8x512xf32> to vector<8x128xf32>
    %407 = arith.negf %406 : vector<8x128xf32>
    %408 = math.exp %407 : vector<8x128xf32>
    %cst_206 = arith.constant 1.000000e+00 : f32
    %409 = vector.broadcast %cst_206 : f32 to vector<8x128xf32>
    %410 = arith.addf %409, %408 : vector<8x128xf32>
    %411 = arith.divf %409, %410 : vector<8x128xf32>
    %412 = vector.extract_strided_slice %405 {offsets = [0, 128], sizes = [8, 128], strides = [1, 1]} : vector<8x512xf32> to vector<8x128xf32>
    %413 = arith.negf %412 : vector<8x128xf32>
    %414 = math.exp %413 : vector<8x128xf32>
    %cst_207 = arith.constant 1.000000e+00 : f32
    %415 = vector.broadcast %cst_207 : f32 to vector<8x128xf32>
    %416 = arith.addf %415, %414 : vector<8x128xf32>
    %417 = arith.divf %415, %416 : vector<8x128xf32>
    %418 = vector.extract_strided_slice %405 {offsets = [0, 256], sizes = [8, 128], strides = [1, 1]} : vector<8x512xf32> to vector<8x128xf32>
    %419 = math.tanh %418 : vector<8x128xf32>
    %420 = vector.extract_strided_slice %405 {offsets = [0, 384], sizes = [8, 128], strides = [1, 1]} : vector<8x512xf32> to vector<8x128xf32>
    %421 = arith.negf %420 : vector<8x128xf32>
    %422 = math.exp %421 : vector<8x128xf32>
    %cst_208 = arith.constant 1.000000e+00 : f32
    %423 = vector.broadcast %cst_208 : f32 to vector<8x128xf32>
    %424 = arith.addf %423, %422 : vector<8x128xf32>
    %425 = arith.divf %423, %424 : vector<8x128xf32>
    %c0_209 = arith.constant 0 : index
    %c0_210 = arith.constant 0 : index
    %426 = vector.load %arg14[%c0_209, %c0_210] : memref<8x128xf32, #tpu.memory_space<vmem>>, vector<8x128xf32>
    %427 = arith.mulf %417, %426 : vector<8x128xf32>
    %428 = arith.mulf %411, %419 : vector<8x128xf32>
    %429 = arith.addf %427, %428 : vector<8x128xf32>
    %430 = math.tanh %429 : vector<8x128xf32>
    %431 = arith.mulf %425, %430 : vector<8x128xf32>
    %c0_211 = arith.constant 0 : index
    %c0_212 = arith.constant 0 : index
    %432 = vector.load %arg13[%c0_211, %c0_212] : memref<8x128xf32, #tpu.memory_space<vmem>>, vector<8x128xf32>
    tpu.vector_store %arg13[%c0_211, %c0_212], %431 {strides = array<i32>} : memref<8x128xf32, #tpu.memory_space<vmem>>, vector<8x128xf32>,
    %c0_213 = arith.constant 0 : index
    %c0_214 = arith.constant 0 : index
    %433 = vector.load %arg14[%c0_213, %c0_214] : memref<8x128xf32, #tpu.memory_space<vmem>>, vector<8x128xf32>
    tpu.vector_store %arg14[%c0_213, %c0_214], %429 {strides = array<i32>} : memref<8x128xf32, #tpu.memory_space<vmem>>, vector<8x128xf32>,
    %c3_i32_215 = arith.constant 3 : i32
    %c8_i32_216 = arith.constant 8 : i32
    %434 = arith.muli %c3_i32_215, %c8_i32_216 : i32
    %435 = tpu.assume_multiple %434, 8 : i32
    %436 = arith.index_cast %435 : i32 to index
    %c0_217 = arith.constant 0 : index
    %437 = vector.load %arg11[%436, %c0_217] : memref<64x512xf32, #tpu.memory_space<vmem>>, vector<8x512xf32>
    %c0_218 = arith.constant 0 : index
    %c0_219 = arith.constant 0 : index
    %438 = vector.load %arg13[%c0_218, %c0_219] : memref<8x128xf32, #tpu.memory_space<vmem>>, vector<8x128xf32>
    %c0_220 = arith.constant 0 : index
    %c0_221 = arith.constant 0 : index
    %439 = vector.load %arg6[%c0_220, %c0_221] : memref<128x512xf32, #tpu.memory_space<vmem>>, vector<128x512xf32>
    %cst_222 = arith.constant dense<0.000000e+00> : vector<8x512xf32>
    %440 = tpu.matmul %438, %439, %cst_222 {dimension_numbers = #tpu.dot_dimension_numbers<[1], [0], [0], [1], [0, 0, 1, 1], [], []>} : vector<8x128xf32>, vector<128x512xf32>, vector<8x512xf32> -> vector<8x512xf32>
    %441 = arith.addf %437, %440 : vector<8x512xf32>
    %442 = vector.extract_strided_slice %441 {offsets = [0, 0], sizes = [8, 128], strides = [1, 1]} : vector<8x512xf32> to vector<8x128xf32>
    %443 = arith.negf %442 : vector<8x128xf32>
    %444 = math.exp %443 : vector<8x128xf32>
    %cst_223 = arith.constant 1.000000e+00 : f32
    %445 = vector.broadcast %cst_223 : f32 to vector<8x128xf32>
    %446 = arith.addf %445, %444 : vector<8x128xf32>
    %447 = arith.divf %445, %446 : vector<8x128xf32>
    %448 = vector.extract_strided_slice %441 {offsets = [0, 128], sizes = [8, 128], strides = [1, 1]} : vector<8x512xf32> to vector<8x128xf32>
    %449 = arith.negf %448 : vector<8x128xf32>
    %450 = math.exp %449 : vector<8x128xf32>
    %cst_224 = arith.constant 1.000000e+00 : f32
    %451 = vector.broadcast %cst_224 : f32 to vector<8x128xf32>
    %452 = arith.addf %451, %450 : vector<8x128xf32>
    %453 = arith.divf %451, %452 : vector<8x128xf32>
    %454 = vector.extract_strided_slice %441 {offsets = [0, 256], sizes = [8, 128], strides = [1, 1]} : vector<8x512xf32> to vector<8x128xf32>
    %455 = math.tanh %454 : vector<8x128xf32>
    %456 = vector.extract_strided_slice %441 {offsets = [0, 384], sizes = [8, 128], strides = [1, 1]} : vector<8x512xf32> to vector<8x128xf32>
    %457 = arith.negf %456 : vector<8x128xf32>
    %458 = math.exp %457 : vector<8x128xf32>
    %cst_225 = arith.constant 1.000000e+00 : f32
    %459 = vector.broadcast %cst_225 : f32 to vector<8x128xf32>
    %460 = arith.addf %459, %458 : vector<8x128xf32>
    %461 = arith.divf %459, %460 : vector<8x128xf32>
    %c0_226 = arith.constant 0 : index
    %c0_227 = arith.constant 0 : index
    %462 = vector.load %arg14[%c0_226, %c0_227] : memref<8x128xf32, #tpu.memory_space<vmem>>, vector<8x128xf32>
    %463 = arith.mulf %453, %462 : vector<8x128xf32>
    %464 = arith.mulf %447, %455 : vector<8x128xf32>
    %465 = arith.addf %463, %464 : vector<8x128xf32>
    %466 = math.tanh %465 : vector<8x128xf32>
    %467 = arith.mulf %461, %466 : vector<8x128xf32>
    %c0_228 = arith.constant 0 : index
    %c0_229 = arith.constant 0 : index
    %468 = vector.load %arg13[%c0_228, %c0_229] : memref<8x128xf32, #tpu.memory_space<vmem>>, vector<8x128xf32>
    tpu.vector_store %arg13[%c0_228, %c0_229], %467 {strides = array<i32>} : memref<8x128xf32, #tpu.memory_space<vmem>>, vector<8x128xf32>,
    %c0_230 = arith.constant 0 : index
    %c0_231 = arith.constant 0 : index
    %469 = vector.load %arg14[%c0_230, %c0_231] : memref<8x128xf32, #tpu.memory_space<vmem>>, vector<8x128xf32>
    tpu.vector_store %arg14[%c0_230, %c0_231], %465 {strides = array<i32>} : memref<8x128xf32, #tpu.memory_space<vmem>>, vector<8x128xf32>,
    %c4_i32_232 = arith.constant 4 : i32
    %c8_i32_233 = arith.constant 8 : i32
    %470 = arith.muli %c4_i32_232, %c8_i32_233 : i32
    %471 = tpu.assume_multiple %470, 8 : i32
    %472 = arith.index_cast %471 : i32 to index
    %c0_234 = arith.constant 0 : index
    %473 = vector.load %arg11[%472, %c0_234] : memref<64x512xf32, #tpu.memory_space<vmem>>, vector<8x512xf32>
    %c0_235 = arith.constant 0 : index
    %c0_236 = arith.constant 0 : index
    %474 = vector.load %arg13[%c0_235, %c0_236] : memref<8x128xf32, #tpu.memory_space<vmem>>, vector<8x128xf32>
    %c0_237 = arith.constant 0 : index
    %c0_238 = arith.constant 0 : index
    %475 = vector.load %arg6[%c0_237, %c0_238] : memref<128x512xf32, #tpu.memory_space<vmem>>, vector<128x512xf32>
    %cst_239 = arith.constant dense<0.000000e+00> : vector<8x512xf32>
    %476 = tpu.matmul %474, %475, %cst_239 {dimension_numbers = #tpu.dot_dimension_numbers<[1], [0], [0], [1], [0, 0, 1, 1], [], []>} : vector<8x128xf32>, vector<128x512xf32>, vector<8x512xf32> -> vector<8x512xf32>
    %477 = arith.addf %473, %476 : vector<8x512xf32>
    %478 = vector.extract_strided_slice %477 {offsets = [0, 0], sizes = [8, 128], strides = [1, 1]} : vector<8x512xf32> to vector<8x128xf32>
    %479 = arith.negf %478 : vector<8x128xf32>
    %480 = math.exp %479 : vector<8x128xf32>
    %cst_240 = arith.constant 1.000000e+00 : f32
    %481 = vector.broadcast %cst_240 : f32 to vector<8x128xf32>
    %482 = arith.addf %481, %480 : vector<8x128xf32>
    %483 = arith.divf %481, %482 : vector<8x128xf32>
    %484 = vector.extract_strided_slice %477 {offsets = [0, 128], sizes = [8, 128], strides = [1, 1]} : vector<8x512xf32> to vector<8x128xf32>
    %485 = arith.negf %484 : vector<8x128xf32>
    %486 = math.exp %485 : vector<8x128xf32>
    %cst_241 = arith.constant 1.000000e+00 : f32
    %487 = vector.broadcast %cst_241 : f32 to vector<8x128xf32>
    %488 = arith.addf %487, %486 : vector<8x128xf32>
    %489 = arith.divf %487, %488 : vector<8x128xf32>
    %490 = vector.extract_strided_slice %477 {offsets = [0, 256], sizes = [8, 128], strides = [1, 1]} : vector<8x512xf32> to vector<8x128xf32>
    %491 = math.tanh %490 : vector<8x128xf32>
    %492 = vector.extract_strided_slice %477 {offsets = [0, 384], sizes = [8, 128], strides = [1, 1]} : vector<8x512xf32> to vector<8x128xf32>
    %493 = arith.negf %492 : vector<8x128xf32>
    %494 = math.exp %493 : vector<8x128xf32>
    %cst_242 = arith.constant 1.000000e+00 : f32
    %495 = vector.broadcast %cst_242 : f32 to vector<8x128xf32>
    %496 = arith.addf %495, %494 : vector<8x128xf32>
    %497 = arith.divf %495, %496 : vector<8x128xf32>
    %c0_243 = arith.constant 0 : index
    %c0_244 = arith.constant 0 : index
    %498 = vector.load %arg14[%c0_243, %c0_244] : memref<8x128xf32, #tpu.memory_space<vmem>>, vector<8x128xf32>
    %499 = arith.mulf %489, %498 : vector<8x128xf32>
    %500 = arith.mulf %483, %491 : vector<8x128xf32>
    %501 = arith.addf %499, %500 : vector<8x128xf32>
    %502 = math.tanh %501 : vector<8x128xf32>
    %503 = arith.mulf %497, %502 : vector<8x128xf32>
    %c0_245 = arith.constant 0 : index
    %c0_246 = arith.constant 0 : index
    %504 = vector.load %arg13[%c0_245, %c0_246] : memref<8x128xf32, #tpu.memory_space<vmem>>, vector<8x128xf32>
    tpu.vector_store %arg13[%c0_245, %c0_246], %503 {strides = array<i32>} : memref<8x128xf32, #tpu.memory_space<vmem>>, vector<8x128xf32>,
    %c0_247 = arith.constant 0 : index
    %c0_248 = arith.constant 0 : index
    %505 = vector.load %arg14[%c0_247, %c0_248] : memref<8x128xf32, #tpu.memory_space<vmem>>, vector<8x128xf32>
    tpu.vector_store %arg14[%c0_247, %c0_248], %501 {strides = array<i32>} : memref<8x128xf32, #tpu.memory_space<vmem>>, vector<8x128xf32>,
    %c5_i32_249 = arith.constant 5 : i32
    %c8_i32_250 = arith.constant 8 : i32
    %506 = arith.muli %c5_i32_249, %c8_i32_250 : i32
    %507 = tpu.assume_multiple %506, 8 : i32
    %508 = arith.index_cast %507 : i32 to index
    %c0_251 = arith.constant 0 : index
    %509 = vector.load %arg11[%508, %c0_251] : memref<64x512xf32, #tpu.memory_space<vmem>>, vector<8x512xf32>
    %c0_252 = arith.constant 0 : index
    %c0_253 = arith.constant 0 : index
    %510 = vector.load %arg13[%c0_252, %c0_253] : memref<8x128xf32, #tpu.memory_space<vmem>>, vector<8x128xf32>
    %c0_254 = arith.constant 0 : index
    %c0_255 = arith.constant 0 : index
    %511 = vector.load %arg6[%c0_254, %c0_255] : memref<128x512xf32, #tpu.memory_space<vmem>>, vector<128x512xf32>
    %cst_256 = arith.constant dense<0.000000e+00> : vector<8x512xf32>
    %512 = tpu.matmul %510, %511, %cst_256 {dimension_numbers = #tpu.dot_dimension_numbers<[1], [0], [0], [1], [0, 0, 1, 1], [], []>} : vector<8x128xf32>, vector<128x512xf32>, vector<8x512xf32> -> vector<8x512xf32>
    %513 = arith.addf %509, %512 : vector<8x512xf32>
    %514 = vector.extract_strided_slice %513 {offsets = [0, 0], sizes = [8, 128], strides = [1, 1]} : vector<8x512xf32> to vector<8x128xf32>
    %515 = arith.negf %514 : vector<8x128xf32>
    %516 = math.exp %515 : vector<8x128xf32>
    %cst_257 = arith.constant 1.000000e+00 : f32
    %517 = vector.broadcast %cst_257 : f32 to vector<8x128xf32>
    %518 = arith.addf %517, %516 : vector<8x128xf32>
    %519 = arith.divf %517, %518 : vector<8x128xf32>
    %520 = vector.extract_strided_slice %513 {offsets = [0, 128], sizes = [8, 128], strides = [1, 1]} : vector<8x512xf32> to vector<8x128xf32>
    %521 = arith.negf %520 : vector<8x128xf32>
    %522 = math.exp %521 : vector<8x128xf32>
    %cst_258 = arith.constant 1.000000e+00 : f32
    %523 = vector.broadcast %cst_258 : f32 to vector<8x128xf32>
    %524 = arith.addf %523, %522 : vector<8x128xf32>
    %525 = arith.divf %523, %524 : vector<8x128xf32>
    %526 = vector.extract_strided_slice %513 {offsets = [0, 256], sizes = [8, 128], strides = [1, 1]} : vector<8x512xf32> to vector<8x128xf32>
    %527 = math.tanh %526 : vector<8x128xf32>
    %528 = vector.extract_strided_slice %513 {offsets = [0, 384], sizes = [8, 128], strides = [1, 1]} : vector<8x512xf32> to vector<8x128xf32>
    %529 = arith.negf %528 : vector<8x128xf32>
    %530 = math.exp %529 : vector<8x128xf32>
    %cst_259 = arith.constant 1.000000e+00 : f32
    %531 = vector.broadcast %cst_259 : f32 to vector<8x128xf32>
    %532 = arith.addf %531, %530 : vector<8x128xf32>
    %533 = arith.divf %531, %532 : vector<8x128xf32>
    %c0_260 = arith.constant 0 : index
    %c0_261 = arith.constant 0 : index
    %534 = vector.load %arg14[%c0_260, %c0_261] : memref<8x128xf32, #tpu.memory_space<vmem>>, vector<8x128xf32>
    %535 = arith.mulf %525, %534 : vector<8x128xf32>
    %536 = arith.mulf %519, %527 : vector<8x128xf32>
    %537 = arith.addf %535, %536 : vector<8x128xf32>
    %538 = math.tanh %537 : vector<8x128xf32>
    %539 = arith.mulf %533, %538 : vector<8x128xf32>
    %c0_262 = arith.constant 0 : index
    %c0_263 = arith.constant 0 : index
    %540 = vector.load %arg13[%c0_262, %c0_263] : memref<8x128xf32, #tpu.memory_space<vmem>>, vector<8x128xf32>
    tpu.vector_store %arg13[%c0_262, %c0_263], %539 {strides = array<i32>} : memref<8x128xf32, #tpu.memory_space<vmem>>, vector<8x128xf32>,
    %c0_264 = arith.constant 0 : index
    %c0_265 = arith.constant 0 : index
    %541 = vector.load %arg14[%c0_264, %c0_265] : memref<8x128xf32, #tpu.memory_space<vmem>>, vector<8x128xf32>
    tpu.vector_store %arg14[%c0_264, %c0_265], %537 {strides = array<i32>} : memref<8x128xf32, #tpu.memory_space<vmem>>, vector<8x128xf32>,
    %c6_i32_266 = arith.constant 6 : i32
    %c8_i32_267 = arith.constant 8 : i32
    %542 = arith.muli %c6_i32_266, %c8_i32_267 : i32
    %543 = tpu.assume_multiple %542, 8 : i32
    %544 = arith.index_cast %543 : i32 to index
    %c0_268 = arith.constant 0 : index
    %545 = vector.load %arg11[%544, %c0_268] : memref<64x512xf32, #tpu.memory_space<vmem>>, vector<8x512xf32>
    %c0_269 = arith.constant 0 : index
    %c0_270 = arith.constant 0 : index
    %546 = vector.load %arg13[%c0_269, %c0_270] : memref<8x128xf32, #tpu.memory_space<vmem>>, vector<8x128xf32>
    %c0_271 = arith.constant 0 : index
    %c0_272 = arith.constant 0 : index
    %547 = vector.load %arg6[%c0_271, %c0_272] : memref<128x512xf32, #tpu.memory_space<vmem>>, vector<128x512xf32>
    %cst_273 = arith.constant dense<0.000000e+00> : vector<8x512xf32>
    %548 = tpu.matmul %546, %547, %cst_273 {dimension_numbers = #tpu.dot_dimension_numbers<[1], [0], [0], [1], [0, 0, 1, 1], [], []>} : vector<8x128xf32>, vector<128x512xf32>, vector<8x512xf32> -> vector<8x512xf32>
    %549 = arith.addf %545, %548 : vector<8x512xf32>
    %550 = vector.extract_strided_slice %549 {offsets = [0, 0], sizes = [8, 128], strides = [1, 1]} : vector<8x512xf32> to vector<8x128xf32>
    %551 = arith.negf %550 : vector<8x128xf32>
    %552 = math.exp %551 : vector<8x128xf32>
    %cst_274 = arith.constant 1.000000e+00 : f32
    %553 = vector.broadcast %cst_274 : f32 to vector<8x128xf32>
    %554 = arith.addf %553, %552 : vector<8x128xf32>
    %555 = arith.divf %553, %554 : vector<8x128xf32>
    %556 = vector.extract_strided_slice %549 {offsets = [0, 128], sizes = [8, 128], strides = [1, 1]} : vector<8x512xf32> to vector<8x128xf32>
    %557 = arith.negf %556 : vector<8x128xf32>
    %558 = math.exp %557 : vector<8x128xf32>
    %cst_275 = arith.constant 1.000000e+00 : f32
    %559 = vector.broadcast %cst_275 : f32 to vector<8x128xf32>
    %560 = arith.addf %559, %558 : vector<8x128xf32>
    %561 = arith.divf %559, %560 : vector<8x128xf32>
    %562 = vector.extract_strided_slice %549 {offsets = [0, 256], sizes = [8, 128], strides = [1, 1]} : vector<8x512xf32> to vector<8x128xf32>
    %563 = math.tanh %562 : vector<8x128xf32>
    %564 = vector.extract_strided_slice %549 {offsets = [0, 384], sizes = [8, 128], strides = [1, 1]} : vector<8x512xf32> to vector<8x128xf32>
    %565 = arith.negf %564 : vector<8x128xf32>
    %566 = math.exp %565 : vector<8x128xf32>
    %cst_276 = arith.constant 1.000000e+00 : f32
    %567 = vector.broadcast %cst_276 : f32 to vector<8x128xf32>
    %568 = arith.addf %567, %566 : vector<8x128xf32>
    %569 = arith.divf %567, %568 : vector<8x128xf32>
    %c0_277 = arith.constant 0 : index
    %c0_278 = arith.constant 0 : index
    %570 = vector.load %arg14[%c0_277, %c0_278] : memref<8x128xf32, #tpu.memory_space<vmem>>, vector<8x128xf32>
    %571 = arith.mulf %561, %570 : vector<8x128xf32>
    %572 = arith.mulf %555, %563 : vector<8x128xf32>
    %573 = arith.addf %571, %572 : vector<8x128xf32>
    %574 = math.tanh %573 : vector<8x128xf32>
    %575 = arith.mulf %569, %574 : vector<8x128xf32>
    %c0_279 = arith.constant 0 : index
    %c0_280 = arith.constant 0 : index
    %576 = vector.load %arg13[%c0_279, %c0_280] : memref<8x128xf32, #tpu.memory_space<vmem>>, vector<8x128xf32>
    tpu.vector_store %arg13[%c0_279, %c0_280], %575 {strides = array<i32>} : memref<8x128xf32, #tpu.memory_space<vmem>>, vector<8x128xf32>,
    %c0_281 = arith.constant 0 : index
    %c0_282 = arith.constant 0 : index
    %577 = vector.load %arg14[%c0_281, %c0_282] : memref<8x128xf32, #tpu.memory_space<vmem>>, vector<8x128xf32>
    tpu.vector_store %arg14[%c0_281, %c0_282], %573 {strides = array<i32>} : memref<8x128xf32, #tpu.memory_space<vmem>>, vector<8x128xf32>,
    %c7_i32_283 = arith.constant 7 : i32
    %c8_i32_284 = arith.constant 8 : i32
    %578 = arith.muli %c7_i32_283, %c8_i32_284 : i32
    %579 = tpu.assume_multiple %578, 8 : i32
    %580 = arith.index_cast %579 : i32 to index
    %c0_285 = arith.constant 0 : index
    %581 = vector.load %arg11[%580, %c0_285] : memref<64x512xf32, #tpu.memory_space<vmem>>, vector<8x512xf32>
    %c0_286 = arith.constant 0 : index
    %c0_287 = arith.constant 0 : index
    %582 = vector.load %arg13[%c0_286, %c0_287] : memref<8x128xf32, #tpu.memory_space<vmem>>, vector<8x128xf32>
    %c0_288 = arith.constant 0 : index
    %c0_289 = arith.constant 0 : index
    %583 = vector.load %arg6[%c0_288, %c0_289] : memref<128x512xf32, #tpu.memory_space<vmem>>, vector<128x512xf32>
    %cst_290 = arith.constant dense<0.000000e+00> : vector<8x512xf32>
    %584 = tpu.matmul %582, %583, %cst_290 {dimension_numbers = #tpu.dot_dimension_numbers<[1], [0], [0], [1], [0, 0, 1, 1], [], []>} : vector<8x128xf32>, vector<128x512xf32>, vector<8x512xf32> -> vector<8x512xf32>
    %585 = arith.addf %581, %584 : vector<8x512xf32>
    %586 = vector.extract_strided_slice %585 {offsets = [0, 0], sizes = [8, 128], strides = [1, 1]} : vector<8x512xf32> to vector<8x128xf32>
    %587 = arith.negf %586 : vector<8x128xf32>
    %588 = math.exp %587 : vector<8x128xf32>
    %cst_291 = arith.constant 1.000000e+00 : f32
    %589 = vector.broadcast %cst_291 : f32 to vector<8x128xf32>
    %590 = arith.addf %589, %588 : vector<8x128xf32>
    %591 = arith.divf %589, %590 : vector<8x128xf32>
    %592 = vector.extract_strided_slice %585 {offsets = [0, 128], sizes = [8, 128], strides = [1, 1]} : vector<8x512xf32> to vector<8x128xf32>
    %593 = arith.negf %592 : vector<8x128xf32>
    %594 = math.exp %593 : vector<8x128xf32>
    %cst_292 = arith.constant 1.000000e+00 : f32
    %595 = vector.broadcast %cst_292 : f32 to vector<8x128xf32>
    %596 = arith.addf %595, %594 : vector<8x128xf32>
    %597 = arith.divf %595, %596 : vector<8x128xf32>
    %598 = vector.extract_strided_slice %585 {offsets = [0, 256], sizes = [8, 128], strides = [1, 1]} : vector<8x512xf32> to vector<8x128xf32>
    %599 = math.tanh %598 : vector<8x128xf32>
    %600 = vector.extract_strided_slice %585 {offsets = [0, 384], sizes = [8, 128], strides = [1, 1]} : vector<8x512xf32> to vector<8x128xf32>
    %601 = arith.negf %600 : vector<8x128xf32>
    %602 = math.exp %601 : vector<8x128xf32>
    %cst_293 = arith.constant 1.000000e+00 : f32
    %603 = vector.broadcast %cst_293 : f32 to vector<8x128xf32>
    %604 = arith.addf %603, %602 : vector<8x128xf32>
    %605 = arith.divf %603, %604 : vector<8x128xf32>
    %c0_294 = arith.constant 0 : index
    %c0_295 = arith.constant 0 : index
    %606 = vector.load %arg14[%c0_294, %c0_295] : memref<8x128xf32, #tpu.memory_space<vmem>>, vector<8x128xf32>
    %607 = arith.mulf %597, %606 : vector<8x128xf32>
    %608 = arith.mulf %591, %599 : vector<8x128xf32>
    %609 = arith.addf %607, %608 : vector<8x128xf32>
    %610 = math.tanh %609 : vector<8x128xf32>
    %611 = arith.mulf %605, %610 : vector<8x128xf32>
    %c0_296 = arith.constant 0 : index
    %c0_297 = arith.constant 0 : index
    %612 = vector.load %arg13[%c0_296, %c0_297] : memref<8x128xf32, #tpu.memory_space<vmem>>, vector<8x128xf32>
    tpu.vector_store %arg13[%c0_296, %c0_297], %611 {strides = array<i32>} : memref<8x128xf32, #tpu.memory_space<vmem>>, vector<8x128xf32>,
    %c0_298 = arith.constant 0 : index
    %c0_299 = arith.constant 0 : index
    %613 = vector.load %arg14[%c0_298, %c0_299] : memref<8x128xf32, #tpu.memory_space<vmem>>, vector<8x128xf32>
    tpu.vector_store %arg14[%c0_298, %c0_299], %609 {strides = array<i32>} : memref<8x128xf32, #tpu.memory_space<vmem>>, vector<8x128xf32>,
    %c8_i32_300 = arith.constant 8 : i32
    %c0_301 = arith.constant 0 : index
    %c0_302 = arith.constant 0 : index
    %614 = vector.load %arg13[%c0_301, %c0_302] : memref<8x128xf32, #tpu.memory_space<vmem>>, vector<8x128xf32>
    %c0_303 = arith.constant 0 : index
    %c0_304 = arith.constant 0 : index
    %615 = vector.load %arg8[%c0_303, %c0_304] : memref<128x128xf32, #tpu.memory_space<vmem>>, vector<128x128xf32>
    %cst_305 = arith.constant dense<0.000000e+00> : vector<8x128xf32>
    %616 = tpu.matmul %614, %615, %cst_305 {dimension_numbers = #tpu.dot_dimension_numbers<[1], [0], [0], [1], [0, 0, 1, 1], [], []>} : vector<8x128xf32>, vector<128x128xf32>, vector<8x128xf32> -> vector<8x128xf32>
    %c0_306 = arith.constant 0 : index
    %c0_307 = arith.constant 0 : index
    %617 = vector.load %arg9[%c0_306, %c0_307] : memref<1x128xf32, #tpu.memory_space<vmem>>, vector<1x128xf32>
    %618 = vector.broadcast %617 : vector<1x128xf32> to vector<8x128xf32>
    %619 = arith.addf %616, %618 : vector<8x128xf32>
    %c0_308 = arith.constant 0 : index
    %c0_309 = arith.constant 0 : index
    %620 = vector.load %arg10[%c0_308, %c0_309] : memref<8x128xf32, #tpu.memory_space<vmem>>, vector<8x128xf32>
    tpu.vector_store %arg10[%c0_308, %c0_309], %619 {strides = array<i32>} : memref<8x128xf32, #tpu.memory_space<vmem>>, vector<8x128xf32>,
    return
  }
  func.func @transform_0(%arg0: i32) -> (i32, i32) {
    %c0_i32 = arith.constant 0 : i32
    %c0_i32_0 = arith.constant 0 : i32
    %c0_i32_1 = arith.constant 0 : i32
    return %c0_i32, %c0_i32_0 : i32, i32
  }
  func.func @transform_1(%arg0: i32) -> (i32, i32) {
    %c0_i32 = arith.constant 0 : i32
    %c0_i32_0 = arith.constant 0 : i32
    %c0_i32_1 = arith.constant 0 : i32
    return %c0_i32, %c0_i32_0 : i32, i32
  }
  func.func @transform_2(%arg0: i32) -> (i32, i32) {
    %c0_i32 = arith.constant 0 : i32
    %c0_i32_0 = arith.constant 0 : i32
    %c0_i32_1 = arith.constant 0 : i32
    return %c0_i32, %c0_i32_0 : i32, i32
  }
  func.func @transform_3(%arg0: i32) -> (i32, i32) {
    %c0_i32 = arith.constant 0 : i32
    %c0_i32_0 = arith.constant 0 : i32
    %c0_i32_1 = arith.constant 0 : i32
    return %c0_i32, %c0_i32_0 : i32, i32
  }
  func.func @transform_4(%arg0: i32) -> (i32, i32) {
    %c0_i32 = arith.constant 0 : i32
    %c0_i32_0 = arith.constant 0 : i32
    %c0_i32_1 = arith.constant 0 : i32
    return %c0_i32, %c0_i32_0 : i32, i32
  }
  func.func @transform_5(%arg0: i32) -> (i32, i32) {
    %c0_i32 = arith.constant 0 : i32
    %c0_i32_0 = arith.constant 0 : i32
    %c0_i32_1 = arith.constant 0 : i32
    return %c0_i32, %c0_i32_0 : i32, i32
  }
  func.func @transform_6(%arg0: i32) -> (i32, i32) {
    %c0_i32 = arith.constant 0 : i32
    %c0_i32_0 = arith.constant 0 : i32
    %c0_i32_1 = arith.constant 0 : i32
    return %c0_i32, %c0_i32_0 : i32, i32
  }
  func.func @transform_7(%arg0: i32) -> (i32, i32) {
    %c0_i32 = arith.constant 0 : i32
    %c0_i32_0 = arith.constant 0 : i32
    %c0_i32_1 = arith.constant 0 : i32
    return %c0_i32, %c0_i32_0 : i32, i32
  }
  func.func @transform_8(%arg0: i32) -> (i32, i32) {
    %c0_i32 = arith.constant 0 : i32
    %c0_i32_0 = arith.constant 0 : i32
    %c0_i32_1 = arith.constant 0 : i32
    return %c0_i32, %c0_i32_0 : i32, i32
  }
  func.func @transform_9(%arg0: i32) -> (i32, i32) {
    %c0_i32 = arith.constant 0 : i32
    %c0_i32_0 = arith.constant 0 : i32
    %c0_i32_1 = arith.constant 0 : i32
    return %c0_i32, %c0_i32_0 : i32, i32
  }
}

</mosaic_0001>

<bundles_post_ra>
// kernel: lstm_model_forward.1
= control target key start
LH: loop header
LB: loop body
LE: loop exit
PB: predicated region body
PF: predicated region fallthrough
CT: control target
= control target key end

     0   :  { %14 = vsyncpa [#allocation7], 0  ;;  %s8543_s0 = inlined_call_operand.vmem [shape: f32[64,512], index: 0, kind: input, shape index: {}]   ;;  %s8544_s1 = inlined_call_operand.hbm [shape: f32[512,512], index: 1, kind: input, shape index: {}]   ;;  %s8545_s2 = inlined_call_operand.hbm [shape: f32[128,512], index: 2, kind: input, shape index: {}]   ;;  %s8546_s3 = inlined_call_operand.vmem [shape: f32[1,512], index: 3, kind: input, shape index: {}]   ;;  %s8547_s4 = inlined_call_operand.hbm [shape: f32[128,512], index: 4, kind: input, shape index: {}]   ;;  %s8548_s5 = inlined_call_operand.hbm [shape: f32[128,512], index: 5, kind: input, shape index: {}]   ;;  %s8549_s6 = inlined_call_operand.vmem [shape: f32[1,512], index: 6, kind: input, shape index: {}]   ;;  %s8550_s7 = inlined_call_operand.vmem [shape: f32[128,128], index: 7, kind: input, shape index: {}]   ;;  %s8551_s8 = inlined_call_operand.vmem [shape: f32[1,128], index: 8, kind: input, shape index: {}]   ;;  %s8552_s9 = inlined_call_operand.vmem [shape: f32[8,128], index: 9, kind: output, shape index: {}]  }
   0x1   :  { %15 = vsyncpa [#allocation9], 0 }
   0x2   :  { %16 = vsyncpa [#allocation12], 0  ;;  %s7245_s30 = smov [#allocation8]   ;;  %s7246_s11 = smov [#allocation6]  }
   0x3   :  { %s36_s10 = sshll.u32 %s7245_s30, 4  ;;  %s24_s12 = sshll.u32 %s7246_s11, 4  ;;  %s37_s10 = int_to_ptr.vmem [resolvable:$true] %s36_s10  ;;  %s7304_s12 = int_to_ptr.vmem [resolvable:$true] %s24_s12 }
   0x4   :  { %s7151_s15 = scalar_lea.hbm %s8545_s2, 8192 }
   0x5   :  { %p7152_p0 = scmp.ne.s32.totalorder %s8545_s2, %s7151_s15  ;;  %p7155_p1 = scmp.lt.u32.totalorder %s7151_s15, %s8545_s2 }
   0x7   :  { %p7157_p2 = pnand %p7155_p1, %p7152_p0 }
   0x9   :  { %7160 = shalt.err (!%p7157_p2)
}
   0xa   :  { %s7161_s20 = scalar_lea.vmem %s37_s10, 8192  ;;  %p7166_p4 = scmp.lt.s32.totalorder %s37_s10, %s37_s10 }
   0xb   :  { %p7162_p3 = scmp.ne.s32.totalorder %s37_s10, %s7161_s20  ;;  %p7167_p5 = scmp.lt.s32.totalorder %s7161_s20, %s7161_s20 }
   0xd   :  { %p7168_p6 = por %p7167_p5, %p7166_p4 }
   0xf   :  { %p7169_p7 = pnand %p7168_p6, %p7162_p3 }
  0x11   :  { %7172 = shalt.err (!%p7169_p7)
}
  0x12   :  { %s7247_s21 = smov 512   ;;  %s7248_s22 = smov 32  }
  0x13   :  { %42 = dma.hbm_to_vmem [thread:$0]  %s8545_s2, 8192, %s37_s10, [#allocation9], %s7247_s21, %s7247_s21, %s7248_s22  }
  0x14   :  { %s7173_s27 = scalar_lea.hbm %s8544_s1, 32768 }
  0x15   :  { %p7174_p8 = scmp.ne.s32.totalorder %s8544_s1, %s7173_s27  ;;  %p7177_p9 = scmp.lt.u32.totalorder %s7173_s27, %s8544_s1 }
  0x17   :  { %p7179_p10 = pnand %p7177_p9, %p7174_p8 }
  0x19   :  { %7182 = shalt.err (!%p7179_p10)
}
  0x1a   :  { %s7183_s13 = scalar_lea.vmem %s7304_s12, 32768  ;;  %p7188_p12 = scmp.lt.s32.totalorder %s7304_s12, %s7304_s12 }
  0x1b   :  { %p7184_p11 = scmp.ne.s32.totalorder %s7304_s12, %s7183_s13  ;;  %p7189_p13 = scmp.lt.s32.totalorder %s7183_s13, %s7183_s13 }
  0x1d   :  { %p7190_p0 = por %p7189_p13, %p7188_p12 }
  0x1f   :  { %p7191_p1 = pnand %p7190_p0, %p7184_p11 }
  0x21   :  { %7194 = shalt.err (!%p7191_p1)
}
  0x22   :  { %30 = dma.hbm_to_vmem [thread:$0]  %s8544_s1, 32768, %s7304_s12, [#allocation7], %s7247_s21, %s7247_s21, %s7248_s22  }
  0x23   :  { %s7249_s14 = smov [#allocation10]   ;;  %s7250_s16 = smov [#allocation11]  }
  0x24   :  { %s50_s15 = sshll.u32 %s7249_s14, 4  ;;  %s62_s17 = sshll.u32 %s7250_s16, 4  ;;  %s51_s15 = int_to_ptr.vmem [resolvable:$true] %s50_s15  ;;  %s7341_s17 = int_to_ptr.vmem [resolvable:$true] %s62_s17 }
  0x25   :  { %s7195_s20 = scalar_lea.hbm %s8547_s4, 8192 }
  0x26   :  { %p7196_p2 = scmp.ne.s32.totalorder %s8547_s4, %s7195_s20  ;;  %p7199_p3 = scmp.lt.u32.totalorder %s7195_s20, %s8547_s4 }
  0x28   :  { %p7201_p4 = pnand %p7199_p3, %p7196_p2 }
  0x2a   :  { %7204 = shalt.err (!%p7201_p4)
}
  0x2b   :  { %s7205_s1 = scalar_lea.vmem %s51_s15, 8192  ;;  %p7210_p6 = scmp.lt.s32.totalorder %s51_s15, %s51_s15 }
  0x2c   :  { %p7206_p5 = scmp.ne.s32.totalorder %s51_s15, %s7205_s1  ;;  %p7211_p7 = scmp.lt.s32.totalorder %s7205_s1, %s7205_s1 }
  0x2e   :  { %p7212_p8 = por %p7211_p7, %p7210_p6 }
  0x30   :  { %p7213_p9 = pnand %p7212_p8, %p7206_p5 }
  0x32   :  { %7216 = shalt.err (!%p7213_p9)
}
  0x33   :  { %56 = dma.hbm_to_vmem [thread:$0]  %s8547_s4, 8192, %s51_s15, [#allocation9], %s7247_s21, %s7247_s21, %s7248_s22  }
  0x34   :  { %s7217_s30 = scalar_lea.hbm %s8548_s5, 8192 }
  0x35   :  { %p7218_p10 = scmp.ne.s32.totalorder %s8548_s5, %s7217_s30  ;;  %p7221_p11 = scmp.lt.u32.totalorder %s7217_s30, %s8548_s5 }
  0x37   :  { %p7223_p12 = pnand %p7221_p11, %p7218_p10 }
  0x39   :  { %7226 = shalt.err (!%p7223_p12)
}
  0x3a   :  { %s7227_s14 = scalar_lea.vmem %s7341_s17, 8192  ;;  %p7232_p0 = scmp.lt.s32.totalorder %s7341_s17, %s7341_s17 }
  0x3b   :  { %p7228_p13 = scmp.ne.s32.totalorder %s7341_s17, %s7227_s14  ;;  %p7233_p1 = scmp.lt.s32.totalorder %s7227_s14, %s7227_s14 }
  0x3d   :  { %p7234_p2 = por %p7233_p1, %p7232_p0 }
  0x3f   :  { %p7235_p3 = pnand %p7234_p2, %p7228_p13 }
  0x41   :  { %7238 = shalt.err (!%p7235_p3)
}
  0x42   :  { %68 = dma.hbm_to_vmem [thread:$0]  %s8548_s5, 8192, %s7341_s17, [#allocation12], %s7247_s21, %s7247_s21, %s7248_s22  }
  0x43   :  { %7239 = dma.done.wait [#allocation7], 32768  }
  0x44   :  { %7240 = vsyncadd [#allocation7], 4294934528 }
  0x45   :  { %7241 = dma.done.wait [#allocation9], 16384  }
  0x46   :  { %7242 = vsyncadd [#allocation9], 4294950912 }
  0x47   :  { %7243 = dma.done.wait [#allocation12], 8192  }
  0x48   :  { %7244 = vsyncadd [#allocation12], 4294959104  ;;  %v120_v0 = vld [vmem:[#allocation6 + $0x8] sm:$0xff]  ;;  %v122_v2 = vld [vmem:[#allocation6 + $0x18] sm:$0xff]  ;;  %vm7253_vm0 = vmmov 0  }
  0x49   :  { %v124_v1 = vld [vmem:[#allocation6 + $0x28] sm:$0xff]  ;;  %v126_v4 = vld [vmem:[#allocation6 + $0x38] sm:$0xff]  ;;  %v119_v5 = vld [vmem:[#allocation6] sm:$0xff] }
  0x4a   :  { %v5358_v3 = vpack.c.bf16 %v124_v1, %v120_v0  ;;  %v123_v6 = vld [vmem:[#allocation6 + $0x20] sm:$0xff]  ;;  %v5486_v7 = vpack.c.bf16 %v126_v4, %v122_v2  ;;  %v121_v9 = vld [vmem:[#allocation6 + $0x10] sm:$0xff]  ;;  %v128_v11 = vld [vmem:[#allocation6 + $0x48] sm:$0xff] }
  0x4b   :  { %v5360_v8 = vpack.c.bf16 %v123_v6, %v119_v5  ;;  %v125_v10 = vld [vmem:[#allocation6 + $0x30] sm:$0xff]  ;;  %v132_v13 = vld [vmem:[#allocation6 + $0x68] sm:$0xff]  ;;  %v130_v14 = vld [vmem:[#allocation6 + $0x58] sm:$0xff] }
  0x4c   :  { %5359 = vmatprep.subr.bf16.mxu0 %v5358_v3  ;;  %v5488_v12 = vpack.c.bf16 %v125_v10, %v121_v9  ;;  %v134_v15 = vld [vmem:[#allocation6 + $0x78] sm:$0xff]  ;;  %5487 = vmatprep.subr.bf16.mxu1 %v5486_v7  ;;  %v5362_v16 = vpack.c.bf16 %v132_v13, %v128_v11  ;;  %v127_v18 = vld [vmem:[#allocation6 + $0x40] sm:$0xff]  ;;  %v129_v20 = vld [vmem:[#allocation6 + $0x50] sm:$0xff] }
  0x4d   :  { %5361 = vmatpush1.bf16.msra.mxu0 %v5360_v8  ;;  %v5490_v17 = vpack.c.bf16 %v134_v15, %v130_v14  ;;  %v131_v19 = vld [vmem:[#allocation6 + $0x60] sm:$0xff]  ;;  %v133_v22 = vld [vmem:[#allocation6 + $0x70] sm:$0xff]  ;;  %v136_v23 = vld [vmem:[#allocation6 + $0x88] sm:$0xff] }
  0x4e   :  { %5489 = vmatpush1.bf16.msra.mxu1 %v5488_v12  ;;  %v5364_v21 = vpack.c.bf16 %v131_v19, %v127_v18  ;;  %v140_v24 = vld [vmem:[#allocation6 + $0xa8] sm:$0xff]  ;;  %5363 = vmatprep.subr.bf16.mxu0 %v5362_v16  ;;  %v5492_v25 = vpack.c.bf16 %v133_v22, %v129_v20  ;;  %v138_v27 = vld [vmem:[#allocation6 + $0x98] sm:$0xff]  ;;  %v135_v29 = vld [vmem:[#allocation6 + $0x80] sm:$0xff] }
  0x4f   :  { %5491 = vmatprep.subr.bf16.mxu1 %v5490_v17  ;;  %v5366_v26 = vpack.c.bf16 %v140_v24, %v136_v23  ;;  %v142_v28 = vld [vmem:[#allocation6 + $0xb8] sm:$0xff]  ;;  %v139_v31 = vld [vmem:[#allocation6 + $0xa0] sm:$0xff]  ;;  %v137_v32 = vld [vmem:[#allocation6 + $0x90] sm:$0xff] }
  0x50   :  { %v5494_v30 = vpack.c.bf16 %v142_v28, %v138_v27  ;;  %v141_v33 = vld [vmem:[#allocation6 + $0xb0] sm:$0xff]  ;;  %v5368_v34 = vpack.c.bf16 %v139_v31, %v135_v29  ;;  %v144_v35 = vld [vmem:[#allocation6 + $0xc8] sm:$0xff]  ;;  %v146_v37 = vld [vmem:[#allocation6 + $0xd8] sm:$0xff] }
  0x51   :  { %5365 = vmatpush1.bf16.msra.mxu0 %v5364_v21  ;;  %v148_v36 = vld [vmem:[#allocation6 + $0xe8] sm:$0xff]  ;;  %v5496_v38 = vpack.c.bf16 %v141_v33, %v137_v32  ;;  %v150_v40 = vld [vmem:[#allocation6 + $0xf8] sm:$0xff]  ;;  %v143_v41 = vld [vmem:[#allocation6 + $0xc0] sm:$0xff] }
  0x52   :  { %5493 = vmatpush1.bf16.msra.mxu1 %v5492_v25  ;;  %5367 = vmatprep.subr.bf16.mxu0 %v5366_v26  ;;  %v5370_v39 = vpack.c.bf16 %v148_v36, %v144_v35  ;;  %v147_v42 = vld [vmem:[#allocation6 + $0xe0] sm:$0xff]  ;;  %v5498_v43 = vpack.c.bf16 %v150_v40, %v146_v37  ;;  %v145_v44 = vld [vmem:[#allocation6 + $0xd0] sm:$0xff]  ;;  %v152_v46 = vld [vmem:[#allocation6 + $0x108] sm:$0xff] }
  0x53   :  { %5495 = vmatprep.subr.bf16.mxu1 %v5494_v30  ;;  %v149_v45 = vld [vmem:[#allocation6 + $0xf0] sm:$0xff]  ;;  %v156_v47 = vld [vmem:[#allocation6 + $0x128] sm:$0xff]  ;;  %v154_v48 = vld [vmem:[#allocation6 + $0x118] sm:$0xff]  ;;  %v5372_v50 = vpack.c.bf16 %v147_v42, %v143_v41 }
  0x54   :  { %v158_v49 = vld [vmem:[#allocation6 + $0x138] sm:$0xff]  ;;  %v5500_v51 = vpack.c.bf16 %v149_v45, %v145_v44  ;;  %v5374_v52 = vpack.c.bf16 %v156_v47, %v152_v46  ;;  %v151_v53 = vld [vmem:[#allocation6 + $0x100] sm:$0xff]  ;;  %v153_v55 = vld [vmem:[#allocation6 + $0x110] sm:$0xff] }
  0x55   :  { %5369 = vmatpush1.bf16.msra.mxu0 %v5368_v34  ;;  %v155_v54 = vld [vmem:[#allocation6 + $0x120] sm:$0xff]  ;;  %v5502_v56 = vpack.c.bf16 %v158_v49, %v154_v48  ;;  %v157_v57 = vld [vmem:[#allocation6 + $0x130] sm:$0xff]  ;;  %v160_v58 = vld [vmem:[#allocation6 + $0x148] sm:$0xff] }
  0x56   :  { %5497 = vmatpush1.bf16.msra.mxu1 %v5496_v38  ;;  %5371 = vmatprep.subr.bf16.mxu0 %v5370_v39  ;;  %v164_v59 = vld [vmem:[#allocation6 + $0x168] sm:$0xff]  ;;  %v162_v60 = vld [vmem:[#allocation6 + $0x158] sm:$0xff]  ;;  %v5376_v62 = vpack.c.bf16 %v155_v54, %v151_v53  ;;  %v5504_v63 = vpack.c.bf16 %v157_v57, %v153_v55  ;;  %v159_v1 = vld [vmem:[#allocation6 + $0x140] sm:$0xff] }
  0x57   :  { %5499 = vmatprep.subr.bf16.mxu1 %v5498_v43  ;;  %v166_v61 = vld [vmem:[#allocation6 + $0x178] sm:$0xff]  ;;  %v5378_v0 = vpack.c.bf16 %v164_v59, %v160_v58  ;;  %v163_v2 = vld [vmem:[#allocation6 + $0x160] sm:$0xff]  ;;  %v161_v3 = vld [vmem:[#allocation6 + $0x150] sm:$0xff] }
  0x58   :  { %v5506_v4 = vpack.c.bf16 %v166_v61, %v162_v60  ;;  %v165_v5 = vld [vmem:[#allocation6 + $0x170] sm:$0xff]  ;;  %v168_v6 = vld [vmem:[#allocation6 + $0x188] sm:$0xff]  ;;  %v170_v8 = vld [vmem:[#allocation6 + $0x198] sm:$0xff]  ;;  %v5380_v10 = vpack.c.bf16 %v163_v2, %v159_v1 }
  0x59   :  { %5373 = vmatpush1.bf16.msra.mxu0 %v5372_v50  ;;  %v172_v7 = vld [vmem:[#allocation6 + $0x1a8] sm:$0xff]  ;;  %v174_v9 = vld [vmem:[#allocation6 + $0x1b8] sm:$0xff]  ;;  %v5508_v11 = vpack.c.bf16 %v165_v5, %v161_v3  ;;  %v167_v13 = vld [vmem:[#allocation6 + $0x180] sm:$0xff] }
  0x5a   :  { %5501 = vmatpush1.bf16.msra.mxu1 %v5500_v51  ;;  %5375 = vmatprep.subr.bf16.mxu0 %v5374_v52  ;;  %v5382_v12 = vpack.c.bf16 %v172_v7, %v168_v6  ;;  %v171_v14 = vld [vmem:[#allocation6 + $0x1a0] sm:$0xff]  ;;  %v169_v15 = vld [vmem:[#allocation6 + $0x190] sm:$0xff]  ;;  %v5510_v16 = vpack.c.bf16 %v174_v9, %v170_v8  ;;  %v176_v18 = vld [vmem:[#allocation6 + $0x1c8] sm:$0xff] }
  0x5b   :  { %5503 = vmatprep.subr.bf16.mxu1 %v5502_v56  ;;  %v173_v17 = vld [vmem:[#allocation6 + $0x1b0] sm:$0xff]  ;;  %v180_v19 = vld [vmem:[#allocation6 + $0x1e8] sm:$0xff]  ;;  %v178_v20 = vld [vmem:[#allocation6 + $0x1d8] sm:$0xff]  ;;  %v5384_v22 = vpack.c.bf16 %v171_v14, %v167_v13 }
  0x5c   :  { %v182_v21 = vld [vmem:[#allocation6 + $0x1f8] sm:$0xff]  ;;  %v5512_v23 = vpack.c.bf16 %v173_v17, %v169_v15  ;;  %v5386_v24 = vpack.c.bf16 %v180_v19, %v176_v18  ;;  %v175_v25 = vld [vmem:[#allocation6 + $0x1c0] sm:$0xff]  ;;  %v177_v27 = vld [vmem:[#allocation6 + $0x1d0] sm:$0xff] }
  0x5d   :  { %5377 = vmatpush1.bf16.msra.mxu0 %v5376_v62  ;;  %v179_v26 = vld [vmem:[#allocation6 + $0x1e0] sm:$0xff]  ;;  %v5514_v28 = vpack.c.bf16 %v182_v21, %v178_v20  ;;  %v181_v29 = vld [vmem:[#allocation6 + $0x1f0] sm:$0xff]  ;;  %v184_v30 = vld [vmem:[#allocation6 + $0x208] sm:$0xff] }
  0x5e   :  { %5505 = vmatpush1.bf16.msra.mxu1 %v5504_v63  ;;  %5379 = vmatprep.subr.bf16.mxu0 %v5378_v0  ;;  %v188_v31 = vld [vmem:[#allocation6 + $0x228] sm:$0xff]  ;;  %v186_v32 = vld [vmem:[#allocation6 + $0x218] sm:$0xff]  ;;  %v5388_v34 = vpack.c.bf16 %v179_v26, %v175_v25  ;;  %v5516_v35 = vpack.c.bf16 %v181_v29, %v177_v27  ;;  %v183_v37 = vld [vmem:[#allocation6 + $0x200] sm:$0xff] }
  0x5f   :  { %5507 = vmatprep.subr.bf16.mxu1 %v5506_v4  ;;  %v190_v33 = vld [vmem:[#allocation6 + $0x238] sm:$0xff]  ;;  %v5390_v36 = vpack.c.bf16 %v188_v31, %v184_v30  ;;  %v187_v38 = vld [vmem:[#allocation6 + $0x220] sm:$0xff]  ;;  %v185_v39 = vld [vmem:[#allocation6 + $0x210] sm:$0xff] }
  0x60   :  { %v5518_v40 = vpack.c.bf16 %v190_v33, %v186_v32  ;;  %v189_v41 = vld [vmem:[#allocation6 + $0x230] sm:$0xff]  ;;  %v192_v42 = vld [vmem:[#allocation6 + $0x248] sm:$0xff]  ;;  %v194_v44 = vld [vmem:[#allocation6 + $0x258] sm:$0xff]  ;;  %v5392_v46 = vpack.c.bf16 %v187_v38, %v183_v37 }
  0x61   :  { %5381 = vmatpush1.bf16.msra.mxu0 %v5380_v10  ;;  %v196_v43 = vld [vmem:[#allocation6 + $0x268] sm:$0xff]  ;;  %v198_v45 = vld [vmem:[#allocation6 + $0x278] sm:$0xff]  ;;  %v5520_v47 = vpack.c.bf16 %v189_v41, %v185_v39  ;;  %v191_v49 = vld [vmem:[#allocation6 + $0x240] sm:$0xff] }
  0x62   :  { %5509 = vmatpush1.bf16.msra.mxu1 %v5508_v11  ;;  %5383 = vmatprep.subr.bf16.mxu0 %v5382_v12  ;;  %v5394_v48 = vpack.c.bf16 %v196_v43, %v192_v42  ;;  %v195_v50 = vld [vmem:[#allocation6 + $0x260] sm:$0xff]  ;;  %v193_v51 = vld [vmem:[#allocation6 + $0x250] sm:$0xff]  ;;  %v5522_v52 = vpack.c.bf16 %v198_v45, %v194_v44  ;;  %v200_v54 = vld [vmem:[#allocation6 + $0x288] sm:$0xff] }
  0x63   :  { %5511 = vmatprep.subr.bf16.mxu1 %v5510_v16  ;;  %v197_v53 = vld [vmem:[#allocation6 + $0x270] sm:$0xff]  ;;  %v204_v55 = vld [vmem:[#allocation6 + $0x2a8] sm:$0xff]  ;;  %v202_v56 = vld [vmem:[#allocation6 + $0x298] sm:$0xff]  ;;  %v5396_v58 = vpack.c.bf16 %v195_v50, %v191_v49 }
  0x64   :  { %v206_v57 = vld [vmem:[#allocation6 + $0x2b8] sm:$0xff]  ;;  %v5524_v59 = vpack.c.bf16 %v197_v53, %v193_v51  ;;  %v5398_v60 = vpack.c.bf16 %v204_v55, %v200_v54  ;;  %v199_v61 = vld [vmem:[#allocation6 + $0x280] sm:$0xff]  ;;  %v201_v63 = vld [vmem:[#allocation6 + $0x290] sm:$0xff] }
  0x65   :  { %5385 = vmatpush1.bf16.msra.mxu0 %v5384_v22  ;;  %v203_v62 = vld [vmem:[#allocation6 + $0x2a0] sm:$0xff]  ;;  %v5526_v0 = vpack.c.bf16 %v206_v57, %v202_v56  ;;  %v205_v1 = vld [vmem:[#allocation6 + $0x2b0] sm:$0xff]  ;;  %v208_v2 = vld [vmem:[#allocation6 + $0x2c8] sm:$0xff] }
  0x66   :  { %5513 = vmatpush1.bf16.msra.mxu1 %v5512_v23  ;;  %5387 = vmatprep.subr.bf16.mxu0 %v5386_v24  ;;  %v212_v3 = vld [vmem:[#allocation6 + $0x2e8] sm:$0xff]  ;;  %v210_v4 = vld [vmem:[#allocation6 + $0x2d8] sm:$0xff]  ;;  %v5400_v6 = vpack.c.bf16 %v203_v62, %v199_v61  ;;  %v207_v7 = vld [vmem:[#allocation6 + $0x2c0] sm:$0xff]  ;;  %v5528_v8 = vpack.c.bf16 %v205_v1, %v201_v63 }
  0x67   :  { %5515 = vmatprep.subr.bf16.mxu1 %v5514_v28  ;;  %v214_v5 = vld [vmem:[#allocation6 + $0x2f8] sm:$0xff]  ;;  %v5402_v9 = vpack.c.bf16 %v212_v3, %v208_v2  ;;  %v211_v10 = vld [vmem:[#allocation6 + $0x2e0] sm:$0xff]  ;;  %v209_v11 = vld [vmem:[#allocation6 + $0x2d0] sm:$0xff] }
  0x68   :  { %v213_v12 = vld [vmem:[#allocation6 + $0x2f0] sm:$0xff]  ;;  %v5530_v13 = vpack.c.bf16 %v214_v5, %v210_v4  ;;  %v216_v14 = vld [vmem:[#allocation6 + $0x308] sm:$0xff]  ;;  %v218_v17 = vld [vmem:[#allocation6 + $0x318] sm:$0xff]  ;;  %v5404_v19 = vpack.c.bf16 %v211_v10, %v207_v7 }
  0x69   :  { %5389 = vmatpush1.bf16.msra.mxu0 %v5388_v34  ;;  %v220_v15 = vld [vmem:[#allocation6 + $0x328] sm:$0xff]  ;;  %v222_v18 = vld [vmem:[#allocation6 + $0x338] sm:$0xff]  ;;  %v5532_v20 = vpack.c.bf16 %v213_v12, %v209_v11  ;;  %v215_v22 = vld [vmem:[#allocation6 + $0x300] sm:$0xff] }
  0x6a   :  { %5517 = vmatpush1.bf16.msra.mxu1 %v5516_v35  ;;  %5391 = vmatprep.subr.bf16.mxu0 %v5390_v36  ;;  %v88_v16 = vld [vmem:[%s8543_s0 + $0x8] sm:$0xff]  ;;  %v5406_v21 = vpack.c.bf16 %v220_v15, %v216_v14  ;;  %v219_v23 = vld [vmem:[#allocation6 + $0x320] sm:$0xff]  ;;  %v217_v24 = vld [vmem:[#allocation6 + $0x310] sm:$0xff]  ;;  %v5534_v25 = vpack.c.bf16 %v222_v18, %v218_v17 }
  0x6b   :  { %5519 = vmatprep.subr.bf16.mxu1 %v5518_v40  ;;  %461 = vmatprep.mubr.f32.mxu0 %v88_v16  ;;  %v221_v26 = vld [vmem:[#allocation6 + $0x330] sm:$0xff]  ;;  %v224_v27 = vld [vmem:[#allocation6 + $0x348] sm:$0xff]  ;;  %v226_v29 = vld [vmem:[#allocation6 + $0x358] sm:$0xff]  ;;  %v5408_v31 = vpack.c.bf16 %v219_v23, %v215_v22 }
  0x6c   :  { %687 = vmatprep.mubr.f32.mxu1 %v88_v16  ;;  %v228_v28 = vld [vmem:[#allocation6 + $0x368] sm:$0xff]  ;;  %v230_v30 = vld [vmem:[#allocation6 + $0x378] sm:$0xff]  ;;  %v5536_v32 = vpack.c.bf16 %v221_v26, %v217_v24  ;;  %v223_v34 = vld [vmem:[#allocation6 + $0x340] sm:$0xff] }
  0x6d   :  { %5393 = vmatpush1.bf16.msra.mxu0 %v5392_v46  ;;  %v5410_v33 = vpack.c.bf16 %v228_v28, %v224_v27  ;;  %v227_v35 = vld [vmem:[#allocation6 + $0x360] sm:$0xff]  ;;  %v225_v36 = vld [vmem:[#allocation6 + $0x350] sm:$0xff]  ;;  %v5538_v37 = vpack.c.bf16 %v230_v30, %v226_v29  ;;  %v232_v39 = vld [vmem:[#allocation6 + $0x388] sm:$0xff] }
  0x6e   :  { %5521 = vmatpush1.bf16.msra.mxu1 %v5520_v47  ;;  %5395 = vmatprep.subr.bf16.mxu0 %v5394_v48  ;;  %v229_v38 = vld [vmem:[#allocation6 + $0x370] sm:$0xff]  ;;  %v236_v40 = vld [vmem:[#allocation6 + $0x3a8] sm:$0xff]  ;;  %v234_v41 = vld [vmem:[#allocation6 + $0x398] sm:$0xff]  ;;  %v5412_v43 = vpack.c.bf16 %v227_v35, %v223_v34 }
  0x6f   :  { %5523 = vmatprep.subr.bf16.mxu1 %v5522_v52  ;;  %v238_v42 = vld [vmem:[#allocation6 + $0x3b8] sm:$0xff]  ;;  %v5540_v44 = vpack.c.bf16 %v229_v38, %v225_v36  ;;  %v5414_v45 = vpack.c.bf16 %v236_v40, %v232_v39  ;;  %v231_v46 = vld [vmem:[#allocation6 + $0x380] sm:$0xff]  ;;  %v233_v48 = vld [vmem:[#allocation6 + $0x390] sm:$0xff] }
  0x70   :  { %v235_v47 = vld [vmem:[#allocation6 + $0x3a0] sm:$0xff]  ;;  %v5542_v49 = vpack.c.bf16 %v238_v42, %v234_v41  ;;  %v237_v50 = vld [vmem:[#allocation6 + $0x3b0] sm:$0xff]  ;;  %v240_v51 = vld [vmem:[#allocation6 + $0x3c8] sm:$0xff] }
  0x71   :  { %5397 = vmatpush1.bf16.msra.mxu0 %v5396_v58  ;;  %v244_v52 = vld [vmem:[#allocation6 + $0x3e8] sm:$0xff]  ;;  %v242_v53 = vld [vmem:[#allocation6 + $0x3d8] sm:$0xff]  ;;  %v5416_v55 = vpack.c.bf16 %v235_v47, %v231_v46  ;;  %v5544_v56 = vpack.c.bf16 %v237_v50, %v233_v48  ;;  %v239_v58 = vld [vmem:[#allocation6 + $0x3c0] sm:$0xff] }
  0x72   :  { %5525 = vmatpush1.bf16.msra.mxu1 %v5524_v59  ;;  %5399 = vmatprep.subr.bf16.mxu0 %v5398_v60  ;;  %v246_v54 = vld [vmem:[#allocation6 + $0x3f8] sm:$0xff]  ;;  %v5418_v57 = vpack.c.bf16 %v244_v52, %v240_v51  ;;  %v243_v59 = vld [vmem:[#allocation6 + $0x3e0] sm:$0xff]  ;;  %v241_v60 = vld [vmem:[#allocation6 + $0x3d0] sm:$0xff] }
  0x73   :  { %5527 = vmatprep.subr.bf16.mxu1 %v5526_v0  ;;  %v5546_v61 = vpack.c.bf16 %v246_v54, %v242_v53  ;;  %v245_v62 = vld [vmem:[#allocation6 + $0x3f0] sm:$0xff]  ;;  %v248_v63 = vld [vmem:[#allocation6 + $0x408] sm:$0xff]  ;;  %v250_v1 = vld [vmem:[#allocation6 + $0x418] sm:$0xff]  ;;  %v5420_v3 = vpack.c.bf16 %v243_v59, %v239_v58 }
  0x74   :  { %v252_v0 = vld [vmem:[#allocation6 + $0x428] sm:$0xff]  ;;  %v254_v2 = vld [vmem:[#allocation6 + $0x438] sm:$0xff]  ;;  %v5548_v4 = vpack.c.bf16 %v245_v62, %v241_v60  ;;  %v251_v7 = vld [vmem:[#allocation6 + $0x420] sm:$0xff] }
  0x75   :  { %5401 = vmatpush1.bf16.msra.mxu0 %v5400_v6  ;;  %v5422_v5 = vpack.c.bf16 %v252_v0, %v248_v63  ;;  %v247_v6 = vld [vmem:[#allocation6 + $0x400] sm:$0xff]  ;;  %v253_v10 = vld [vmem:[#allocation6 + $0x430] sm:$0xff]  ;;  %v256_v11 = vld [vmem:[#allocation6 + $0x448] sm:$0xff] }
  0x76   :  { %5529 = vmatpush1.bf16.msra.mxu1 %v5528_v8  ;;  %5403 = vmatprep.subr.bf16.mxu0 %v5402_v9  ;;  %v249_v8 = vld [vmem:[#allocation6 + $0x410] sm:$0xff]  ;;  %v5550_v9 = vpack.c.bf16 %v254_v2, %v250_v1  ;;  %v260_v12 = vld [vmem:[#allocation6 + $0x468] sm:$0xff]  ;;  %v262_v14 = vld [vmem:[#allocation6 + $0x478] sm:$0xff]  ;;  %v5424_v16 = vpack.c.bf16 %v251_v7, %v247_v6 }
  0x77   :  { %5531 = vmatprep.subr.bf16.mxu1 %v5530_v13  ;;  %v258_v13 = vld [vmem:[#allocation6 + $0x458] sm:$0xff]  ;;  %v87_v15 = vld [vmem:[%s8543_s0] sm:$0xff]  ;;  %v5552_v17 = vpack.c.bf16 %v253_v10, %v249_v8  ;;  %v5426_v18 = vpack.c.bf16 %v260_v12, %v256_v11  ;;  %v261_v23 = vld [vmem:[#allocation6 + $0x470] sm:$0xff] }
  0x78   :  { %v5554_v22 = vpack.c.bf16 %v262_v14, %v258_v13  ;;  %v264_v24 = vld [vmem:[#allocation6 + $0x488] sm:$0xff]  ;;  %v266_v26 = vld [vmem:[#allocation6 + $0x498] sm:$0xff]  ;;  %v91_v30 = vld [vmem:[%s8543_s0 + $0x20] sm:$0xff] }
  0x79   :  { %5405 = vmatpush1.bf16.msra.mxu0 %v5404_v19  ;;  %v255_v19 = vld [vmem:[#allocation6 + $0x440] sm:$0xff]  ;;  %v270_v27 = vld [vmem:[#allocation6 + $0x4b8] sm:$0xff]  ;;  %v92_v28 = vld [vmem:[%s8543_s0 + $0x28] sm:$0xff] }
  0x7a   :  { %5533 = vmatpush1.bf16.msra.mxu1 %v5532_v20  ;;  %5407 = vmatprep.subr.bf16.mxu0 %v5406_v21  ;;  %v259_v20 = vld [vmem:[#allocation6 + $0x460] sm:$0xff]  ;;  %v257_v21 = vld [vmem:[#allocation6 + $0x450] sm:$0xff]  ;;  %v5558_v36 = vpack.c.bf16 %v270_v27, %v266_v26  ;;  %v272_v38 = vld [vmem:[#allocation6 + $0x4c8] sm:$0xff] }
  0x7b   :  { %5535 = vmatprep.subr.bf16.mxu1 %v5534_v25  ;;  %v268_v25 = vld [vmem:[#allocation6 + $0x4a8] sm:$0xff]  ;;  %v5428_v29 = vpack.c.bf16 %v259_v20, %v255_v19  ;;  %v267_v34 = vld [vmem:[#allocation6 + $0x4a0] sm:$0xff]  ;;  %v265_v35 = vld [vmem:[#allocation6 + $0x490] sm:$0xff] }
  0x7c   :  { %v276_v39 = vld [vmem:[#allocation6 + $0x4e8] sm:$0xff]  ;;  %v274_v40 = vld [vmem:[#allocation6 + $0x4d8] sm:$0xff]  ;;  %v271_v47 = vld [vmem:[#allocation6 + $0x4c0] sm:$0xff] }
  0x7d   :  { %5409 = vmatpush1.bf16.msra.mxu0 %v5408_v31  ;;  %v5556_v31 = vpack.c.bf16 %v261_v23, %v257_v21  ;;  %v278_v41 = vld [vmem:[#allocation6 + $0x4f8] sm:$0xff]  ;;  %v96_v42 = vld [vmem:[%s8543_s0 + $0x48] sm:$0xff]  ;;  %v5434_v46 = vpack.c.bf16 %v276_v39, %v272_v38  ;;  %v275_v48 = vld [vmem:[#allocation6 + $0x4e0] sm:$0xff] }
  0x7e   :  { %5537 = vmatpush1.bf16.msra.mxu1 %v5536_v32  ;;  %5411 = vmatprep.subr.bf16.mxu0 %v5410_v33  ;;  %v5430_v32 = vpack.c.bf16 %v268_v25, %v264_v24  ;;  %v263_v33 = vld [vmem:[#allocation6 + $0x480] sm:$0xff]  ;;  %v5562_v50 = vpack.c.bf16 %v278_v41, %v274_v40  ;;  %v277_v51 = vld [vmem:[#allocation6 + $0x4f0] sm:$0xff]  ;;  %v280_v52 = vld [vmem:[#allocation6 + $0x508] sm:$0xff] }
  0x7f   :  { %5539 = vmatprep.subr.bf16.mxu1 %v5538_v37  ;;  %v269_v37 = vld [vmem:[#allocation6 + $0x4b0] sm:$0xff]  ;;  %v284_v53 = vld [vmem:[#allocation6 + $0x528] sm:$0xff]  ;;  %v282_v54 = vld [vmem:[#allocation6 + $0x518] sm:$0xff] }
  0x80   :  { %v99_v58 = vld [vmem:[%s8543_s0 + $0x60] sm:$0xff]  ;;  %v5438_v60 = vpack.c.bf16 %v284_v53, %v280_v52  ;;  %v281_v63 = vld [vmem:[#allocation6 + $0x510] sm:$0xff]  ;;  %v288_v2 = vld [vmem:[#allocation6 + $0x548] sm:$0xff] }
  0x81   :  { %5413 = vmatpush1.bf16.msra.mxu0 %v5412_v43  ;;  %v5432_v43 = vpack.c.bf16 %v267_v34, %v263_v33  ;;  %v283_v62 = vld [vmem:[#allocation6 + $0x520] sm:$0xff]  ;;  %v285_v1 = vld [vmem:[#allocation6 + $0x530] sm:$0xff]  ;;  %v104_v6 = vld [vmem:[%s8543_s0 + $0x88] sm:$0xff] }
  0x82   :  { %5541 = vmatpush1.bf16.msra.mxu1 %v5540_v44  ;;  %5415 = vmatprep.subr.bf16.mxu0 %v5414_v45  ;;  %v95_v44 = vld [vmem:[%s8543_s0 + $0x40] sm:$0xff]  ;;  %v5560_v45 = vpack.c.bf16 %v269_v37, %v265_v35  ;;  %v289_v13 = vld [vmem:[#allocation6 + $0x550] sm:$0xff]  ;;  %v302_v19 = vld [vmem:[#allocation6 + $0x5b8] sm:$0xff] }
  0x83   :  { %5543 = vmatprep.subr.bf16.mxu1 %v5542_v49  ;;  %v273_v49 = vld [vmem:[#allocation6 + $0x4d0] sm:$0xff]  ;;  %v103_v8 = vld [vmem:[%s8543_s0 + $0x80] sm:$0xff]  ;;  %v108_v20 = vld [vmem:[%s8543_s0 + $0xa8] sm:$0xff] }
  0x84   :  { %v5564_v59 = vpack.c.bf16 %v277_v51, %v273_v49  ;;  %v287_v11 = vld [vmem:[#allocation6 + $0x540] sm:$0xff]  ;;  %v297_v27 = vld [vmem:[#allocation6 + $0x590] sm:$0xff]  ;;  %v310_v33 = vld [vmem:[#allocation6 + $0x5f8] sm:$0xff] }
  0x85   :  { %5417 = vmatpush1.bf16.msra.mxu0 %v5416_v55  ;;  %v286_v55 = vld [vmem:[#allocation6 + $0x538] sm:$0xff]  ;;  %v291_v12 = vld [vmem:[#allocation6 + $0x560] sm:$0xff]  ;;  %v112_v34 = vld [vmem:[%s8543_s0 + $0xc8] sm:$0xff] }
  0x86   :  { %5545 = vmatpush1.bf16.msra.mxu1 %v5544_v56  ;;  %5419 = vmatprep.subr.bf16.mxu0 %v5418_v57  ;;  %v100_v56 = vld [vmem:[%s8543_s0 + $0x68] sm:$0xff]  ;;  %v5436_v57 = vpack.c.bf16 %v275_v48, %v271_v47  ;;  %v5566_v0 = vpack.c.bf16 %v286_v55, %v282_v54  ;;  %v5444_v21 = vpack.c.bf16 %v291_v12, %v287_v11  ;;  %v295_v25 = vld [vmem:[#allocation6 + $0x580] sm:$0xff]  ;;  %v305_v41 = vld [vmem:[#allocation6 + $0x5d0] sm:$0xff] }
  0x87   :  { %5547 = vmatprep.subr.bf16.mxu1 %v5546_v61  ;;  %v279_v61 = vld [vmem:[#allocation6 + $0x500] sm:$0xff]  ;;  %v318_v47 = vld [vmem:[#allocation6 + $0x638] sm:$0xff]  ;;  %v116_v48 = vld [vmem:[%s8543_s0 + $0xe8] sm:$0xff] }
  0x88   :  { %v5440_v7 = vpack.c.bf16 %v283_v62, %v279_v61  ;;  %v299_v26 = vld [vmem:[#allocation6 + $0x5a0] sm:$0xff]  ;;  %v313_v55 = vld [vmem:[#allocation6 + $0x610] sm:$0xff]  ;;  %v326_v61 = vld [vmem:[#allocation6 + $0x678] sm:$0xff] }
  0x89   :  { %5421 = vmatpush1.bf16.msra.mxu0 %v5420_v3  ;;  %v292_v3 = vld [vmem:[#allocation6 + $0x568] sm:$0xff]  ;;  %v5448_v35 = vpack.c.bf16 %v299_v26, %v295_v25  ;;  %v303_v39 = vld [vmem:[#allocation6 + $0x5c0] sm:$0xff]  ;;  %v90_v62 = vld [vmem:[%s8543_s0 + $0x18] sm:$0xff] }
  0x8a   :  { %5549 = vmatpush1.bf16.msra.mxu1 %v5548_v4  ;;  %5423 = vmatprep.subr.bf16.mxu0 %v5422_v5  ;;  %v290_v4 = vld [vmem:[#allocation6 + $0x558] sm:$0xff]  ;;  %v5442_v10 = vpack.c.bf16 %v292_v3, %v288_v2  ;;  %v307_v40 = vld [vmem:[#allocation6 + $0x5e0] sm:$0xff] }
  0x8b   :  { %5551 = vmatprep.subr.bf16.mxu1 %v5550_v9  ;;  %v294_v5 = vld [vmem:[#allocation6 + $0x578] sm:$0xff]  ;;  %v5568_v9 = vpack.c.bf16 %v285_v1, %v281_v63  ;;  %v5452_v49 = vpack.c.bf16 %v307_v40, %v303_v39  ;;  %v311_v53 = vld [vmem:[#allocation6 + $0x600] sm:$0xff]  ;;  %v345_v40 = vld [vmem:[#allocation6 + $0x710] sm:$0xff] }
  0x8c   :  { %462 = vmatmul.mubr.f32.vlgmr.msra.gmra.mrb[0].mxu0 %v87_v15  ;;  %v5570_v14 = vpack.c.bf16 %v294_v5, %v290_v4  ;;  %v315_v54 = vld [vmem:[#allocation6 + $0x620] sm:$0xff]  ;;  %v321_v4 = vld [vmem:[#allocation6 + $0x650] sm:$0xff] }
  0x8d   :  { %5425 = vmatpush1.bf16.msra.mxu0 %v5424_v16  ;;  %688 = vmatmul.mubr.f32.vlgmr.msra.gmra.mrb[0].mxu1 %v87_v15  ;;  %v293_v15 = vld [vmem:[#allocation6 + $0x570] sm:$0xff]  ;;  %v296_v16 = vld [vmem:[#allocation6 + $0x588] sm:$0xff]  ;;  %v5456_v63 = vpack.c.bf16 %v315_v54, %v311_v53  ;;  %v319_v2 = vld [vmem:[#allocation6 + $0x640] sm:$0xff] }
  0x8e   :  { %5553 = vmatpush1.bf16.msra.mxu1 %v5552_v17  ;;  %5427 = vmatprep.subr.bf16.mxu0 %v5426_v18  ;;  %v300_v17 = vld [vmem:[#allocation6 + $0x5a8] sm:$0xff]  ;;  %v298_v18 = vld [vmem:[#allocation6 + $0x598] sm:$0xff]  ;;  %v5572_v23 = vpack.c.bf16 %v293_v15, %v289_v13  ;;  %v323_v3 = vld [vmem:[#allocation6 + $0x660] sm:$0xff] }
  0x8f   :  { %5555 = vmatprep.subr.bf16.mxu1 %v5554_v22  ;;  %467 = vmatprep.mubr.f32.mxu0 %v92_v28  ;;  %v107_v22 = vld [vmem:[%s8543_s0 + $0xa0] sm:$0xff]  ;;  %v5446_v24 = vpack.c.bf16 %v300_v17, %v296_v16  ;;  %v5460_v11 = vpack.c.bf16 %v323_v3, %v319_v2  ;;  %v329_v16 = vld [vmem:[#allocation6 + $0x690] sm:$0xff]  ;;  %v368_v3 = vld [vmem:[#allocation6 + $0x7c8] sm:$0xff] }
  0x90   :  { %693 = vmatprep.mubr.f32.mxu1 %v92_v28  ;;  %468 = vmatmul.mubr.f32.gmra.mrb[2].mxu0 %v91_v30  ;;  %v5574_v28 = vpack.c.bf16 %v302_v19, %v298_v18  ;;  %v331_v15 = vld [vmem:[#allocation6 + $0x6a0] sm:$0xff]  ;;  %v333_v18 = vld [vmem:[#allocation6 + $0x6b0] sm:$0xff]  ;;  %v336_v19 = vld [vmem:[#allocation6 + $0x6c8] sm:$0xff] }
  0x91   :  { %5429 = vmatpush1.bf16.msra.mxu0 %v5428_v29  ;;  %694 = vmatmul.mubr.f32.gmra.mrb[2].mxu1 %v91_v30  ;;  %v301_v29 = vld [vmem:[#allocation6 + $0x5b0] sm:$0xff]  ;;  %v304_v30 = vld [vmem:[#allocation6 + $0x5c8] sm:$0xff]  ;;  %v335_v26 = vld [vmem:[#allocation6 + $0x6c0] sm:$0xff] }
  0x92   :  { %5557 = vmatpush1.bf16.msra.mxu1 %v5556_v31  ;;  %5431 = vmatprep.subr.bf16.mxu0 %v5430_v32  ;;  %v308_v31 = vld [vmem:[#allocation6 + $0x5e8] sm:$0xff]  ;;  %v306_v32 = vld [vmem:[#allocation6 + $0x5d8] sm:$0xff]  ;;  %v5576_v37 = vpack.c.bf16 %v301_v29, %v297_v27  ;;  %v339_v27 = vld [vmem:[#allocation6 + $0x6e0] sm:$0xff] }
  0x93   :  { %5559 = vmatprep.subr.bf16.mxu1 %v5558_v36  ;;  %473 = vmatprep.mubr.f32.mxu0 %v96_v42  ;;  %v111_v36 = vld [vmem:[%s8543_s0 + $0xc0] sm:$0xff]  ;;  %v5450_v38 = vpack.c.bf16 %v308_v31, %v304_v30  ;;  %v341_v30 = vld [vmem:[#allocation6 + $0x6f0] sm:$0xff]  ;;  %v344_v31 = vld [vmem:[#allocation6 + $0x708] sm:$0xff] }
  0x94   :  { %699 = vmatprep.mubr.f32.mxu1 %v96_v42  ;;  %474 = vmatmul.mubr.f32.gmra.mrb[4].mxu0 %v95_v44  ;;  %v5578_v42 = vpack.c.bf16 %v310_v33, %v306_v32  ;;  %v348_v32 = vld [vmem:[#allocation6 + $0x728] sm:$0xff]  ;;  %v346_v33 = vld [vmem:[#allocation6 + $0x718] sm:$0xff]  ;;  %v347_v39 = vld [vmem:[#allocation6 + $0x720] sm:$0xff] }
  0x95   :  { %5433 = vmatpush1.bf16.msra.mxu0 %v5432_v43  ;;  %700 = vmatmul.mubr.f32.gmra.mrb[4].mxu1 %v95_v44  ;;  %v309_v43 = vld [vmem:[#allocation6 + $0x5f0] sm:$0xff]  ;;  %v312_v44 = vld [vmem:[#allocation6 + $0x608] sm:$0xff] }
  0x96   :  { %5561 = vmatpush1.bf16.msra.mxu1 %v5560_v45  ;;  %5435 = vmatprep.subr.bf16.mxu0 %v5434_v46  ;;  %v316_v45 = vld [vmem:[#allocation6 + $0x628] sm:$0xff]  ;;  %v314_v46 = vld [vmem:[#allocation6 + $0x618] sm:$0xff]  ;;  %v5580_v51 = vpack.c.bf16 %v309_v43, %v305_v41  ;;  %v357_v54 = vld [vmem:[#allocation6 + $0x770] sm:$0xff] }
  0x97   :  { %5563 = vmatprep.subr.bf16.mxu1 %v5562_v50  ;;  %479 = vmatprep.mubr.f32.mxu0 %v100_v56  ;;  %v115_v50 = vld [vmem:[%s8543_s0 + $0xe0] sm:$0xff]  ;;  %v5454_v52 = vpack.c.bf16 %v316_v45, %v312_v44  ;;  %v352_v43 = vld [vmem:[#allocation6 + $0x748] sm:$0xff]  ;;  %v354_v45 = vld [vmem:[#allocation6 + $0x758] sm:$0xff] }
  0x98   :  { %705 = vmatprep.mubr.f32.mxu1 %v100_v56  ;;  %480 = vmatmul.mubr.f32.gmra.mrb[6].mxu0 %v99_v58  ;;  %v5582_v56 = vpack.c.bf16 %v318_v47, %v314_v46  ;;  %v356_v44 = vld [vmem:[#allocation6 + $0x768] sm:$0xff]  ;;  %v358_v46 = vld [vmem:[#allocation6 + $0x778] sm:$0xff]  ;;  %v365_v2 = vld [vmem:[#allocation6 + $0x7b0] sm:$0xff] }
  0x99   :  { %5437 = vmatpush1.bf16.msra.mxu0 %v5436_v57  ;;  %706 = vmatmul.mubr.f32.gmra.mrb[6].mxu1 %v99_v58  ;;  %v317_v57 = vld [vmem:[#allocation6 + $0x630] sm:$0xff]  ;;  %v320_v58 = vld [vmem:[#allocation6 + $0x648] sm:$0xff]  ;;  %v5602_v53 = vpack.c.bf16 %v358_v46, %v354_v45  ;;  %v910_v45 = vld [vmem:[#allocation8 + $0x98] sm:$0xff] }
  0x9a   :  { %5565 = vmatpush1.bf16.msra.mxu1 %v5564_v59  ;;  %5439 = vmatprep.subr.bf16.mxu0 %v5438_v60  ;;  %v324_v59 = vld [vmem:[#allocation6 + $0x668] sm:$0xff]  ;;  %v322_v60 = vld [vmem:[#allocation6 + $0x658] sm:$0xff] }
  0x9b   :  { %5567 = vmatprep.subr.bf16.mxu1 %v5566_v0  ;;  %485 = vmatprep.mubr.f32.mxu0 %v104_v6  ;;  %v5584_v0 = vpack.c.bf16 %v317_v57, %v313_v55  ;;  %v5458_v1 = vpack.c.bf16 %v324_v59, %v320_v58  ;;  %v5586_v5 = vpack.c.bf16 %v326_v61, %v322_v60  ;;  %v360_v55 = vld [vmem:[#allocation6 + $0x788] sm:$0xff]  ;;  %v362_v57 = vld [vmem:[#allocation6 + $0x798] sm:$0xff] }
  0x9c   :  { %711 = vmatprep.mubr.f32.mxu1 %v104_v6  ;;  %486 = vmatmul.mubr.f32.gmra.mrb[8].mxu0 %v103_v8  ;;  %v325_v6 = vld [vmem:[#allocation6 + $0x670] sm:$0xff]  ;;  %v366_v58 = vld [vmem:[#allocation6 + $0x7b8] sm:$0xff] }
  0x9d   :  { %5441 = vmatpush1.bf16.msra.mxu0 %v5440_v7  ;;  %712 = vmatmul.mubr.f32.gmra.mrb[8].mxu1 %v103_v8  ;;  %v328_v7 = vld [vmem:[#allocation6 + $0x688] sm:$0xff]  ;;  %v5588_v12 = vpack.c.bf16 %v325_v6, %v321_v4  ;;  %v374_v6 = vld [vmem:[#allocation6 + $0x7f8] sm:$0xff] }
  0x9e   :  { %5569 = vmatpush1.bf16.msra.mxu1 %v5568_v9  ;;  %5443 = vmatprep.subr.bf16.mxu0 %v5442_v10  ;;  %v332_v8 = vld [vmem:[#allocation6 + $0x6a8] sm:$0xff]  ;;  %v330_v9 = vld [vmem:[#allocation6 + $0x698] sm:$0xff] }
  0x9f   :  { %5571 = vmatprep.subr.bf16.mxu1 %v5570_v14  ;;  %491 = vmatprep.mubr.f32.mxu0 %v108_v20  ;;  %v334_v10 = vld [vmem:[#allocation6 + $0x6b8] sm:$0xff]  ;;  %v5462_v13 = vpack.c.bf16 %v332_v8, %v328_v7  ;;  %v327_v14 = vld [vmem:[#allocation6 + $0x680] sm:$0xff]  ;;  %v372_v4 = vld [vmem:[#allocation6 + $0x7e8] sm:$0xff] }
  0xa0   :  { %717 = vmatprep.mubr.f32.mxu1 %v108_v20  ;;  %492 = vmatmul.mubr.f32.gmra.mrb[10].mxu0 %v107_v22  ;;  %v5590_v17 = vpack.c.bf16 %v334_v10, %v330_v9  ;;  %v340_v20 = vld [vmem:[#allocation6 + $0x6e8] sm:$0xff]  ;;  %v5482_v9 = vpack.c.bf16 %v372_v4, %v368_v3  ;;  %v367_v10 = vld [vmem:[#allocation6 + $0x7c0] sm:$0xff]  ;;  %v914_v46 = vld [vmem:[#allocation8 + $0xb8] sm:$0xff] }
  0xa1   :  { %5445 = vmatpush1.bf16.msra.mxu0 %v5444_v21  ;;  %718 = vmatmul.mubr.f32.gmra.mrb[10].mxu1 %v107_v22  ;;  %v338_v21 = vld [vmem:[#allocation6 + $0x6d8] sm:$0xff]  ;;  %v5466_v25 = vpack.c.bf16 %v340_v20, %v336_v19  ;;  %v921_v3 = vld [vmem:[#allocation8 + $0xf0] sm:$0xff] }
  0xa2   :  { %5573 = vmatpush1.bf16.msra.mxu1 %v5572_v23  ;;  %5447 = vmatprep.subr.bf16.mxu0 %v5446_v24  ;;  %v342_v22 = vld [vmem:[#allocation6 + $0x6f8] sm:$0xff]  ;;  %v5464_v23 = vpack.c.bf16 %v331_v15, %v327_v14  ;;  %v5592_v24 = vpack.c.bf16 %v333_v18, %v329_v16  ;;  %v373_v14 = vld [vmem:[#allocation6 + $0x7f0] sm:$0xff]  ;;  %v892_v15 = vld [vmem:[#allocation8 + $0x8] sm:$0xff] }
  0xa3   :  { %5575 = vmatprep.subr.bf16.mxu1 %v5574_v28  ;;  %497 = vmatprep.mubr.f32.mxu0 %v112_v34  ;;  %v337_v28 = vld [vmem:[#allocation6 + $0x6d0] sm:$0xff]  ;;  %v5594_v29 = vpack.c.bf16 %v342_v22, %v338_v21  ;;  %v896_v16 = vld [vmem:[#allocation8 + $0x28] sm:$0xff]  ;;  %v898_v18 = vld [vmem:[#allocation8 + $0x38] sm:$0xff] }
  0xa4   :  { %723 = vmatprep.mubr.f32.mxu1 %v112_v34  ;;  %498 = vmatmul.mubr.f32.gmra.mrb[12].mxu0 %v111_v36  ;;  %v350_v34 = vld [vmem:[#allocation6 + $0x738] sm:$0xff]  ;;  %v7429_v21 = vpack.c.bf16 %v896_v16, %v892_v15  ;;  %v891_v22 = vld [vmem:[#allocation8] sm:$0xff]  ;;  %v925_v16 = vld [vmem:[#allocation8 + $0x110] sm:$0xff] }
  0xa5   :  { %5449 = vmatpush1.bf16.msra.mxu0 %v5448_v35  ;;  %724 = vmatmul.mubr.f32.gmra.mrb[12].mxu1 %v111_v36  ;;  %v5468_v35 = vpack.c.bf16 %v339_v27, %v335_v26  ;;  %v5596_v36 = vpack.c.bf16 %v341_v30, %v337_v28  ;;  %v5598_v41 = vpack.c.bf16 %v350_v34, %v346_v33  ;;  %v897_v26 = vld [vmem:[#allocation8 + $0x30] sm:$0xff]  ;;  %v900_v27 = vld [vmem:[#allocation8 + $0x48] sm:$0xff]  ;;  %v899_v34 = vld [vmem:[#allocation8 + $0x40] sm:$0xff] }
  0xa6   :  { %5577 = vmatpush1.bf16.msra.mxu1 %v5576_v37  ;;  %5451 = vmatprep.subr.bf16.mxu0 %v5450_v38  ;;  %v5470_v37 = vpack.c.bf16 %v348_v32, %v344_v31  ;;  %v343_v38 = vld [vmem:[#allocation6 + $0x700] sm:$0xff]  ;;  %v904_v28 = vld [vmem:[#allocation8 + $0x68] sm:$0xff]  ;;  %v902_v31 = vld [vmem:[#allocation8 + $0x58] sm:$0xff] }
  0xa7   :  { %5579 = vmatprep.subr.bf16.mxu1 %v5578_v42  ;;  %503 = vmatprep.mubr.f32.mxu0 %v116_v48  ;;  %v349_v42 = vld [vmem:[#allocation6 + $0x730] sm:$0xff]  ;;  %v5472_v47 = vpack.c.bf16 %v347_v39, %v343_v38  ;;  %v906_v32 = vld [vmem:[#allocation8 + $0x78] sm:$0xff] }
  0xa8   :  { %729 = vmatprep.mubr.f32.mxu1 %v116_v48  ;;  %504 = vmatmul.mubr.f32.gmra.mrb[14].mxu0 %v115_v50  ;;  %v5600_v48 = vpack.c.bf16 %v349_v42, %v345_v40  ;;  %v901_v38 = vld [vmem:[#allocation8 + $0x50] sm:$0xff]  ;;  %v7447_v40 = vpack.c.bf16 %v906_v32, %v902_v31  ;;  %v912_v42 = vld [vmem:[#allocation8 + $0xa8] sm:$0xff]  ;;  %v110_v31 = vld [vmem:[%s8543_s0 + $0xb8] sm:$0xff] }
  0xa9   :  { %5453 = vmatpush1.bf16.msra.mxu0 %v5452_v49  ;;  %730 = vmatmul.mubr.f32.gmra.mrb[14].mxu1 %v115_v50  ;;  %v5474_v49 = vpack.c.bf16 %v356_v44, %v352_v43  ;;  %v351_v50 = vld [vmem:[#allocation6 + $0x740] sm:$0xff]  ;;  %v905_v39 = vld [vmem:[#allocation8 + $0x70] sm:$0xff] }
  0xaa   :  { %5581 = vmatpush1.bf16.msra.mxu1 %v5580_v51  ;;  %5455 = vmatprep.subr.bf16.mxu0 %v5454_v52  ;;  %v355_v51 = vld [vmem:[#allocation6 + $0x760] sm:$0xff]  ;;  %v353_v52 = vld [vmem:[#allocation6 + $0x750] sm:$0xff] }
  0xab   :  { %5583 = vmatprep.subr.bf16.mxu1 %v5582_v56  ;;  %574 = vmatprep.mubr.f32.mxu0 %v90_v62  ;;  %v364_v56 = vld [vmem:[#allocation6 + $0x7a8] sm:$0xff]  ;;  %v5476_v59 = vpack.c.bf16 %v355_v51, %v351_v50  ;;  %v5604_v60 = vpack.c.bf16 %v357_v54, %v353_v52  ;;  %v93_v43 = vld [vmem:[%s8543_s0 + $0x30] sm:$0xff]  ;;  %v98_v50 = vld [vmem:[%s8543_s0 + $0x58] sm:$0xff]  ;;  %v7465_v54 = vpack.c.bf16 %v914_v46, %v910_v45 }
  0xac   :  { %800 = vmatprep.mubr.f32.mxu1 %v90_v62  ;;  %v5478_v61 = vpack.c.bf16 %v364_v56, %v360_v55  ;;  %v359_v62 = vld [vmem:[#allocation6 + $0x780] sm:$0xff]  ;;  %v909_v52 = vld [vmem:[#allocation8 + $0x90] sm:$0xff]  ;;  %v916_v55 = vld [vmem:[#allocation8 + $0xc8] sm:$0xff] }
  0xad   :  { %5457 = vmatpush1.bf16.msra.mxu0 %v5456_v63  ;;  %v363_v63 = vld [vmem:[#allocation6 + $0x7a0] sm:$0xff]  ;;  %v920_v56 = vld [vmem:[#allocation8 + $0xe8] sm:$0xff]  ;;  %v946_v45 = vld [vmem:[#allocation8 + $0x1b8] sm:$0xff] }
  0xae   :  { %5585 = vmatpush1.bf16.msra.mxu1 %v5584_v0  ;;  %5459 = vmatprep.subr.bf16.mxu0 %v5458_v1  ;;  %v361_v0 = vld [vmem:[#allocation6 + $0x790] sm:$0xff]  ;;  %v5606_v1 = vpack.c.bf16 %v366_v58, %v362_v57  ;;  %v5480_v7 = vpack.c.bf16 %v363_v63, %v359_v62  ;;  %v915_v62 = vld [vmem:[#allocation8 + $0xc0] sm:$0xff] }
  0xaf   :  { %5587 = vmatprep.subr.bf16.mxu1 %v5586_v5  ;;  %v370_v5 = vld [vmem:[#allocation6 + $0x7d8] sm:$0xff]  ;;  %v5608_v8 = vpack.c.bf16 %v365_v2, %v361_v0  ;;  %v97_v57 = vld [vmem:[%s8543_s0 + $0x50] sm:$0xff]  ;;  %v919_v63 = vld [vmem:[#allocation8 + $0xe0] sm:$0xff] }
  0xb0   :  { %v102_v0 = vld [vmem:[%s8543_s0 + $0x78] sm:$0xff]  ;;  %v917_v2 = vld [vmem:[#allocation8 + $0xd0] sm:$0xff] }
  0xb1   :  { %5461 = vmatpush1.bf16.msra.mxu0 %v5460_v11  ;;  %v371_v11 = vld [vmem:[#allocation6 + $0x7e0] sm:$0xff] }
  0xb2   :  { %5589 = vmatpush1.bf16.msra.mxu1 %v5588_v12  ;;  %5463 = vmatprep.subr.bf16.mxu0 %v5462_v13  ;;  %v369_v12 = vld [vmem:[#allocation6 + $0x7d0] sm:$0xff]  ;;  %v5610_v13 = vpack.c.bf16 %v374_v6, %v370_v5  ;;  %v5484_v19 = vpack.c.bf16 %v371_v11, %v367_v10  ;;  %v924_v5 = vld [vmem:[#allocation8 + $0x108] sm:$0xff]  ;;  %v930_v10 = vld [vmem:[#allocation8 + $0x138] sm:$0xff]  ;;  %v7492_v11 = vpack.c.bf16 %v921_v3, %v917_v2 }
  0xb3   :  { %5591 = vmatprep.subr.bf16.mxu1 %v5590_v17  ;;  %v894_v17 = vld [vmem:[#allocation8 + $0x18] sm:$0xff]  ;;  %v5612_v20 = vpack.c.bf16 %v373_v14, %v369_v12  ;;  %v928_v6 = vld [vmem:[#allocation8 + $0x128] sm:$0xff]  ;;  %v923_v12 = vld [vmem:[#allocation8 + $0x100] sm:$0xff] }
  0xb4   :  { %v106_v14 = vld [vmem:[%s8543_s0 + $0x98] sm:$0xff]  ;;  %v7498_v15 = vpack.c.bf16 %v928_v6, %v924_v5  ;;  %v947_v3 = vld [vmem:[#allocation8 + $0x1c0] sm:$0xff] }
  0xb5   :  { %5465 = vmatpush1.bf16.msra.mxu0 %v5464_v23  ;;  %v895_v23 = vld [vmem:[#allocation8 + $0x20] sm:$0xff]  ;;  %v118_v6 = vld [vmem:[%s8543_s0 + $0xf8] sm:$0xff] }
  0xb6   :  { %5593 = vmatpush1.bf16.msra.mxu1 %v5592_v24  ;;  %5467 = vmatprep.subr.bf16.mxu0 %v5466_v25  ;;  %v7431_v24 = vpack.c.bf16 %v898_v18, %v894_v17  ;;  %v893_v25 = vld [vmem:[#allocation8 + $0x10] sm:$0xff]  ;;  %v7436_v30 = vpack.c.bf16 %v895_v23, %v891_v22  ;;  %v951_v5 = vld [vmem:[#allocation8 + $0x1e0] sm:$0xff] }
  0xb7   :  { %5595 = vmatprep.subr.bf16.mxu1 %v5594_v29  ;;  %v89_v29 = vld [vmem:[%s8543_s0 + $0x10] sm:$0xff]  ;;  %v7439_v33 = vpack.c.bf16 %v897_v26, %v893_v25  ;;  %v934_v25 = vld [vmem:[#allocation8 + $0x158] sm:$0xff] }
  0xb8   :  { %v929_v17 = vld [vmem:[#allocation8 + $0x130] sm:$0xff]  ;;  %v938_v26 = vld [vmem:[#allocation8 + $0x178] sm:$0xff] }
  0xb9   :  { %5469 = vmatpush1.bf16.msra.mxu0 %v5468_v35  ;;  %v903_v35 = vld [vmem:[#allocation8 + $0x60] sm:$0xff]  ;;  %v105_v22 = vld [vmem:[%s8543_s0 + $0x90] sm:$0xff] }
  0xba   :  { %5597 = vmatpush1.bf16.msra.mxu1 %v5596_v36  ;;  %5471 = vmatprep.subr.bf16.mxu0 %v5470_v37  ;;  %v94_v36 = vld [vmem:[%s8543_s0 + $0x38] sm:$0xff]  ;;  %v7445_v37 = vpack.c.bf16 %v904_v28, %v900_v27  ;;  %v7453_v44 = vpack.c.bf16 %v903_v35, %v899_v34  ;;  %v7510_v27 = vpack.c.bf16 %v929_v17, %v925_v16  ;;  %v931_v28 = vld [vmem:[#allocation8 + $0x140] sm:$0xff]  ;;  %v933_v34 = vld [vmem:[#allocation8 + $0x150] sm:$0xff]  ;;  %v7251_v17 = vmov 0.0  }
  0xbb   :  { %5599 = vmatprep.subr.bf16.mxu1 %v5598_v41  ;;  %v908_v41 = vld [vmem:[#allocation8 + $0x88] sm:$0xff]  ;;  %v937_v35 = vld [vmem:[#allocation8 + $0x170] sm:$0xff] }
  0xbc   :  { %v7462_v51 = vpack.c.bf16 %v912_v42, %v908_v41  ;;  %v109_v41 = vld [vmem:[%s8543_s0 + $0xb0] sm:$0xff]  ;;  %v7528_v46 = vpack.c.bf16 %v937_v35, %v933_v34 }
  0xbd   :  { %5473 = vmatpush1.bf16.msra.mxu0 %v5472_v47  ;;  %v7456_v47 = vpack.c.bf16 %v905_v39, %v901_v38  ;;  %v940_v38 = vld [vmem:[#allocation8 + $0x188] sm:$0xff] }
  0xbe   :  { %5601 = vmatpush1.bf16.msra.mxu1 %v5600_v48  ;;  %5475 = vmatprep.subr.bf16.mxu0 %v5474_v49  ;;  %v907_v48 = vld [vmem:[#allocation8 + $0x80] sm:$0xff]  ;;  %v944_v39 = vld [vmem:[#allocation8 + $0x1a8] sm:$0xff] }
  0xbf   :  { %5603 = vmatprep.subr.bf16.mxu1 %v5602_v53  ;;  %v911_v49 = vld [vmem:[#allocation8 + $0xa0] sm:$0xff]  ;;  %v913_v53 = vld [vmem:[#allocation8 + $0xb0] sm:$0xff] }
  0xc0   :  { %v7471_v58 = vpack.c.bf16 %v911_v49, %v907_v48  ;;  %v939_v48 = vld [vmem:[#allocation8 + $0x180] sm:$0xff] }
  0xc1   :  { %5477 = vmatpush1.bf16.msra.mxu0 %v5476_v59  ;;  %v918_v59 = vld [vmem:[#allocation8 + $0xd8] sm:$0xff]  ;;  %v943_v49 = vld [vmem:[#allocation8 + $0x1a0] sm:$0xff] }
  0xc2   :  { %5605 = vmatpush1.bf16.msra.mxu1 %v5604_v60  ;;  %5479 = vmatprep.subr.bf16.mxu0 %v5478_v61  ;;  %v922_v60 = vld [vmem:[#allocation8 + $0xf8] sm:$0xff]  ;;  %v7474_v61 = vpack.c.bf16 %v913_v53, %v909_v52  ;;  %v7534_v52 = vpack.c.bf16 %v944_v39, %v940_v38  ;;  %v941_v53 = vld [vmem:[#allocation8 + $0x190] sm:$0xff] }
  0xc3   :  { %5607 = vmatprep.subr.bf16.mxu1 %v5606_v1  ;;  %v7480_v1 = vpack.c.bf16 %v920_v56, %v916_v55  ;;  %v7483_v4 = vpack.c.bf16 %v922_v60, %v918_v59  ;;  %v945_v55 = vld [vmem:[#allocation8 + $0x1b0] sm:$0xff]  ;;  %v952_v59 = vld [vmem:[#allocation8 + $0x1e8] sm:$0xff] }
  0xc4   :  { %v113_v60 = vld [vmem:[%s8543_s0 + $0xd0] sm:$0xff]  ;;  %v7546_v2 = vpack.c.bf16 %v945_v55, %v941_v53 }
  0xc5   :  { %5481 = vmatpush1.bf16.msra.mxu0 %v5480_v7  ;;  %v101_v7 = vld [vmem:[%s8543_s0 + $0x70] sm:$0xff] }
  0xc6   :  { %5609 = vmatpush1.bf16.msra.mxu1 %v5608_v8  ;;  %5483 = vmatprep.subr.bf16.mxu0 %v5482_v9  ;;  %v7489_v8 = vpack.c.bf16 %v919_v63, %v915_v62  ;;  %v926_v9 = vld [vmem:[#allocation8 + $0x118] sm:$0xff]  ;;  %v7543_v62 = vpack.c.bf16 %v943_v49, %v939_v48 }
  0xc7   :  { %5611 = vmatprep.subr.bf16.mxu1 %v5610_v13  ;;  %v927_v13 = vld [vmem:[#allocation8 + $0x120] sm:$0xff]  ;;  %v7501_v18 = vpack.c.bf16 %v930_v10, %v926_v9  ;;  %v950_v63 = vld [vmem:[#allocation8 + $0x1d8] sm:$0xff]  ;;  %v949_v9 = vld [vmem:[#allocation8 + $0x1d0] sm:$0xff] }
  0xc8   :  { %v7507_v23 = vpack.c.bf16 %v927_v13, %v923_v12  ;;  %v953_v10 = vld [vmem:[#allocation8 + $0x1f0] sm:$0xff] }
  0xc9   :  { %5485 = vmatpush1.bf16.msra.mxu0 %v5484_v19  ;;  %v932_v19 = vld [vmem:[#allocation8 + $0x148] sm:$0xff]  ;;  %v117_v13 = vld [vmem:[%s8543_s0 + $0xf0] sm:$0xff]  ;;  %v7564_v16 = vpack.c.bf16 %v953_v10, %v949_v9 }
  0xca   :  { %5613 = vmatpush1.bf16.msra.mxu1 %v5612_v20  ;;  %5615 = vmatprep.subr.bf16.mxu0 %v7429_v21  ;;  %v936_v20 = vld [vmem:[#allocation8 + $0x168] sm:$0xff] }
  0xcb   :  { %5647 = vmatprep.subr.bf16.mxu1 %v7431_v24  ;;  %v7516_v32 = vpack.c.bf16 %v936_v20, %v932_v19  ;;  %v377_v19 = vlaneseq }
  0xcc   :  { %575 = vmatmul.mubr.f32.vlgmr.msra.gmra.mrb[0].mxu0 %v89_v29 }
  0xcd   :  { %801 = vmatmul.mubr.f32.vlgmr.msra.gmra.mrb[0].mxu1 %v89_v29  ;;  %5617 = vmatpush1.bf16.msra.mxu0 %v7436_v30  ;;  %v935_v29 = vld [vmem:[#allocation8 + $0x160] sm:$0xff]  ;;  %v7610_v20 = vshrl.u32 %v377_v19, 7 }
  0xce   :  { %5649 = vmatpush1.bf16.msra.mxu1 %v7439_v33  ;;  %580 = vmatprep.mubr.f32.mxu0 %v94_v36  ;;  %v7525_v42 = vpack.c.bf16 %v935_v29, %v931_v28 }
  0xcf   :  { %806 = vmatprep.mubr.f32.mxu1 %v94_v36  ;;  %5619 = vmatprep.subr.bf16.mxu0 %v7445_v37  ;;  %v7519_v36 = vpack.c.bf16 %v938_v26, %v934_v25  ;;  %v375_v25 = vld [vmem:[%s8546_s3] sm:$0xf]  ;;  %v383_v26 = vsub.s32 1, %v7610_v20  ;;  %v391_v29 = vsub.s32 3, %v7610_v20  ;;  %v387_v48 = vsub.s32 2, %v7610_v20 }
  0xd0   :  { %581 = vmatmul.mubr.f32.gmra.mrb[2].mxu0 %v93_v43  ;;  %5651 = vmatprep.subr.bf16.mxu1 %v7447_v40 }
  0xd1   :  { %807 = vmatmul.mubr.f32.gmra.mrb[2].mxu1 %v93_v43  ;;  %5621 = vmatpush1.bf16.msra.mxu0 %v7453_v44  ;;  %v942_v43 = vld [vmem:[#allocation8 + $0x198] sm:$0xff] }
  0xd2   :  { %5653 = vmatpush1.bf16.msra.mxu1 %v7456_v47  ;;  %586 = vmatprep.mubr.f32.mxu0 %v98_v50  ;;  %v7537_v56 = vpack.c.bf16 %v946_v45, %v942_v43  ;;  %v7630_v45 = vrot.slane %v375_v25, %v391_v29 }
  0xd3   :  { %812 = vmatprep.mubr.f32.mxu1 %v98_v50  ;;  %5623 = vmatprep.subr.bf16.mxu0 %v7462_v51  ;;  %v114_v50 = vld [vmem:[%s8543_s0 + $0xd8] sm:$0xff] }
  0xd4   :  { %587 = vmatmul.mubr.f32.gmra.mrb[4].mxu0 %v97_v57  ;;  %5655 = vmatprep.subr.bf16.mxu1 %v7465_v54 }
  0xd5   :  { %813 = vmatmul.mubr.f32.gmra.mrb[4].mxu1 %v97_v57  ;;  %5625 = vmatpush1.bf16.msra.mxu0 %v7471_v58  ;;  %v948_v57 = vld [vmem:[#allocation8 + $0x1c8] sm:$0xff] }
  0xd6   :  { %5657 = vmatpush1.bf16.msra.mxu1 %v7474_v61  ;;  %592 = vmatprep.mubr.f32.mxu0 %v102_v0 }
  0xd7   :  { %818 = vmatprep.mubr.f32.mxu1 %v102_v0  ;;  %5627 = vmatprep.subr.bf16.mxu0 %v7480_v1  ;;  %v954_v0 = vld [vmem:[#allocation8 + $0x1f8] sm:$0xff] }
  0xd8   :  { %593 = vmatmul.mubr.f32.gmra.mrb[6].mxu0 %v101_v7  ;;  %5659 = vmatprep.subr.bf16.mxu1 %v7483_v4  ;;  %v7555_v12 = vpack.c.bf16 %v954_v0, %v950_v63 }
  0xd9   :  { %819 = vmatmul.mubr.f32.gmra.mrb[6].mxu1 %v101_v7  ;;  %5629 = vmatpush1.bf16.msra.mxu0 %v7489_v8  ;;  %v7552_v7 = vpack.c.bf16 %v952_v59, %v948_v57 }
  0xda   :  { %5661 = vmatpush1.bf16.msra.mxu1 %v7492_v11  ;;  %598 = vmatprep.mubr.f32.mxu0 %v106_v14 }
  0xdb   :  { %824 = vmatprep.mubr.f32.mxu1 %v106_v14  ;;  %5631 = vmatprep.subr.bf16.mxu0 %v7498_v15  ;;  %v7561_v14 = vpack.c.bf16 %v951_v5, %v947_v3 }
  0xdc   :  { %599 = vmatmul.mubr.f32.gmra.mrb[8].mxu0 %v105_v22  ;;  %5663 = vmatprep.subr.bf16.mxu1 %v7501_v18 }
  0xdd   :  { %825 = vmatmul.mubr.f32.gmra.mrb[8].mxu1 %v105_v22  ;;  %5633 = vmatpush1.bf16.msra.mxu0 %v7507_v23  ;;  %v379_v22 = vsub.s32 0, %v7610_v20 }
  0xde   :  { %5665 = vmatpush1.bf16.msra.mxu1 %v7510_v27  ;;  %604 = vmatprep.mubr.f32.mxu0 %v110_v31 }
  0xdf   :  { %830 = vmatprep.mubr.f32.mxu1 %v110_v31  ;;  %5635 = vmatprep.subr.bf16.mxu0 %v7516_v32  ;;  %v7619_v28 = vrot.slane %v375_v25, %v379_v22 }
  0xe0   :  { %605 = vmatmul.mubr.f32.gmra.mrb[10].mxu0 %v109_v41  ;;  %5667 = vmatprep.subr.bf16.mxu1 %v7519_v36 }
  0xe1   :  { %831 = vmatmul.mubr.f32.gmra.mrb[10].mxu1 %v109_v41  ;;  %5637 = vmatpush1.bf16.msra.mxu0 %v7525_v42 }
  0xe2   :  { %5669 = vmatpush1.bf16.msra.mxu1 %v7528_v46  ;;  %610 = vmatprep.mubr.f32.mxu0 %v114_v50 }
  0xe3   :  { %836 = vmatprep.mubr.f32.mxu1 %v114_v50  ;;  %5639 = vmatprep.subr.bf16.mxu0 %v7534_v52  ;;  %v7636_v50 = vrot.slane %v375_v25, %v387_v48 }
  0xe4   :  { %611 = vmatmul.mubr.f32.gmra.mrb[12].mxu0 %v113_v60  ;;  %5671 = vmatprep.subr.bf16.mxu1 %v7537_v56 }
  0xe5   :  { %837 = vmatmul.mubr.f32.gmra.mrb[12].mxu1 %v113_v60  ;;  %5641 = vmatpush1.bf16.msra.mxu0 %v7543_v62 }
  0xe6   :  { %5673 = vmatpush1.bf16.msra.mxu1 %v7546_v2  ;;  %616 = vmatprep.mubr.f32.mxu0 %v118_v6 }
  0xe7   :  { %842 = vmatprep.mubr.f32.mxu1 %v118_v6  ;;  %5643 = vmatprep.subr.bf16.mxu0 %v7552_v7 }
  0xe8   :  { %617 = vmatmul.mubr.f32.gmra.mrb[14].mxu0 %v117_v13  ;;  %5675 = vmatprep.subr.bf16.mxu1 %v7555_v12 }
  0xe9   :  { %843 = vmatmul.mubr.f32.gmra.mrb[14].mxu1 %v117_v13  ;;  %5645 = vmatpush1.bf16.msra.mxu0 %v7561_v14 }
  0xea   :  { %5677 = vmatpush1.bf16.msra.mxu1 %v7564_v16  ;;  %1019 = vmatprep.mubr.f32.mxu0 %v7251_v17 }
  0xeb   :  { %1090 = vmatprep.mubr.f32.mxu1 %v7251_v17  ;;  %5679 = vmatprep.subr.bf16.mxu0 %v7429_v21 }
  0xec   :  { %1020 = vmatmul.mubr.f32.vlgmr.msra.gmra.mrb[0].mxu0 %v7251_v17  ;;  %5711 = vmatprep.subr.bf16.mxu1 %v7431_v24 }
  0xed   :  { %1091 = vmatmul.mubr.f32.vlgmr.msra.gmra.mrb[0].mxu1 %v7251_v17  ;;  %5681 = vmatpush1.bf16.msra.mxu0 %v7436_v30 }
  0xee   :  { %5713 = vmatpush1.bf16.msra.mxu1 %v7439_v33  ;;  %5683 = vmatprep.subr.bf16.mxu0 %v7445_v37 }
  0xef   :  { %5715 = vmatprep.subr.bf16.mxu1 %v7447_v40  ;;  %1265 = vmatprep.mubr.f32.mxu0 %v7251_v17 }
  0xf0   :  { %1336 = vmatprep.mubr.f32.mxu1 %v7251_v17 }
  0xf1   :  { %5685 = vmatpush1.bf16.msra.mxu0 %v7453_v44 }
  0xf2   :  { %5717 = vmatpush1.bf16.msra.mxu1 %v7456_v47  ;;  %5687 = vmatprep.subr.bf16.mxu0 %v7462_v51 }
  0xf3   :  { %5719 = vmatprep.subr.bf16.mxu1 %v7465_v54 }
  0xf5   :  { %5689 = vmatpush1.bf16.msra.mxu0 %v7471_v58 }
  0xf6   :  { %5721 = vmatpush1.bf16.msra.mxu1 %v7474_v61  ;;  %5691 = vmatprep.subr.bf16.mxu0 %v7480_v1 }
  0xf7   :  { %5723 = vmatprep.subr.bf16.mxu1 %v7483_v4 }
  0xf9   :  { %5693 = vmatpush1.bf16.msra.mxu0 %v7489_v8 }
  0xfa   :  { %5725 = vmatpush1.bf16.msra.mxu1 %v7492_v11  ;;  %5695 = vmatprep.subr.bf16.mxu0 %v7498_v15 }
  0xfb   :  { %5727 = vmatprep.subr.bf16.mxu1 %v7501_v18 }
  0xfd   :  { %5697 = vmatpush1.bf16.msra.mxu0 %v7507_v23 }
  0xfe   :  { %5729 = vmatpush1.bf16.msra.mxu1 %v7510_v27  ;;  %5699 = vmatprep.subr.bf16.mxu0 %v7516_v32 }
  0xff   :  { %5731 = vmatprep.subr.bf16.mxu1 %v7519_v36 }
 0x101   :  { %5701 = vmatpush1.bf16.msra.mxu0 %v7525_v42 }
 0x102   :  { %5733 = vmatpush1.bf16.msra.mxu1 %v7528_v46  ;;  %5703 = vmatprep.subr.bf16.mxu0 %v7534_v52 }
 0x103   :  { %5735 = vmatprep.subr.bf16.mxu1 %v7537_v56 }
 0x105   :  { %5705 = vmatpush1.bf16.msra.mxu0 %v7543_v62 }
 0x106   :  { %5737 = vmatpush1.bf16.msra.mxu1 %v7546_v2  ;;  %5707 = vmatprep.subr.bf16.mxu0 %v7552_v7 }
 0x107   :  { %5739 = vmatprep.subr.bf16.mxu1 %v7555_v12 }
 0x109   :  { %5709 = vmatpush1.bf16.msra.mxu0 %v7561_v14 }
 0x10a   :  { %5741 = vmatpush1.bf16.msra.mxu1 %v7564_v16  ;;  %5743 = vmatprep.subr.bf16.mxu0 %v7429_v21  ;;  %v7623_v21 = vrot.slane %v375_v25, %v383_v26 }
 0x10b   :  { %5775 = vmatprep.subr.bf16.mxu1 %v7431_v24 }
 0x1bf   :  { %v1021_v24 = vpop.f32.mrb[0].mxu0 }
 0x1c0   :  { %v6726_v31 = vadd.f32 %v1021_v24, %v7619_v28  ;;  %v1092_v34 = vpop.f32.mrb[0].mxu1  ;;  %v1023_v35 = vpop.f32.mrb[1].mxu0 }
 0x1c1   :  { %v6727_v38 = vadd.f32 %v1023_v35, %v7623_v21  ;;  %v1094_v39 = vpop.f32.mrb[1].mxu1  ;;  %v6742_v55 = vadd.f32 %v1092_v34, %v7636_v50 }
 0x1c2   :  { %v5257_v41 = vmul.f32 -1.442695, %v6726_v31  ;;  %v6743_v49 = vadd.f32 %v1094_v39, %v7630_v45 }
 0x1c3   :  { %v5258_v43 = vmul.f32 -1.442695, %v6727_v38 }
 0x1c4   :  { %6895 = vpow2.f32 %v5257_v41  ;;  %v5259_v53 = vmul.f32 -1.442695, %v6743_v49 }
 0x1c5   :  { %6897 = vpow2.f32 %v5258_v43 }
 0x1c6   :  { %6899 = vpow2.f32 %v5259_v53 }
 0x1c7   :  { %6901 = vtanh.f32 %v6742_v55 }
 0x1ce   :  { %v6896_v57 = vpop.eup %6895 }
 0x1cf   :  { %v6898_v59 = vpop.eup %6897  ;;  %v1104_v60 = vadd.f32 1.0, %v6896_v57 }
 0x1d0   :  { %v1110_v63 = vadd.f32 1.0, %v6898_v59  ;;  %v6900_v0 = vpop.eup %6899 }
 0x1d1   :  { %6903 = vrcp.f32 %v1104_v60  ;;  %v6902_v3 = vpop.eup %6901  ;;  %v1117_v10 = vadd.f32 1.0, %v6900_v0 }
 0x1d2   :  { %6905 = vrcp.f32 %v1110_v63 }
 0x1d3   :  { %6907 = vrcp.f32 %v1117_v10  ;;  %v1634_v10 = vld [vmem:[#allocation8 + $0x18] sm:$0xff] }
 0x1db   :  { %v6904_v5 = vpop.eup %6903 }
 0x1dc   :  { %v6906_v6 = vpop.eup %6905  ;;  %v1122_v9 = vmul.f32 %v6904_v5, %v6902_v3 }
 0x1dd   :  { %v1121_v13 = vmul.f32 0.0, %v6906_v6  ;;  %v6908_v25 = vpop.eup %6907  ;;  %v1632_v6 = vld [vmem:[#allocation8 + $0x8] sm:$0xff] }
 0x1df   :  { %v7639_v19 = vadd.f32 %v1122_v9, %v1121_v13  ;;  %v1636_v9 = vld [vmem:[#allocation8 + $0x28] sm:$0xff] }
 0x1e0   :  { %v7692_v13 = vpack.c.bf16 %v1636_v9, %v1632_v6 }
 0x1e1   :  { %6909 = vtanh.f32 %v7639_v19 }
 0x1eb   :  { %v6910_v24 = vpop.eup %6909 }
 0x1ec   :  { %v7642_v31 = vmul.f32 %v6910_v24, %v6908_v25  ;;  %v1631_v25 = vld [vmem:[#allocation8] sm:$0xff] }
 0x1ed   :  { %v1635_v24 = vld [vmem:[#allocation8 + $0x20] sm:$0xff] }
 0x1ee   :  { %1266 = vmatmul.mubr.f32.vlgmr.msra.gmra.mrb[2].mxu0 %v7642_v31  ;;  %1337 = vmatmul.mubr.f32.vlgmr.msra.gmra.mrb[2].mxu1 %v7642_v31 }
 0x1ef   :  { %5745 = vmatpush1.bf16.msra.mxu0 %v7436_v30  ;;  %5777 = vmatpush1.bf16.msra.mxu1 %v7439_v33 }
 0x1f0   :  { %5747 = vmatprep.subr.bf16.mxu0 %v7445_v37  ;;  %5779 = vmatprep.subr.bf16.mxu1 %v7447_v40 }
 0x1f1   :  { %1512 = vmatprep.mubr.f32.mxu0 %v7251_v17  ;;  %1583 = vmatprep.mubr.f32.mxu1 %v7251_v17 }
 0x1f3   :  { %5749 = vmatpush1.bf16.msra.mxu0 %v7453_v44  ;;  %5781 = vmatpush1.bf16.msra.mxu1 %v7456_v47 }
 0x1f4   :  { %5751 = vmatprep.subr.bf16.mxu0 %v7462_v51  ;;  %5783 = vmatprep.subr.bf16.mxu1 %v7465_v54 }
 0x1f7   :  { %5753 = vmatpush1.bf16.msra.mxu0 %v7471_v58  ;;  %5785 = vmatpush1.bf16.msra.mxu1 %v7474_v61 }
 0x1f8   :  { %5755 = vmatprep.subr.bf16.mxu0 %v7480_v1  ;;  %5787 = vmatprep.subr.bf16.mxu1 %v7483_v4 }
 0x1fb   :  { %5757 = vmatpush1.bf16.msra.mxu0 %v7489_v8  ;;  %5789 = vmatpush1.bf16.msra.mxu1 %v7492_v11 }
 0x1fc   :  { %5759 = vmatprep.subr.bf16.mxu0 %v7498_v15  ;;  %5791 = vmatprep.subr.bf16.mxu1 %v7501_v18 }
 0x1ff   :  { %5761 = vmatpush1.bf16.msra.mxu0 %v7507_v23  ;;  %5793 = vmatpush1.bf16.msra.mxu1 %v7510_v27 }
 0x200   :  { %5763 = vmatprep.subr.bf16.mxu0 %v7516_v32  ;;  %5795 = vmatprep.subr.bf16.mxu1 %v7519_v36 }
 0x203   :  { %5765 = vmatpush1.bf16.msra.mxu0 %v7525_v42  ;;  %5797 = vmatpush1.bf16.msra.mxu1 %v7528_v46 }
 0x204   :  { %5767 = vmatprep.subr.bf16.mxu0 %v7534_v52  ;;  %5799 = vmatprep.subr.bf16.mxu1 %v7537_v56 }
 0x207   :  { %5769 = vmatpush1.bf16.msra.mxu0 %v7543_v62  ;;  %5801 = vmatpush1.bf16.msra.mxu1 %v7546_v2 }
 0x208   :  { %5771 = vmatprep.subr.bf16.mxu0 %v7552_v7  ;;  %5803 = vmatprep.subr.bf16.mxu1 %v7555_v12 }
 0x20b   :  { %5773 = vmatpush1.bf16.msra.mxu0 %v7561_v14  ;;  %5805 = vmatpush1.bf16.msra.mxu1 %v7564_v16 }
 0x20c   :  { %5807 = vmatprep.subr.bf16.mxu0 %v7692_v13 }
 0x2c1   :  { %v1267_v30 = vpop.f32.mrb[2].mxu0  ;;  %v1338_v33 = vpop.f32.mrb[2].mxu1 }
 0x2c2   :  { %v6728_v37 = vadd.f32 %v1267_v30, %v7619_v28  ;;  %v1269_v40 = vpop.f32.mrb[3].mxu0  ;;  %v1340_v44 = vpop.f32.mrb[3].mxu1  ;;  %v6744_v34 = vadd.f32 %v1338_v33, %v7636_v50  ;;  %v7696_v33 = vpack.c.bf16 %v1635_v24, %v1631_v25 }
 0x2c3   :  { %v6729_v47 = vadd.f32 %v1269_v40, %v7623_v21  ;;  %v6745_v58 = vadd.f32 %v1340_v44, %v7630_v45  ;;  %v1637_v40 = vld [vmem:[#allocation8 + $0x30] sm:$0xff] }
 0x2c4   :  { %v5260_v51 = vmul.f32 -1.442695, %v6728_v37  ;;  %v1633_v37 = vld [vmem:[#allocation8 + $0x10] sm:$0xff] }
 0x2c5   :  { %v5261_v54 = vmul.f32 -1.442695, %v6729_v47  ;;  %v5262_v61 = vmul.f32 -1.442695, %v6745_v58  ;;  %v7699_v44 = vpack.c.bf16 %v1637_v40, %v1633_v37  ;;  %v1640_v47 = vld [vmem:[#allocation8 + $0x48] sm:$0xff] }
 0x2c6   :  { %6911 = vpow2.f32 %v5260_v51  ;;  %v1644_v51 = vld [vmem:[#allocation8 + $0x68] sm:$0xff] }
 0x2c7   :  { %6913 = vpow2.f32 %v5261_v54  ;;  %v1642_v54 = vld [vmem:[#allocation8 + $0x58] sm:$0xff]  ;;  %v7704_v58 = vpack.c.bf16 %v1644_v51, %v1640_v47 }
 0x2c8   :  { %6915 = vpow2.f32 %v5262_v61  ;;  %v1646_v61 = vld [vmem:[#allocation8 + $0x78] sm:$0xff] }
 0x2c9   :  { %6917 = vtanh.f32 %v6744_v34  ;;  %v1639_v34 = vld [vmem:[#allocation8 + $0x40] sm:$0xff] }
 0x2d0   :  { %v6912_v35 = vpop.eup %6911 }
 0x2d1   :  { %v6914_v38 = vpop.eup %6913  ;;  %v1350_v39 = vadd.f32 1.0, %v6912_v35  ;;  %v1643_v35 = vld [vmem:[#allocation8 + $0x60] sm:$0xff] }
 0x2d2   :  { %v1356_v41 = vadd.f32 1.0, %v6914_v38  ;;  %v6916_v43 = vpop.eup %6915  ;;  %v7706_v38 = vpack.c.bf16 %v1646_v61, %v1642_v54  ;;  %v1907_v61 = vld [vmem:[#allocation8 + $0xe8] sm:$0xff] }
 0x2d3   :  { %6919 = vrcp.f32 %v1350_v39  ;;  %v6918_v49 = vpop.eup %6917  ;;  %v1363_v59 = vadd.f32 1.0, %v6916_v43  ;;  %v7708_v39 = vpack.c.bf16 %v1643_v35, %v1639_v34  ;;  %v1645_v43 = vld [vmem:[#allocation8 + $0x70] sm:$0xff]  ;;  %v1905_v34 = vld [vmem:[#allocation8 + $0xd8] sm:$0xff] }
 0x2d4   :  { %6921 = vrcp.f32 %v1356_v41  ;;  %v1641_v41 = vld [vmem:[#allocation8 + $0x50] sm:$0xff] }
 0x2d5   :  { %6923 = vrcp.f32 %v1363_v59 }
 0x2dd   :  { %v6920_v53 = vpop.eup %6919 }
 0x2de   :  { %v6922_v55 = vpop.eup %6921  ;;  %v1368_v57 = vmul.f32 %v6920_v53, %v6918_v49  ;;  %v7711_v49 = vpack.c.bf16 %v1645_v43, %v1641_v41  ;;  %v1648_v53 = vld [vmem:[#allocation8 + $0x88] sm:$0xff]  ;;  %v1909_v41 = vld [vmem:[#allocation8 + $0xf8] sm:$0xff]  ;;  %v1902_v43 = vld [vmem:[#allocation8 + $0xc0] sm:$0xff] }
 0x2df   :  { %v1367_v60 = vmul.f32 %v6922_v55, %v7639_v19  ;;  %v6924_v0 = vpop.eup %6923  ;;  %v1638_v19 = vld [vmem:[#allocation8 + $0x38] sm:$0xff]  ;;  %v1652_v55 = vld [vmem:[#allocation8 + $0xa8] sm:$0xff] }
 0x2e0   :  { %v7694_v30 = vpack.c.bf16 %v1638_v19, %v1634_v10  ;;  %v7716_v59 = vpack.c.bf16 %v1652_v55, %v1648_v53  ;;  %v1649_v10 = vld [vmem:[#allocation8 + $0x90] sm:$0xff]  ;;  %v1906_v53 = vld [vmem:[#allocation8 + $0xe0] sm:$0xff]  ;;  %v7776_v55 = vpack.c.bf16 %v1909_v41, %v1905_v34 }
 0x2e1   :  { %v7683_v63 = vadd.f32 %v1368_v57, %v1367_v60  ;;  %v1650_v57 = vld [vmem:[#allocation8 + $0x98] sm:$0xff]  ;;  %v1653_v19 = vld [vmem:[#allocation8 + $0xb0] sm:$0xff] }
 0x2e2   :  { %5839 = vmatprep.subr.bf16.mxu1 %v7694_v30  ;;  %v1654_v60 = vld [vmem:[#allocation8 + $0xb8] sm:$0xff]  ;;  %v7723_v25 = vpack.c.bf16 %v1653_v19, %v1649_v10  ;;  %v1911_v10 = vld [vmem:[#allocation8 + $0x108] sm:$0xff] }
 0x2e3   :  { %6925 = vtanh.f32 %v7683_v63  ;;  %v7718_v6 = vpack.c.bf16 %v1654_v60, %v1650_v57  ;;  %v7778_v57 = vpack.c.bf16 %v1906_v53, %v1902_v43  ;;  %v1904_v60 = vld [vmem:[#allocation8 + $0xd0] sm:$0xff]  ;;  %v1915_v19 = vld [vmem:[#allocation8 + $0x128] sm:$0xff]  ;;  %v1926_v43 = vld [vmem:[#allocation8 + $0x180] sm:$0xff] }
 0x2e4   :  { %v1930_v53 = vld [vmem:[#allocation8 + $0x1a0] sm:$0xff] }
 0x2ed   :  { %v6926_v3 = vpop.eup %6925 }
 0x2ee   :  { %v7686_v5 = vmul.f32 %v6926_v3, %v6924_v0  ;;  %v1647_v0 = vld [vmem:[#allocation8 + $0x80] sm:$0xff] }
 0x2ef   :  { %v1651_v3 = vld [vmem:[#allocation8 + $0xa0] sm:$0xff] }
 0x2f0   :  { %1513 = vmatmul.mubr.f32.vlgmr.msra.gmra.mrb[4].mxu0 %v7686_v5  ;;  %1584 = vmatmul.mubr.f32.vlgmr.msra.gmra.mrb[4].mxu1 %v7686_v5  ;;  %v7720_v9 = vpack.c.bf16 %v1651_v3, %v1647_v0  ;;  %v1908_v0 = vld [vmem:[#allocation8 + $0xf0] sm:$0xff] }
 0x2f1   :  { %1759 = vmatprep.mubr.f32.mxu0 %v7251_v17  ;;  %1830 = vmatprep.mubr.f32.mxu1 %v7251_v17  ;;  %v7781_v3 = vpack.c.bf16 %v1908_v0, %v1904_v60  ;;  %v1928_v60 = vld [vmem:[#allocation8 + $0x190] sm:$0xff]  ;;  %v7813_v0 = vpack.c.bf16 %v1930_v53, %v1926_v43 }
 0x2f2   :  { %5809 = vmatpush1.bf16.msra.mxu0 %v7696_v33  ;;  %5841 = vmatpush1.bf16.msra.mxu1 %v7699_v44 }
 0x2f3   :  { %5811 = vmatprep.subr.bf16.mxu0 %v7704_v58  ;;  %5843 = vmatprep.subr.bf16.mxu1 %v7706_v38 }
 0x2f6   :  { %5813 = vmatpush1.bf16.msra.mxu0 %v7708_v39  ;;  %5845 = vmatpush1.bf16.msra.mxu1 %v7711_v49 }
 0x2f7   :  { %5815 = vmatprep.subr.bf16.mxu0 %v7716_v59  ;;  %5847 = vmatprep.subr.bf16.mxu1 %v7718_v6 }
 0x2fa   :  { %5817 = vmatpush1.bf16.msra.mxu0 %v7720_v9  ;;  %5849 = vmatpush1.bf16.msra.mxu1 %v7723_v25 }
 0x2fb   :  { %5819 = vmatprep.subr.bf16.mxu0 %v7480_v1  ;;  %5851 = vmatprep.subr.bf16.mxu1 %v7483_v4 }
 0x2fe   :  { %5821 = vmatpush1.bf16.msra.mxu0 %v7489_v8  ;;  %5853 = vmatpush1.bf16.msra.mxu1 %v7492_v11 }
 0x2ff   :  { %5823 = vmatprep.subr.bf16.mxu0 %v7498_v15  ;;  %5855 = vmatprep.subr.bf16.mxu1 %v7501_v18 }
 0x302   :  { %5825 = vmatpush1.bf16.msra.mxu0 %v7507_v23  ;;  %5857 = vmatpush1.bf16.msra.mxu1 %v7510_v27 }
 0x303   :  { %5827 = vmatprep.subr.bf16.mxu0 %v7516_v32  ;;  %5859 = vmatprep.subr.bf16.mxu1 %v7519_v36 }
 0x306   :  { %5829 = vmatpush1.bf16.msra.mxu0 %v7525_v42  ;;  %5861 = vmatpush1.bf16.msra.mxu1 %v7528_v46 }
 0x307   :  { %5831 = vmatprep.subr.bf16.mxu0 %v7534_v52  ;;  %5863 = vmatprep.subr.bf16.mxu1 %v7537_v56 }
 0x30a   :  { %5833 = vmatpush1.bf16.msra.mxu0 %v7543_v62  ;;  %5865 = vmatpush1.bf16.msra.mxu1 %v7546_v2 }
 0x30b   :  { %5835 = vmatprep.subr.bf16.mxu0 %v7552_v7  ;;  %5867 = vmatprep.subr.bf16.mxu1 %v7555_v12 }
 0x30e   :  { %5837 = vmatpush1.bf16.msra.mxu0 %v7561_v14  ;;  %5869 = vmatpush1.bf16.msra.mxu1 %v7564_v16 }
 0x30f   :  { %5871 = vmatprep.subr.bf16.mxu0 %v7692_v13  ;;  %5903 = vmatprep.subr.bf16.mxu1 %v7694_v30 }
 0x3c3   :  { %v1514_v1 = vpop.f32.mrb[4].mxu0  ;;  %v1585_v4 = vpop.f32.mrb[4].mxu1 }
 0x3c4   :  { %v6730_v8 = vadd.f32 %v1514_v1, %v7619_v28  ;;  %v1516_v11 = vpop.f32.mrb[5].mxu0  ;;  %v1587_v15 = vpop.f32.mrb[5].mxu1  ;;  %v6746_v42 = vadd.f32 %v1585_v4, %v7636_v50  ;;  %v1913_v1 = vld [vmem:[#allocation8 + $0x118] sm:$0xff]  ;;  %v7786_v4 = vpack.c.bf16 %v1915_v19, %v1911_v10  ;;  %v1932_v10 = vld [vmem:[#allocation8 + $0x1b0] sm:$0xff]  ;;  %v1935_v19 = vld [vmem:[#allocation8 + $0x1c8] sm:$0xff] }
 0x3c5   :  { %v6731_v18 = vadd.f32 %v1516_v11, %v7623_v21  ;;  %v6747_v32 = vadd.f32 %v1587_v15, %v7630_v45  ;;  %v1910_v11 = vld [vmem:[#allocation8 + $0x100] sm:$0xff] }
 0x3c6   :  { %v5263_v23 = vmul.f32 -1.442695, %v6730_v8  ;;  %v1917_v8 = vld [vmem:[#allocation8 + $0x138] sm:$0xff]  ;;  %v1914_v15 = vld [vmem:[#allocation8 + $0x120] sm:$0xff] }
 0x3c7   :  { %v5264_v27 = vmul.f32 -1.442695, %v6731_v18  ;;  %v5265_v36 = vmul.f32 -1.442695, %v6747_v32  ;;  %v7788_v18 = vpack.c.bf16 %v1917_v8, %v1913_v1  ;;  %v1916_v32 = vld [vmem:[#allocation8 + $0x130] sm:$0xff]  ;;  %v1939_v1 = vld [vmem:[#allocation8 + $0x1e8] sm:$0xff]  ;;  %v7817_v8 = vpack.c.bf16 %v1932_v10, %v1928_v60 }
 0x3c8   :  { %6927 = vpow2.f32 %v5263_v23  ;;  %v7790_v23 = vpack.c.bf16 %v1914_v15, %v1910_v11  ;;  %v7819_v11 = vpack.c.bf16 %v1939_v1, %v1935_v19  ;;  %v1937_v15 = vld [vmem:[#allocation8 + $0x1d8] sm:$0xff] }
 0x3c9   :  { %6929 = vpow2.f32 %v5264_v27  ;;  %v1912_v27 = vld [vmem:[#allocation8 + $0x110] sm:$0xff] }
 0x3ca   :  { %6931 = vpow2.f32 %v5265_v36  ;;  %v7793_v36 = vpack.c.bf16 %v1916_v32, %v1912_v27  ;;  %v1941_v27 = vld [vmem:[#allocation8 + $0x1f8] sm:$0xff]  ;;  %v1934_v32 = vld [vmem:[#allocation8 + $0x1c0] sm:$0xff] }
 0x3cb   :  { %6933 = vtanh.f32 %v6746_v42  ;;  %v1919_v42 = vld [vmem:[#allocation8 + $0x148] sm:$0xff] }
 0x3d2   :  { %v6928_v46 = vpop.eup %6927 }
 0x3d3   :  { %v6930_v52 = vpop.eup %6929  ;;  %v1597_v56 = vadd.f32 1.0, %v6928_v46  ;;  %v1923_v46 = vld [vmem:[#allocation8 + $0x168] sm:$0xff] }
 0x3d4   :  { %v1603_v62 = vadd.f32 1.0, %v6930_v52  ;;  %v6932_v2 = vpop.eup %6931  ;;  %v1921_v52 = vld [vmem:[#allocation8 + $0x158] sm:$0xff] }
 0x3d5   :  { %6935 = vrcp.f32 %v1597_v56  ;;  %v6934_v7 = vpop.eup %6933  ;;  %v1610_v24 = vadd.f32 1.0, %v6932_v2  ;;  %v7797_v56 = vpack.c.bf16 %v1923_v46, %v1919_v42  ;;  %v1918_v2 = vld [vmem:[#allocation8 + $0x140] sm:$0xff]  ;;  %v7822_v42 = vpack.c.bf16 %v1941_v27, %v1937_v15 }
 0x3d6   :  { %6937 = vrcp.f32 %v1603_v62  ;;  %v1925_v62 = vld [vmem:[#allocation8 + $0x178] sm:$0xff]  ;;  %v1938_v46 = vld [vmem:[#allocation8 + $0x1e0] sm:$0xff] }
 0x3d7   :  { %6939 = vrcp.f32 %v1610_v24  ;;  %v1924_v24 = vld [vmem:[#allocation8 + $0x170] sm:$0xff] }
 0x3df   :  { %v6936_v12 = vpop.eup %6935 }
 0x3e0   :  { %v6938_v14 = vpop.eup %6937  ;;  %v1615_v16 = vmul.f32 %v6936_v12, %v6934_v7  ;;  %v1922_v7 = vld [vmem:[#allocation8 + $0x160] sm:$0xff]  ;;  %v7800_v12 = vpack.c.bf16 %v1925_v62, %v1921_v52  ;;  %v1936_v52 = vld [vmem:[#allocation8 + $0x1d0] sm:$0xff] }
 0x3e1   :  { %v1614_v37 = vmul.f32 %v6938_v14, %v7683_v63  ;;  %v6940_v47 = vpop.eup %6939  ;;  %v1903_v63 = vld [vmem:[#allocation8 + $0xc8] sm:$0xff]  ;;  %v7802_v14 = vpack.c.bf16 %v1922_v7, %v1918_v2  ;;  %v1940_v62 = vld [vmem:[#allocation8 + $0x1f0] sm:$0xff]  ;;  %v7825_v2 = vpack.c.bf16 %v1938_v46, %v1934_v32 }
 0x3e2   :  { %v7774_v35 = vpack.c.bf16 %v1907_v61, %v1903_v63  ;;  %v1929_v63 = vld [vmem:[#allocation8 + $0x198] sm:$0xff]  ;;  %v7829_v7 = vpack.c.bf16 %v1940_v62, %v1936_v52 }
 0x3e3   :  { %v7755_v40 = vadd.f32 %v1615_v16, %v1614_v37  ;;  %v1920_v16 = vld [vmem:[#allocation8 + $0x150] sm:$0xff]  ;;  %v1927_v37 = vld [vmem:[#allocation8 + $0x188] sm:$0xff]  ;;  %v1933_v61 = vld [vmem:[#allocation8 + $0x1b8] sm:$0xff] }
 0x3e4   :  { %v7810_v41 = vpack.c.bf16 %v1933_v61, %v1929_v63 }
 0x3e5   :  { %6941 = vtanh.f32 %v7755_v40 }
 0x3ef   :  { %v6942_v51 = vpop.eup %6941 }
 0x3f0   :  { %v7758_v54 = vmul.f32 %v6942_v51, %v6940_v47  ;;  %v7805_v47 = vpack.c.bf16 %v1924_v24, %v1920_v16  ;;  %v1931_v51 = vld [vmem:[#allocation8 + $0x1a8] sm:$0xff] }
 0x3f1   :  { %v7808_v34 = vpack.c.bf16 %v1931_v51, %v1927_v37 }
 0x3f2   :  { %1760 = vmatmul.mubr.f32.vlgmr.msra.gmra.mrb[6].mxu0 %v7758_v54  ;;  %1831 = vmatmul.mubr.f32.vlgmr.msra.gmra.mrb[6].mxu1 %v7758_v54 }
 0x3f3   :  { %5873 = vmatpush1.bf16.msra.mxu0 %v7696_v33  ;;  %5905 = vmatpush1.bf16.msra.mxu1 %v7699_v44 }
 0x3f4   :  { %5875 = vmatprep.subr.bf16.mxu0 %v7704_v58  ;;  %5907 = vmatprep.subr.bf16.mxu1 %v7706_v38 }
 0x3f5   :  { %2006 = vmatprep.mubr.f32.mxu0 %v7251_v17  ;;  %2077 = vmatprep.mubr.f32.mxu1 %v7251_v17 }
 0x3f7   :  { %5877 = vmatpush1.bf16.msra.mxu0 %v7708_v39  ;;  %5909 = vmatpush1.bf16.msra.mxu1 %v7711_v49 }
 0x3f8   :  { %5879 = vmatprep.subr.bf16.mxu0 %v7716_v59  ;;  %5911 = vmatprep.subr.bf16.mxu1 %v7718_v6 }
 0x3fb   :  { %5881 = vmatpush1.bf16.msra.mxu0 %v7720_v9  ;;  %5913 = vmatpush1.bf16.msra.mxu1 %v7723_v25 }
 0x3fc   :  { %5883 = vmatprep.subr.bf16.mxu0 %v7774_v35  ;;  %5915 = vmatprep.subr.bf16.mxu1 %v7776_v55 }
 0x3ff   :  { %5885 = vmatpush1.bf16.msra.mxu0 %v7778_v57  ;;  %5917 = vmatpush1.bf16.msra.mxu1 %v7781_v3 }
 0x400   :  { %5887 = vmatprep.subr.bf16.mxu0 %v7786_v4  ;;  %5919 = vmatprep.subr.bf16.mxu1 %v7788_v18 }
 0x403   :  { %5889 = vmatpush1.bf16.msra.mxu0 %v7790_v23  ;;  %5921 = vmatpush1.bf16.msra.mxu1 %v7793_v36 }
 0x404   :  { %5891 = vmatprep.subr.bf16.mxu0 %v7797_v56  ;;  %5923 = vmatprep.subr.bf16.mxu1 %v7800_v12 }
 0x407   :  { %5893 = vmatpush1.bf16.msra.mxu0 %v7802_v14  ;;  %5925 = vmatpush1.bf16.msra.mxu1 %v7805_v47 }
 0x408   :  { %5895 = vmatprep.subr.bf16.mxu0 %v7808_v34  ;;  %5927 = vmatprep.subr.bf16.mxu1 %v7810_v41 }
 0x40b   :  { %5897 = vmatpush1.bf16.msra.mxu0 %v7813_v0  ;;  %5929 = vmatpush1.bf16.msra.mxu1 %v7817_v8 }
 0x40c   :  { %5899 = vmatprep.subr.bf16.mxu0 %v7819_v11  ;;  %5931 = vmatprep.subr.bf16.mxu1 %v7822_v42 }
 0x40f   :  { %5901 = vmatpush1.bf16.msra.mxu0 %v7825_v2  ;;  %5933 = vmatpush1.bf16.msra.mxu1 %v7829_v7 }
 0x410   :  { %5935 = vmatprep.subr.bf16.mxu0 %v7692_v13  ;;  %5967 = vmatprep.subr.bf16.mxu1 %v7694_v30 }
 0x4c5   :  { %v1761_v16 = vpop.f32.mrb[6].mxu0  ;;  %v1832_v24 = vpop.f32.mrb[6].mxu1 }
 0x4c6   :  { %v6732_v37 = vadd.f32 %v1761_v16, %v7619_v28  ;;  %v1763_v51 = vpop.f32.mrb[7].mxu0  ;;  %v1834_v63 = vpop.f32.mrb[7].mxu1  ;;  %v6748_v19 = vadd.f32 %v1832_v24, %v7636_v50 }
 0x4c7   :  { %v6733_v61 = vadd.f32 %v1763_v51, %v7623_v21  ;;  %v6749_v60 = vadd.f32 %v1834_v63, %v7630_v45 }
 0x4c8   :  { %v5266_v43 = vmul.f32 -1.442695, %v6732_v37 }
 0x4c9   :  { %v5267_v53 = vmul.f32 -1.442695, %v6733_v61  ;;  %v5268_v10 = vmul.f32 -1.442695, %v6749_v60 }
 0x4ca   :  { %6943 = vpow2.f32 %v5266_v43 }
 0x4cb   :  { %6945 = vpow2.f32 %v5267_v53 }
 0x4cc   :  { %6947 = vpow2.f32 %v5268_v10 }
 0x4cd   :  { %6949 = vtanh.f32 %v6748_v19 }
 0x4d4   :  { %v6944_v1 = vpop.eup %6943 }
 0x4d5   :  { %v6946_v15 = vpop.eup %6945  ;;  %v1844_v27 = vadd.f32 1.0, %v6944_v1 }
 0x4d6   :  { %v1850_v32 = vadd.f32 1.0, %v6946_v15  ;;  %v6948_v46 = vpop.eup %6947 }
 0x4d7   :  { %6951 = vrcp.f32 %v1844_v27  ;;  %v6950_v52 = vpop.eup %6949  ;;  %v1857_v51 = vadd.f32 1.0, %v6948_v46 }
 0x4d8   :  { %6953 = vrcp.f32 %v1850_v32 }
 0x4d9   :  { %6955 = vrcp.f32 %v1857_v51 }
 0x4e1   :  { %v6952_v62 = vpop.eup %6951 }
 0x4e2   :  { %v6954_v16 = vpop.eup %6953  ;;  %v1862_v37 = vmul.f32 %v6952_v62, %v6950_v52 }
 0x4e3   :  { %v1861_v61 = vmul.f32 %v6954_v16, %v7755_v40  ;;  %v6956_v24 = vpop.eup %6955 }
 0x4e5   :  { %v7841_v63 = vadd.f32 %v1862_v37, %v1861_v61 }
 0x4e7   :  { %6957 = vtanh.f32 %v7841_v63 }
 0x4f1   :  { %v6958_v43 = vpop.eup %6957 }
 0x4f2   :  { %v7844_v53 = vmul.f32 %v6958_v43, %v6956_v24 }
 0x4f4   :  { %2007 = vmatmul.mubr.f32.vlgmr.msra.gmra.mrb[8].mxu0 %v7844_v53  ;;  %2078 = vmatmul.mubr.f32.vlgmr.msra.gmra.mrb[8].mxu1 %v7844_v53 }
 0x4f5   :  { %5937 = vmatpush1.bf16.msra.mxu0 %v7696_v33  ;;  %5969 = vmatpush1.bf16.msra.mxu1 %v7699_v44 }
 0x4f6   :  { %5939 = vmatprep.subr.bf16.mxu0 %v7704_v58  ;;  %5971 = vmatprep.subr.bf16.mxu1 %v7706_v38 }
 0x4f7   :  { %2253 = vmatprep.mubr.f32.mxu0 %v7251_v17  ;;  %2324 = vmatprep.mubr.f32.mxu1 %v7251_v17 }
 0x4f9   :  { %5941 = vmatpush1.bf16.msra.mxu0 %v7708_v39  ;;  %5973 = vmatpush1.bf16.msra.mxu1 %v7711_v49 }
 0x4fa   :  { %5943 = vmatprep.subr.bf16.mxu0 %v7716_v59  ;;  %5975 = vmatprep.subr.bf16.mxu1 %v7718_v6 }
 0x4fd   :  { %5945 = vmatpush1.bf16.msra.mxu0 %v7720_v9  ;;  %5977 = vmatpush1.bf16.msra.mxu1 %v7723_v25 }
 0x4fe   :  { %5947 = vmatprep.subr.bf16.mxu0 %v7774_v35  ;;  %5979 = vmatprep.subr.bf16.mxu1 %v7776_v55 }
 0x501   :  { %5949 = vmatpush1.bf16.msra.mxu0 %v7778_v57  ;;  %5981 = vmatpush1.bf16.msra.mxu1 %v7781_v3 }
 0x502   :  { %5951 = vmatprep.subr.bf16.mxu0 %v7786_v4  ;;  %5983 = vmatprep.subr.bf16.mxu1 %v7788_v18 }
 0x505   :  { %5953 = vmatpush1.bf16.msra.mxu0 %v7790_v23  ;;  %5985 = vmatpush1.bf16.msra.mxu1 %v7793_v36 }
 0x506   :  { %5955 = vmatprep.subr.bf16.mxu0 %v7797_v56  ;;  %5987 = vmatprep.subr.bf16.mxu1 %v7800_v12 }
 0x509   :  { %5957 = vmatpush1.bf16.msra.mxu0 %v7802_v14  ;;  %5989 = vmatpush1.bf16.msra.mxu1 %v7805_v47 }
 0x50a   :  { %5959 = vmatprep.subr.bf16.mxu0 %v7808_v34  ;;  %5991 = vmatprep.subr.bf16.mxu1 %v7810_v41 }
 0x50d   :  { %5961 = vmatpush1.bf16.msra.mxu0 %v7813_v0  ;;  %5993 = vmatpush1.bf16.msra.mxu1 %v7817_v8 }
 0x50e   :  { %5963 = vmatprep.subr.bf16.mxu0 %v7819_v11  ;;  %5995 = vmatprep.subr.bf16.mxu1 %v7822_v42 }
 0x511   :  { %5965 = vmatpush1.bf16.msra.mxu0 %v7825_v2  ;;  %5997 = vmatpush1.bf16.msra.mxu1 %v7829_v7 }
 0x512   :  { %5999 = vmatprep.subr.bf16.mxu0 %v7692_v13  ;;  %6031 = vmatprep.subr.bf16.mxu1 %v7694_v30 }
 0x5c7   :  { %v2008_v40 = vpop.f32.mrb[8].mxu0  ;;  %v2079_v60 = vpop.f32.mrb[8].mxu1 }
 0x5c8   :  { %v6734_v10 = vadd.f32 %v2008_v40, %v7619_v28  ;;  %v2010_v19 = vpop.f32.mrb[9].mxu0  ;;  %v2081_v1 = vpop.f32.mrb[9].mxu1  ;;  %v6750_v62 = vadd.f32 %v2079_v60, %v7636_v50 }
 0x5c9   :  { %v6735_v15 = vadd.f32 %v2010_v19, %v7623_v21  ;;  %v6751_v46 = vadd.f32 %v2081_v1, %v7630_v45 }
 0x5ca   :  { %v5269_v27 = vmul.f32 -1.442695, %v6734_v10 }
 0x5cb   :  { %v5270_v32 = vmul.f32 -1.442695, %v6735_v15  ;;  %v5271_v52 = vmul.f32 -1.442695, %v6751_v46 }
 0x5cc   :  { %6959 = vpow2.f32 %v5269_v27 }
 0x5cd   :  { %6961 = vpow2.f32 %v5270_v32 }
 0x5ce   :  { %6963 = vpow2.f32 %v5271_v52 }
 0x5cf   :  { %6965 = vtanh.f32 %v6750_v62 }
 0x5d6   :  { %v6960_v13 = vpop.eup %6959 }
 0x5d7   :  { %v6962_v16 = vpop.eup %6961  ;;  %v2091_v30 = vadd.f32 1.0, %v6960_v13 }
 0x5d8   :  { %v2097_v37 = vadd.f32 1.0, %v6962_v16  ;;  %v6964_v51 = vpop.eup %6963 }
 0x5d9   :  { %6967 = vrcp.f32 %v2091_v30  ;;  %v6966_v61 = vpop.eup %6965  ;;  %v2104_v10 = vadd.f32 1.0, %v6964_v51 }
 0x5da   :  { %6969 = vrcp.f32 %v2097_v37 }
 0x5db   :  { %6971 = vrcp.f32 %v2104_v10 }
 0x5e3   :  { %v6968_v24 = vpop.eup %6967 }
 0x5e4   :  { %v6970_v43 = vpop.eup %6969  ;;  %v2109_v40 = vmul.f32 %v6968_v24, %v6966_v61 }
 0x5e5   :  { %v2108_v19 = vmul.f32 %v6970_v43, %v7841_v63  ;;  %v6972_v60 = vpop.eup %6971 }
 0x5e7   :  { %v7887_v1 = vadd.f32 %v2109_v40, %v2108_v19 }
 0x5e9   :  { %6973 = vtanh.f32 %v7887_v1 }
 0x5f3   :  { %v6974_v15 = vpop.eup %6973 }
 0x5f4   :  { %v7890_v27 = vmul.f32 %v6974_v15, %v6972_v60  ;;  %v2620_v60 = vld [vmem:[#allocation8 + $0x8] sm:$0xff] }
 0x5f5   :  { %v2624_v15 = vld [vmem:[#allocation8 + $0x28] sm:$0xff] }
 0x5f6   :  { %2254 = vmatmul.mubr.f32.vlgmr.msra.gmra.mrb[10].mxu0 %v7890_v27  ;;  %2325 = vmatmul.mubr.f32.vlgmr.msra.gmra.mrb[10].mxu1 %v7890_v27 }
 0x5f7   :  { %6001 = vmatpush1.bf16.msra.mxu0 %v7696_v33  ;;  %6033 = vmatpush1.bf16.msra.mxu1 %v7699_v44 }
 0x5f8   :  { %6003 = vmatprep.subr.bf16.mxu0 %v7704_v58  ;;  %6035 = vmatprep.subr.bf16.mxu1 %v7706_v38 }
 0x5f9   :  { %2500 = vmatprep.mubr.f32.mxu0 %v7251_v17  ;;  %2571 = vmatprep.mubr.f32.mxu1 %v7251_v17 }
 0x5fb   :  { %6005 = vmatpush1.bf16.msra.mxu0 %v7708_v39  ;;  %6037 = vmatpush1.bf16.msra.mxu1 %v7711_v49 }
 0x5fc   :  { %6007 = vmatprep.subr.bf16.mxu0 %v7716_v59  ;;  %6039 = vmatprep.subr.bf16.mxu1 %v7718_v6 }
 0x5ff   :  { %6009 = vmatpush1.bf16.msra.mxu0 %v7720_v9  ;;  %6041 = vmatpush1.bf16.msra.mxu1 %v7723_v25 }
 0x600   :  { %6011 = vmatprep.subr.bf16.mxu0 %v7774_v35  ;;  %6043 = vmatprep.subr.bf16.mxu1 %v7776_v55 }
 0x603   :  { %6013 = vmatpush1.bf16.msra.mxu0 %v7778_v57  ;;  %6045 = vmatpush1.bf16.msra.mxu1 %v7781_v3 }
 0x604   :  { %6015 = vmatprep.subr.bf16.mxu0 %v7786_v4  ;;  %6047 = vmatprep.subr.bf16.mxu1 %v7788_v18 }
 0x607   :  { %6017 = vmatpush1.bf16.msra.mxu0 %v7790_v23  ;;  %6049 = vmatpush1.bf16.msra.mxu1 %v7793_v36 }
 0x608   :  { %6019 = vmatprep.subr.bf16.mxu0 %v7797_v56  ;;  %6051 = vmatprep.subr.bf16.mxu1 %v7800_v12 }
 0x60b   :  { %6021 = vmatpush1.bf16.msra.mxu0 %v7802_v14  ;;  %6053 = vmatpush1.bf16.msra.mxu1 %v7805_v47 }
 0x60c   :  { %6023 = vmatprep.subr.bf16.mxu0 %v7808_v34  ;;  %6055 = vmatprep.subr.bf16.mxu1 %v7810_v41 }
 0x60f   :  { %6025 = vmatpush1.bf16.msra.mxu0 %v7813_v0  ;;  %6057 = vmatpush1.bf16.msra.mxu1 %v7817_v8 }
 0x610   :  { %6027 = vmatprep.subr.bf16.mxu0 %v7819_v11  ;;  %6059 = vmatprep.subr.bf16.mxu1 %v7822_v42 }
 0x613   :  { %6029 = vmatpush1.bf16.msra.mxu0 %v7825_v2  ;;  %6061 = vmatpush1.bf16.msra.mxu1 %v7829_v7 }
 0x6c9   :  { %v2255_v33 = vpop.f32.mrb[10].mxu0  ;;  %v2326_v44 = vpop.f32.mrb[10].mxu1 }
 0x6ca   :  { %v6736_v58 = vadd.f32 %v2255_v33, %v7619_v28  ;;  %v2257_v38 = vpop.f32.mrb[11].mxu0  ;;  %v2328_v39 = vpop.f32.mrb[11].mxu1  ;;  %v6752_v63 = vadd.f32 %v2326_v44, %v7636_v50  ;;  %v6062_v33 = vpack.c.bf16 %v2624_v15, %v2620_v60  ;;  %v2626_v44 = vld [vmem:[#allocation8 + $0x38] sm:$0xff] }
 0x6cb   :  { %v6737_v49 = vadd.f32 %v2257_v38, %v7623_v21  ;;  %v6753_v9 = vadd.f32 %v2328_v39, %v7630_v45  ;;  %v2623_v38 = vld [vmem:[#allocation8 + $0x20] sm:$0xff]  ;;  %v2642_v15 = vld [vmem:[#allocation8 + $0xb8] sm:$0xff] }
 0x6cc   :  { %v5272_v59 = vmul.f32 -1.442695, %v6736_v58  ;;  %v2619_v58 = vld [vmem:[#allocation8] sm:$0xff]  ;;  %6063 = vmatprep.subr.bf16.mxu0 %v6062_v33 }
 0x6cd   :  { %v5273_v6 = vmul.f32 -1.442695, %v6737_v49  ;;  %v5274_v25 = vmul.f32 -1.442695, %v6753_v9  ;;  %v6064_v49 = vpack.c.bf16 %v2623_v38, %v2619_v58  ;;  %v2639_v33 = vld [vmem:[#allocation8 + $0xa0] sm:$0xff]  ;;  %v2637_v38 = vld [vmem:[#allocation8 + $0x90] sm:$0xff] }
 0x6ce   :  { %6975 = vpow2.f32 %v5272_v59  ;;  %v2621_v59 = vld [vmem:[#allocation8 + $0x10] sm:$0xff] }
 0x6cf   :  { %6977 = vpow2.f32 %v5273_v6  ;;  %v2625_v6 = vld [vmem:[#allocation8 + $0x30] sm:$0xff] }
 0x6d0   :  { %6979 = vpow2.f32 %v5274_v25  ;;  %v6096_v9 = vpack.c.bf16 %v2625_v6, %v2621_v59  ;;  %v2628_v25 = vld [vmem:[#allocation8 + $0x48] sm:$0xff] }
 0x6d1   :  { %6981 = vtanh.f32 %v6752_v63  ;;  %v2632_v63 = vld [vmem:[#allocation8 + $0x68] sm:$0xff] }
 0x6d8   :  { %v6976_v32 = vpop.eup %6975 }
 0x6d9   :  { %v6978_v46 = vpop.eup %6977  ;;  %v2338_v52 = vadd.f32 1.0, %v6976_v32  ;;  %v2630_v32 = vld [vmem:[#allocation8 + $0x58] sm:$0xff] }
 0x6da   :  { %v2344_v62 = vadd.f32 1.0, %v6978_v46  ;;  %v6980_v13 = vpop.eup %6979  ;;  %v6066_v46 = vpack.c.bf16 %v2632_v63, %v2628_v25 }
 0x6db   :  { %6983 = vrcp.f32 %v2338_v52  ;;  %v6982_v16 = vpop.eup %6981  ;;  %v2351_v61 = vadd.f32 1.0, %v6980_v13  ;;  %v2634_v52 = vld [vmem:[#allocation8 + $0x78] sm:$0xff]  ;;  %v2631_v13 = vld [vmem:[#allocation8 + $0x60] sm:$0xff] }
 0x6dc   :  { %6985 = vrcp.f32 %v2344_v62  ;;  %v2627_v62 = vld [vmem:[#allocation8 + $0x40] sm:$0xff] }
 0x6dd   :  { %6987 = vrcp.f32 %v2351_v61 }
 0x6e5   :  { %v6984_v30 = vpop.eup %6983 }
 0x6e6   :  { %v6986_v37 = vpop.eup %6985  ;;  %v2356_v51 = vmul.f32 %v6984_v30, %v6982_v16  ;;  %v6098_v16 = vpack.c.bf16 %v2634_v52, %v2630_v32  ;;  %v6068_v30 = vpack.c.bf16 %v2631_v13, %v2627_v62  ;;  %v2866_v13 = vld [vmem:[#allocation10] sm:$0xff] }
 0x6e7   :  { %v2355_v24 = vmul.f32 %v6986_v37, %v7887_v1  ;;  %v6988_v40 = vpop.eup %6987  ;;  %v2622_v1 = vld [vmem:[#allocation8 + $0x18] sm:$0xff]  ;;  %v2629_v37 = vld [vmem:[#allocation8 + $0x50] sm:$0xff] }
 0x6e8   :  { %v6094_v39 = vpack.c.bf16 %v2626_v44, %v2622_v1  ;;  %v2635_v1 = vld [vmem:[#allocation8 + $0x80] sm:$0xff] }
 0x6e9   :  { %v7931_v43 = vadd.f32 %v2356_v51, %v2355_v24  ;;  %v2633_v51 = vld [vmem:[#allocation8 + $0x70] sm:$0xff]  ;;  %v2636_v24 = vld [vmem:[#allocation8 + $0x88] sm:$0xff]  ;;  %v6072_v58 = vpack.c.bf16 %v2639_v33, %v2635_v1  ;;  %v2874_v33 = vld [vmem:[#allocation10 + $0x40] sm:$0xff] }
 0x6ea   :  { %6095 = vmatprep.subr.bf16.mxu1 %v6094_v39  ;;  %v6100_v61 = vpack.c.bf16 %v2633_v51, %v2629_v37  ;;  %v2641_v39 = vld [vmem:[#allocation8 + $0xb0] sm:$0xff]  ;;  %v2875_v51 = vld [vmem:[#allocation10 + $0x48] sm:$0xff] }
 0x6eb   :  { %6989 = vtanh.f32 %v7931_v43  ;;  %v2872_v37 = vld [vmem:[#allocation10 + $0x30] sm:$0xff] }
 0x6f5   :  { %v6990_v10 = vpop.eup %6989 }
 0x6f6   :  { %v7934_v19 = vmul.f32 %v6990_v10, %v6988_v40  ;;  %v2640_v40 = vld [vmem:[#allocation8 + $0xa8] sm:$0xff]  ;;  %v2638_v10 = vld [vmem:[#allocation8 + $0x98] sm:$0xff] }
 0x6f7   :  { %v6070_v60 = vpack.c.bf16 %v2640_v40, %v2636_v24  ;;  %v6102_v44 = vpack.c.bf16 %v2642_v15, %v2638_v10  ;;  %v2877_v24 = vld [vmem:[#allocation10 + $0x58] sm:$0xff] }
 0x6f8   :  { %2501 = vmatmul.mubr.f32.vlgmr.msra.gmra.mrb[12].mxu0 %v7934_v19  ;;  %2572 = vmatmul.mubr.f32.vlgmr.msra.gmra.mrb[12].mxu1 %v7934_v19  ;;  %v2881_v40 = vld [vmem:[#allocation10 + $0x78] sm:$0xff] }
 0x6f9   :  { %2747 = vmatprep.mubr.f32.mxu0 %v7251_v17  ;;  %2818 = vmatprep.mubr.f32.mxu1 %v7251_v17 }
 0x6fa   :  { %6065 = vmatpush1.bf16.msra.mxu0 %v6064_v49  ;;  %6097 = vmatpush1.bf16.msra.mxu1 %v6096_v9  ;;  %v6104_v49 = vpack.c.bf16 %v2641_v39, %v2637_v38  ;;  %v6162_v38 = vpack.c.bf16 %v2881_v40, %v2877_v24  ;;  %v2876_v39 = vld [vmem:[#allocation10 + $0x50] sm:$0xff] }
 0x6fb   :  { %6067 = vmatprep.subr.bf16.mxu0 %v6066_v46  ;;  %6099 = vmatprep.subr.bf16.mxu1 %v6098_v16  ;;  %v2870_v16 = vld [vmem:[#allocation10 + $0x20] sm:$0xff]  ;;  %v2900_v24 = vld [vmem:[#allocation10 + $0x110] sm:$0xff] }
 0x6fc   :  { %v6128_v15 = vpack.c.bf16 %v2870_v16, %v2866_v13  ;;  %v2904_v40 = vld [vmem:[#allocation10 + $0x130] sm:$0xff] }
 0x6fe   :  { %6069 = vmatpush1.bf16.msra.mxu0 %v6068_v30  ;;  %6101 = vmatpush1.bf16.msra.mxu1 %v6100_v61  ;;  %v2868_v30 = vld [vmem:[#allocation10 + $0x10] sm:$0xff]  ;;  %v2879_v61 = vld [vmem:[#allocation10 + $0x68] sm:$0xff] }
 0x6ff   :  { %6071 = vmatprep.subr.bf16.mxu0 %v6070_v60  ;;  %6103 = vmatprep.subr.bf16.mxu1 %v6102_v44  ;;  %v6160_v1 = vpack.c.bf16 %v2872_v37, %v2868_v30  ;;  %v2878_v44 = vld [vmem:[#allocation10 + $0x60] sm:$0xff] }
 0x700   :  { %v2898_v30 = vld [vmem:[#allocation10 + $0x100] sm:$0xff] }
 0x701   :  { %v2902_v37 = vld [vmem:[#allocation10 + $0x120] sm:$0xff] }
 0x702   :  { %6073 = vmatpush1.bf16.msra.mxu0 %v6072_v58  ;;  %6105 = vmatpush1.bf16.msra.mxu1 %v6104_v49  ;;  %v6130_v58 = vpack.c.bf16 %v2879_v61, %v2875_v51  ;;  %v2880_v49 = vld [vmem:[#allocation10 + $0x70] sm:$0xff] }
 0x703   :  { %6075 = vmatprep.subr.bf16.mxu0 %v7774_v35  ;;  %6107 = vmatprep.subr.bf16.mxu1 %v7776_v55  ;;  %v2867_v35 = vld [vmem:[#allocation10 + $0x8] sm:$0xff] }
 0x704   :  { %v2871_v55 = vld [vmem:[#allocation10 + $0x28] sm:$0xff] }
 0x706   :  { %6077 = vmatpush1.bf16.msra.mxu0 %v7778_v57  ;;  %6109 = vmatpush1.bf16.msra.mxu1 %v7781_v3  ;;  %v2869_v57 = vld [vmem:[#allocation10 + $0x18] sm:$0xff] }
 0x707   :  { %6079 = vmatprep.subr.bf16.mxu0 %v7786_v4  ;;  %6111 = vmatprep.subr.bf16.mxu1 %v7788_v18  ;;  %v2873_v3 = vld [vmem:[#allocation10 + $0x38] sm:$0xff]  ;;  %v6126_v4 = vpack.c.bf16 %v2871_v55, %v2867_v35  ;;  %v2883_v35 = vld [vmem:[#allocation10 + $0x88] sm:$0xff] }
 0x708   :  { %v6158_v18 = vpack.c.bf16 %v2873_v3, %v2869_v57  ;;  %v2887_v55 = vld [vmem:[#allocation10 + $0xa8] sm:$0xff]  ;;  %v2885_v57 = vld [vmem:[#allocation10 + $0x98] sm:$0xff] }
 0x709   :  { %v2889_v3 = vld [vmem:[#allocation10 + $0xb8] sm:$0xff] }
 0x70a   :  { %6081 = vmatpush1.bf16.msra.mxu0 %v7790_v23  ;;  %6113 = vmatpush1.bf16.msra.mxu1 %v7793_v36 }
 0x70b   :  { %6083 = vmatprep.subr.bf16.mxu0 %v7797_v56  ;;  %6115 = vmatprep.subr.bf16.mxu1 %v7800_v12 }
 0x70e   :  { %6085 = vmatpush1.bf16.msra.mxu0 %v7802_v14  ;;  %6117 = vmatpush1.bf16.msra.mxu1 %v7805_v47 }
 0x70f   :  { %6087 = vmatprep.subr.bf16.mxu0 %v7808_v34  ;;  %6119 = vmatprep.subr.bf16.mxu1 %v7810_v41 }
 0x712   :  { %6089 = vmatpush1.bf16.msra.mxu0 %v7813_v0  ;;  %6121 = vmatpush1.bf16.msra.mxu1 %v7817_v8 }
 0x713   :  { %6091 = vmatprep.subr.bf16.mxu0 %v7819_v11  ;;  %6123 = vmatprep.subr.bf16.mxu1 %v7822_v42 }
 0x716   :  { %6093 = vmatpush1.bf16.msra.mxu0 %v7825_v2  ;;  %6125 = vmatpush1.bf16.msra.mxu1 %v7829_v7 }
 0x717   :  { %6127 = vmatprep.subr.bf16.mxu0 %v6126_v4  ;;  %6159 = vmatprep.subr.bf16.mxu1 %v6158_v18  ;;  %v6132_v4 = vpack.c.bf16 %v2878_v44, %v2874_v33  ;;  %v6164_v18 = vpack.c.bf16 %v2880_v49, %v2876_v39  ;;  %v6144_v33 = vpack.c.bf16 %v2902_v37, %v2898_v30  ;;  %v3219_v37 = vld [vmem:[#allocation11 + $0x10] sm:$0xff] }
 0x718   :  { %v6176_v44 = vpack.c.bf16 %v2904_v40, %v2900_v24  ;;  %v3230_v24 = vld [vmem:[#allocation11 + $0x68] sm:$0xff]  ;;  %v3228_v40 = vld [vmem:[#allocation11 + $0x58] sm:$0xff] }
 0x7cb   :  { %v2502_v23 = vpop.f32.mrb[12].mxu0  ;;  %v2573_v36 = vpop.f32.mrb[12].mxu1 }
 0x7cc   :  { %v6738_v56 = vadd.f32 %v2502_v23, %v7619_v28  ;;  %v2504_v12 = vpop.f32.mrb[13].mxu0  ;;  %v2575_v14 = vpop.f32.mrb[13].mxu1  ;;  %v6754_v11 = vadd.f32 %v2573_v36, %v7636_v50  ;;  %v2882_v23 = vld [vmem:[#allocation10 + $0x80] sm:$0xff] }
 0x7cd   :  { %v6739_v47 = vadd.f32 %v2504_v12, %v7623_v21  ;;  %v6755_v0 = vadd.f32 %v2575_v14, %v7630_v45  ;;  %v2886_v36 = vld [vmem:[#allocation10 + $0xa0] sm:$0xff]  ;;  %v6166_v12 = vpack.c.bf16 %v2889_v3, %v2885_v57  ;;  %v2884_v14 = vld [vmem:[#allocation10 + $0x90] sm:$0xff]  ;;  %v2915_v57 = vld [vmem:[#allocation10 + $0x188] sm:$0xff] }
 0x7ce   :  { %v5275_v34 = vmul.f32 -1.442695, %v6738_v56  ;;  %v6134_v56 = vpack.c.bf16 %v2887_v55, %v2883_v35  ;;  %v2908_v35 = vld [vmem:[#allocation10 + $0x150] sm:$0xff]  ;;  %v2919_v3 = vld [vmem:[#allocation10 + $0x1a8] sm:$0xff] }
 0x7cf   :  { %v5276_v41 = vmul.f32 -1.442695, %v6739_v47  ;;  %v5277_v8 = vmul.f32 -1.442695, %v6755_v0  ;;  %v2888_v47 = vld [vmem:[#allocation10 + $0xb0] sm:$0xff]  ;;  %v2893_v0 = vld [vmem:[#allocation10 + $0xd8] sm:$0xff] }
 0x7d0   :  { %6991 = vpow2.f32 %v5275_v34  ;;  %v2891_v34 = vld [vmem:[#allocation10 + $0xc8] sm:$0xff]  ;;  %v2912_v55 = vld [vmem:[#allocation10 + $0x170] sm:$0xff] }
 0x7d1   :  { %6993 = vpow2.f32 %v5276_v41  ;;  %v2895_v41 = vld [vmem:[#allocation10 + $0xe8] sm:$0xff] }
 0x7d2   :  { %6995 = vpow2.f32 %v5277_v8  ;;  %v2897_v8 = vld [vmem:[#allocation10 + $0xf8] sm:$0xff] }
 0x7d3   :  { %6997 = vtanh.f32 %v6754_v11  ;;  %v6136_v11 = vpack.c.bf16 %v2886_v36, %v2882_v23  ;;  %v6180_v36 = vpack.c.bf16 %v2912_v55, %v2908_v35  ;;  %v3238_v35 = vld [vmem:[#allocation11 + $0xa8] sm:$0xff]  ;;  %v3236_v55 = vld [vmem:[#allocation11 + $0x98] sm:$0xff] }
 0x7da   :  { %v6992_v42 = vpop.eup %6991 }
 0x7db   :  { %v6994_v2 = vpop.eup %6993  ;;  %v2585_v7 = vadd.f32 1.0, %v6992_v42  ;;  %v6168_v42 = vpack.c.bf16 %v2888_v47, %v2884_v14  ;;  %v6150_v14 = vpack.c.bf16 %v2919_v3, %v2915_v57  ;;  %v3240_v3 = vld [vmem:[#allocation11 + $0xb8] sm:$0xff] }
 0x7dc   :  { %v2591_v59 = vadd.f32 1.0, %v6994_v2  ;;  %v6996_v6 = vpop.eup %6995  ;;  %v2890_v2 = vld [vmem:[#allocation10 + $0xc0] sm:$0xff] }
 0x7dd   :  { %6999 = vrcp.f32 %v2585_v7  ;;  %v6998_v9 = vpop.eup %6997  ;;  %v2598_v46 = vadd.f32 1.0, %v6996_v6  ;;  %v2894_v7 = vld [vmem:[#allocation10 + $0xe0] sm:$0xff]  ;;  %v6170_v6 = vpack.c.bf16 %v2897_v8, %v2893_v0  ;;  %v2923_v0 = vld [vmem:[#allocation10 + $0x1c8] sm:$0xff] }
 0x7de   :  { %7001 = vrcp.f32 %v2591_v59  ;;  %v6138_v59 = vpack.c.bf16 %v2895_v41, %v2891_v34  ;;  %v6140_v13 = vpack.c.bf16 %v2894_v7, %v2890_v2  ;;  %v2916_v34 = vld [vmem:[#allocation10 + $0x190] sm:$0xff]  ;;  %v2927_v8 = vld [vmem:[#allocation10 + $0x1e8] sm:$0xff] }
 0x7df   :  { %7003 = vrcp.f32 %v2598_v46  ;;  %v2901_v46 = vld [vmem:[#allocation10 + $0x118] sm:$0xff]  ;;  %v2920_v41 = vld [vmem:[#allocation10 + $0x1b0] sm:$0xff] }
 0x7e0   :  { %v6184_v7 = vpack.c.bf16 %v2920_v41, %v2916_v34  ;;  %v3246_v34 = vld [vmem:[#allocation11 + $0xe8] sm:$0xff]  ;;  %v3244_v41 = vld [vmem:[#allocation11 + $0xd8] sm:$0xff] }
 0x7e7   :  { %v7000_v25 = vpop.eup %6999 }
 0x7e8   :  { %v7002_v63 = vpop.eup %7001  ;;  %v2603_v32 = vmul.f32 %v7000_v25, %v6998_v9  ;;  %v2892_v9 = vld [vmem:[#allocation10 + $0xd0] sm:$0xff] }
 0x7e9   :  { %v2602_v52 = vmul.f32 %v7002_v63, %v7931_v43  ;;  %v7004_v10 = vpop.eup %7003  ;;  %v2896_v25 = vld [vmem:[#allocation10 + $0xf0] sm:$0xff]  ;;  %v2899_v63 = vld [vmem:[#allocation10 + $0x108] sm:$0xff] }
 0x7ea   :  { %v6172_v16 = vpack.c.bf16 %v2896_v25, %v2892_v9  ;;  %v2926_v25 = vld [vmem:[#allocation10 + $0x1e0] sm:$0xff] }
 0x7eb   :  { %v7965_v62 = vadd.f32 %v2603_v32, %v2602_v52  ;;  %v2903_v32 = vld [vmem:[#allocation10 + $0x128] sm:$0xff]  ;;  %v2905_v52 = vld [vmem:[#allocation10 + $0x138] sm:$0xff] }
 0x7ec   :  { %v6142_v51 = vpack.c.bf16 %v2903_v32, %v2899_v63  ;;  %v6174_v61 = vpack.c.bf16 %v2905_v52, %v2901_v46  ;;  %v2924_v63 = vld [vmem:[#allocation10 + $0x1d0] sm:$0xff] }
 0x7ed   :  { %7005 = vtanh.f32 %v7965_v62  ;;  %v2928_v32 = vld [vmem:[#allocation10 + $0x1f0] sm:$0xff] }
 0x7ee   :  { %v6188_v52 = vpack.c.bf16 %v2928_v32, %v2924_v63  ;;  %v3254_v63 = vld [vmem:[#allocation11 + $0x128] sm:$0xff]  ;;  %v3252_v32 = vld [vmem:[#allocation11 + $0x118] sm:$0xff] }
 0x7f7   :  { %v7006_v60 = vpop.eup %7005 }
 0x7f8   :  { %v7968_v43 = vmul.f32 %v7006_v60, %v7004_v10  ;;  %v2907_v10 = vld [vmem:[#allocation10 + $0x148] sm:$0xff] }
 0x7f9   :  { %v2911_v60 = vld [vmem:[#allocation10 + $0x168] sm:$0xff] }
 0x7fa   :  { %2748 = vmatmul.mubr.f32.vlgmr.msra.gmra.mrb[14].mxu0 %v7968_v43  ;;  %2819 = vmatmul.mubr.f32.vlgmr.msra.gmra.mrb[14].mxu1 %v7968_v43  ;;  %v6146_v39 = vpack.c.bf16 %v2911_v60, %v2907_v10  ;;  %v3232_v60 = vld [vmem:[#allocation11 + $0x78] sm:$0xff] }
 0x7fb   :  { %6129 = vmatpush1.bf16.msra.mxu0 %v6128_v15  ;;  %6161 = vmatpush1.bf16.msra.mxu1 %v6160_v1  ;;  %v2909_v15 = vld [vmem:[#allocation10 + $0x158] sm:$0xff] }
 0x7fc   :  { %6131 = vmatprep.subr.bf16.mxu0 %v6130_v58  ;;  %6163 = vmatprep.subr.bf16.mxu1 %v6162_v38  ;;  %v2913_v1 = vld [vmem:[#allocation10 + $0x178] sm:$0xff]  ;;  %v2906_v58 = vld [vmem:[#allocation10 + $0x140] sm:$0xff] }
 0x7fd   :  { %3016 = vmatprep.mubr.f32.mxu0 %v7251_v17  ;;  %3129 = vmatprep.mubr.f32.mxu1 %v7251_v17  ;;  %v2910_v38 = vld [vmem:[#allocation10 + $0x160] sm:$0xff]  ;;  %v6178_v49 = vpack.c.bf16 %v2913_v1, %v2909_v15 }
 0x7fe   :  { %v6148_v23 = vpack.c.bf16 %v2910_v38, %v2906_v58  ;;  %v3225_v15 = vld [vmem:[#allocation11 + $0x40] sm:$0xff]  ;;  %v3227_v58 = vld [vmem:[#allocation11 + $0x50] sm:$0xff] }
 0x7ff   :  { %6133 = vmatpush1.bf16.msra.mxu0 %v6132_v4  ;;  %6165 = vmatpush1.bf16.msra.mxu1 %v6164_v18  ;;  %v2917_v4 = vld [vmem:[#allocation10 + $0x198] sm:$0xff]  ;;  %v3229_v1 = vld [vmem:[#allocation11 + $0x60] sm:$0xff]  ;;  %v3231_v38 = vld [vmem:[#allocation11 + $0x70] sm:$0xff] }
 0x800   :  { %6135 = vmatprep.subr.bf16.mxu0 %v6134_v56  ;;  %6167 = vmatprep.subr.bf16.mxu1 %v6166_v12  ;;  %v2921_v18 = vld [vmem:[#allocation10 + $0x1b8] sm:$0xff]  ;;  %v2914_v56 = vld [vmem:[#allocation10 + $0x180] sm:$0xff] }
 0x801   :  { %v2918_v12 = vld [vmem:[#allocation10 + $0x1a0] sm:$0xff]  ;;  %v6182_v47 = vpack.c.bf16 %v2921_v18, %v2917_v4 }
 0x802   :  { %v6152_v2 = vpack.c.bf16 %v2918_v12, %v2914_v56  ;;  %v3233_v4 = vld [vmem:[#allocation11 + $0x80] sm:$0xff]  ;;  %v3235_v56 = vld [vmem:[#allocation11 + $0x90] sm:$0xff] }
 0x803   :  { %6137 = vmatpush1.bf16.msra.mxu0 %v6136_v11  ;;  %6169 = vmatpush1.bf16.msra.mxu1 %v6168_v42  ;;  %v2925_v11 = vld [vmem:[#allocation10 + $0x1d8] sm:$0xff]  ;;  %v3237_v18 = vld [vmem:[#allocation11 + $0xa0] sm:$0xff]  ;;  %v3239_v12 = vld [vmem:[#allocation11 + $0xb0] sm:$0xff] }
 0x804   :  { %6139 = vmatprep.subr.bf16.mxu0 %v6138_v59  ;;  %6171 = vmatprep.subr.bf16.mxu1 %v6170_v6  ;;  %v2929_v42 = vld [vmem:[#allocation10 + $0x1f8] sm:$0xff]  ;;  %v2922_v59 = vld [vmem:[#allocation10 + $0x1c0] sm:$0xff]  ;;  %v6154_v6 = vpack.c.bf16 %v2927_v8, %v2923_v0 }
 0x805   :  { %v6186_v9 = vpack.c.bf16 %v2929_v42, %v2925_v11  ;;  %v6156_v46 = vpack.c.bf16 %v2926_v25, %v2922_v59  ;;  %v3248_v8 = vld [vmem:[#allocation11 + $0xf8] sm:$0xff]  ;;  %v3241_v11 = vld [vmem:[#allocation11 + $0xc0] sm:$0xff]  ;;  %v3243_v59 = vld [vmem:[#allocation11 + $0xd0] sm:$0xff] }
 0x806   :  { %v3245_v42 = vld [vmem:[#allocation11 + $0xe0] sm:$0xff] }
 0x807   :  { %6141 = vmatpush1.bf16.msra.mxu0 %v6140_v13  ;;  %6173 = vmatpush1.bf16.msra.mxu1 %v6172_v16  ;;  %v3217_v13 = vld [vmem:[#allocation11] sm:$0xff] }
 0x808   :  { %6143 = vmatprep.subr.bf16.mxu0 %v6142_v51  ;;  %6175 = vmatprep.subr.bf16.mxu1 %v6174_v61  ;;  %v3223_v51 = vld [vmem:[#allocation11 + $0x30] sm:$0xff]  ;;  %v3226_v61 = vld [vmem:[#allocation11 + $0x48] sm:$0xff] }
 0x809   :  { %v8014_v10 = vpack.c.bf16 %v3230_v24, %v3226_v61 }
 0x80b   :  { %6145 = vmatpush1.bf16.msra.mxu0 %v6144_v33  ;;  %6177 = vmatpush1.bf16.msra.mxu1 %v6176_v44  ;;  %v8016_v33 = vpack.c.bf16 %v3232_v60, %v3228_v40  ;;  %v8018_v44 = vpack.c.bf16 %v3229_v1, %v3225_v15  ;;  %v3260_v40 = vld [vmem:[#allocation11 + $0x158] sm:$0xff]  ;;  %v3257_v15 = vld [vmem:[#allocation11 + $0x140] sm:$0xff] }
 0x80c   :  { %6147 = vmatprep.subr.bf16.mxu0 %v6146_v39  ;;  %6179 = vmatprep.subr.bf16.mxu1 %v6178_v49  ;;  %v8021_v39 = vpack.c.bf16 %v3231_v38, %v3227_v58  ;;  %v3234_v49 = vld [vmem:[#allocation11 + $0x88] sm:$0xff]  ;;  %v3264_v60 = vld [vmem:[#allocation11 + $0x178] sm:$0xff]  ;;  %v3261_v58 = vld [vmem:[#allocation11 + $0x160] sm:$0xff] }
 0x80d   :  { %v8026_v57 = vpack.c.bf16 %v3238_v35, %v3234_v49  ;;  %v8062_v1 = vpack.c.bf16 %v3264_v60, %v3260_v40  ;;  %v3259_v38 = vld [vmem:[#allocation11 + $0x150] sm:$0xff]  ;;  %v8065_v35 = vpack.c.bf16 %v3261_v58, %v3257_v15 }
 0x80e   :  { %v3263_v49 = vld [vmem:[#allocation11 + $0x170] sm:$0xff] }
 0x80f   :  { %6149 = vmatpush1.bf16.msra.mxu0 %v6148_v23  ;;  %6181 = vmatpush1.bf16.msra.mxu1 %v6180_v36  ;;  %v8028_v23 = vpack.c.bf16 %v3240_v3, %v3236_v55  ;;  %v8030_v36 = vpack.c.bf16 %v3237_v18, %v3233_v4  ;;  %v3266_v55 = vld [vmem:[#allocation11 + $0x188] sm:$0xff]  ;;  %v3268_v4 = vld [vmem:[#allocation11 + $0x198] sm:$0xff]  ;;  %v8069_v18 = vpack.c.bf16 %v3263_v49, %v3259_v38 }
 0x810   :  { %6151 = vmatprep.subr.bf16.mxu0 %v6150_v14  ;;  %6183 = vmatprep.subr.bf16.mxu1 %v6182_v47  ;;  %v8033_v14 = vpack.c.bf16 %v3239_v12, %v3235_v56  ;;  %v3242_v47 = vld [vmem:[#allocation11 + $0xc8] sm:$0xff]  ;;  %v3272_v12 = vld [vmem:[#allocation11 + $0x1b8] sm:$0xff] }
 0x811   :  { %v8038_v0 = vpack.c.bf16 %v3246_v34, %v3242_v47  ;;  %v3270_v3 = vld [vmem:[#allocation11 + $0x1a8] sm:$0xff]  ;;  %v3265_v47 = vld [vmem:[#allocation11 + $0x180] sm:$0xff] }
 0x812   :  { %v8071_v56 = vpack.c.bf16 %v3270_v3, %v3266_v55  ;;  %v3269_v34 = vld [vmem:[#allocation11 + $0x1a0] sm:$0xff] }
 0x813   :  { %6153 = vmatpush1.bf16.msra.mxu0 %v6152_v2  ;;  %6185 = vmatpush1.bf16.msra.mxu1 %v6184_v7  ;;  %v8040_v2 = vpack.c.bf16 %v3248_v8, %v3244_v41  ;;  %v8042_v7 = vpack.c.bf16 %v3245_v42, %v3241_v11  ;;  %v8074_v41 = vpack.c.bf16 %v3272_v12, %v3268_v4  ;;  %v3267_v8 = vld [vmem:[#allocation11 + $0x190] sm:$0xff] }
 0x814   :  { %6155 = vmatprep.subr.bf16.mxu0 %v6154_v6  ;;  %6187 = vmatprep.subr.bf16.mxu1 %v6186_v9  ;;  %v3247_v6 = vld [vmem:[#allocation11 + $0xf0] sm:$0xff]  ;;  %v3250_v9 = vld [vmem:[#allocation11 + $0x108] sm:$0xff]  ;;  %v8077_v42 = vpack.c.bf16 %v3269_v34, %v3265_v47 }
 0x815   :  { %v8045_v25 = vpack.c.bf16 %v3247_v6, %v3243_v59  ;;  %v3271_v11 = vld [vmem:[#allocation11 + $0x1b0] sm:$0xff]  ;;  %v3274_v6 = vld [vmem:[#allocation11 + $0x1c8] sm:$0xff] }
 0x816   :  { %v8081_v59 = vpack.c.bf16 %v3271_v11, %v3267_v8 }
 0x817   :  { %6157 = vmatpush1.bf16.msra.mxu0 %v6156_v46  ;;  %6189 = vmatpush1.bf16.msra.mxu1 %v6188_v52  ;;  %v3256_v46 = vld [vmem:[#allocation11 + $0x138] sm:$0xff]  ;;  %v8049_v52 = vpack.c.bf16 %v3254_v63, %v3250_v9  ;;  %v3278_v9 = vld [vmem:[#allocation11 + $0x1e8] sm:$0xff] }
 0x818   :  { %v3276_v63 = vld [vmem:[#allocation11 + $0x1d8] sm:$0xff] }
 0x81a   :  { %3017 = vmatmul.mubr.f32.vlgmr.msra.gmra.mrb[16].mxu0 %v7642_v31  ;;  %3130 = vmatmul.mubr.f32.vlgmr.msra.gmra.mrb[16].mxu1 %v7642_v31  ;;  %v3218_v31 = vld [vmem:[#allocation11 + $0x8] sm:$0xff] }
 0x81b   :  { %3022 = vmatprep.mubr.f32.mxu0 %v7251_v17  ;;  %3135 = vmatprep.mubr.f32.mxu1 %v7251_v17 }
 0x81e   :  { %3023 = vmatmul.mubr.f32.gmra.mrb[18].mxu0 %v7686_v5  ;;  %3136 = vmatmul.mubr.f32.gmra.mrb[18].mxu1 %v7686_v5  ;;  %v3222_v5 = vld [vmem:[#allocation11 + $0x28] sm:$0xff] }
 0x81f   :  { %3028 = vmatprep.mubr.f32.mxu0 %v7251_v17  ;;  %3141 = vmatprep.mubr.f32.mxu1 %v7251_v17 }
 0x822   :  { %3029 = vmatmul.mubr.f32.gmra.mrb[20].mxu0 %v7758_v54  ;;  %3142 = vmatmul.mubr.f32.gmra.mrb[20].mxu1 %v7758_v54  ;;  %v3220_v54 = vld [vmem:[#allocation11 + $0x18] sm:$0xff] }
 0x823   :  { %3034 = vmatprep.mubr.f32.mxu0 %v7251_v17  ;;  %3147 = vmatprep.mubr.f32.mxu1 %v7251_v17 }
 0x826   :  { %3035 = vmatmul.mubr.f32.gmra.mrb[22].mxu0 %v7844_v53  ;;  %3148 = vmatmul.mubr.f32.gmra.mrb[22].mxu1 %v7844_v53  ;;  %v8002_v53 = vpack.c.bf16 %v3222_v5, %v3218_v31  ;;  %v8051_v31 = vpack.c.bf16 %v3256_v46, %v3252_v32  ;;  %v3249_v5 = vld [vmem:[#allocation11 + $0x100] sm:$0xff]  ;;  %v8086_v32 = vpack.c.bf16 %v3278_v9, %v3274_v6  ;;  %v3280_v46 = vld [vmem:[#allocation11 + $0x1f8] sm:$0xff] }
 0x827   :  { %3040 = vmatprep.mubr.f32.mxu0 %v7251_v17  ;;  %3153 = vmatprep.mubr.f32.mxu1 %v7251_v17 }
 0x828   :  { %6191 = vmatprep.subr.bf16.mxu0 %v8002_v53 }
 0x82a   :  { %3041 = vmatmul.mubr.f32.gmra.mrb[24].mxu0 %v7890_v27  ;;  %3154 = vmatmul.mubr.f32.gmra.mrb[24].mxu1 %v7890_v27  ;;  %v3224_v27 = vld [vmem:[#allocation11 + $0x38] sm:$0xff] }
 0x82b   :  { %3046 = vmatprep.mubr.f32.mxu0 %v7251_v17  ;;  %3159 = vmatprep.mubr.f32.mxu1 %v7251_v17  ;;  %v8004_v16 = vpack.c.bf16 %v3224_v27, %v3220_v54  ;;  %v3253_v54 = vld [vmem:[#allocation11 + $0x120] sm:$0xff]  ;;  %v3251_v27 = vld [vmem:[#allocation11 + $0x110] sm:$0xff] }
 0x82d   :  { %6223 = vmatprep.subr.bf16.mxu1 %v8004_v16 }
 0x82e   :  { %3047 = vmatmul.mubr.f32.gmra.mrb[26].mxu0 %v7934_v19  ;;  %3160 = vmatmul.mubr.f32.gmra.mrb[26].mxu1 %v7934_v19  ;;  %v3221_v19 = vld [vmem:[#allocation11 + $0x20] sm:$0xff] }
 0x82f   :  { %3052 = vmatprep.mubr.f32.mxu0 %v7251_v17  ;;  %3165 = vmatprep.mubr.f32.mxu1 %v7251_v17  ;;  %v8006_v30 = vpack.c.bf16 %v3221_v19, %v3217_v13  ;;  %v8054_v13 = vpack.c.bf16 %v3253_v54, %v3249_v5  ;;  %v3255_v19 = vld [vmem:[#allocation11 + $0x130] sm:$0xff]  ;;  %v3273_v5 = vld [vmem:[#allocation11 + $0x1c0] sm:$0xff] }
 0x830   :  { %v8058_v61 = vpack.c.bf16 %v3255_v19, %v3251_v27  ;;  %v3277_v54 = vld [vmem:[#allocation11 + $0x1e0] sm:$0xff]  ;;  %v8088_v27 = vpack.c.bf16 %v3280_v46, %v3276_v63 }
 0x831   :  { %6193 = vmatpush1.bf16.msra.mxu0 %v8006_v30  ;;  %v8090_v19 = vpack.c.bf16 %v3277_v54, %v3273_v5 }
 0x832   :  { %3053 = vmatmul.mubr.f32.gmra.mrb[28].mxu0 %v7968_v43  ;;  %3166 = vmatmul.mubr.f32.gmra.mrb[28].mxu1 %v7968_v43  ;;  %v8009_v43 = vpack.c.bf16 %v3223_v51, %v3219_v37  ;;  %v3258_v37 = vld [vmem:[#allocation11 + $0x148] sm:$0xff] }
 0x833   :  { %3058 = vmatprep.mubr.f32.mxu0 %v7251_v17  ;;  %3171 = vmatprep.mubr.f32.mxu1 %v7251_v17  ;;  %v3262_v51 = vld [vmem:[#allocation11 + $0x168] sm:$0xff] }
 0x834   :  { %6225 = vmatpush1.bf16.msra.mxu1 %v8009_v43  ;;  %6195 = vmatprep.subr.bf16.mxu0 %v8014_v10  ;;  %v8060_v24 = vpack.c.bf16 %v3262_v51, %v3258_v37  ;;  %v3275_v37 = vld [vmem:[#allocation11 + $0x1d0] sm:$0xff] }
 0x835   :  { %6227 = vmatprep.subr.bf16.mxu1 %v8016_v33  ;;  %6197 = vmatpush1.bf16.msra.mxu0 %v8018_v44  ;;  %v3279_v51 = vld [vmem:[#allocation11 + $0x1f0] sm:$0xff] }
 0x836   :  { %6199 = vmatprep.subr.bf16.mxu0 %v8026_v57  ;;  %v8093_v40 = vpack.c.bf16 %v3279_v51, %v3275_v37 }
 0x838   :  { %6229 = vmatpush1.bf16.msra.mxu1 %v8021_v39 }
 0x839   :  { %6231 = vmatprep.subr.bf16.mxu1 %v8028_v23  ;;  %6201 = vmatpush1.bf16.msra.mxu0 %v8030_v36 }
 0x83a   :  { %6203 = vmatprep.subr.bf16.mxu0 %v8038_v0 }
 0x83c   :  { %6233 = vmatpush1.bf16.msra.mxu1 %v8033_v14 }
 0x83d   :  { %6235 = vmatprep.subr.bf16.mxu1 %v8040_v2  ;;  %6205 = vmatpush1.bf16.msra.mxu0 %v8042_v7 }
 0x83e   :  { %6207 = vmatprep.subr.bf16.mxu0 %v8049_v52 }
 0x840   :  { %6237 = vmatpush1.bf16.msra.mxu1 %v8045_v25 }
 0x841   :  { %6239 = vmatprep.subr.bf16.mxu1 %v8051_v31  ;;  %6209 = vmatpush1.bf16.msra.mxu0 %v8054_v13 }
 0x842   :  { %6211 = vmatprep.subr.bf16.mxu0 %v8060_v24 }
 0x844   :  { %6241 = vmatpush1.bf16.msra.mxu1 %v8058_v61 }
 0x845   :  { %6243 = vmatprep.subr.bf16.mxu1 %v8062_v1  ;;  %6213 = vmatpush1.bf16.msra.mxu0 %v8065_v35 }
 0x846   :  { %6215 = vmatprep.subr.bf16.mxu0 %v8071_v56 }
 0x848   :  { %6245 = vmatpush1.bf16.msra.mxu1 %v8069_v18 }
 0x849   :  { %6247 = vmatprep.subr.bf16.mxu1 %v8074_v41  ;;  %6217 = vmatpush1.bf16.msra.mxu0 %v8077_v42 }
 0x84a   :  { %6219 = vmatprep.subr.bf16.mxu0 %v8086_v32 }
 0x84c   :  { %6249 = vmatpush1.bf16.msra.mxu1 %v8081_v59 }
 0x84d   :  { %6251 = vmatprep.subr.bf16.mxu1 %v8088_v27  ;;  %6221 = vmatpush1.bf16.msra.mxu0 %v8090_v19 }
 0x84e   :  { %6255 = vmatprep.subr.bf16.mxu0 %v8002_v53 }
 0x850   :  { %6253 = vmatpush1.bf16.msra.mxu1 %v8093_v40 }
 0x851   :  { %6287 = vmatprep.subr.bf16.mxu1 %v8004_v16 }
 0x8cd   :  { %v2749_v60 = vpop.f32.mrb[14].mxu0  ;;  %v2820_v15 = vpop.f32.mrb[14].mxu1 }
 0x8ce   :  { %v6740_v58 = vadd.f32 %v2749_v60, %v7619_v28  ;;  %v2751_v38 = vpop.f32.mrb[15].mxu0  ;;  %v2822_v49 = vpop.f32.mrb[15].mxu1  ;;  %v6756_v34 = vadd.f32 %v2820_v15, %v7636_v50 }
 0x8cf   :  { %v6741_v55 = vadd.f32 %v2751_v38, %v7623_v21  ;;  %v6757_v12 = vadd.f32 %v2822_v49, %v7630_v45 }
 0x8d0   :  { %v5278_v3 = vmul.f32 -1.442695, %v6740_v58 }
 0x8d1   :  { %v5279_v4 = vmul.f32 -1.442695, %v6741_v55  ;;  %v5280_v47 = vmul.f32 -1.442695, %v6757_v12 }
 0x8d2   :  { %7007 = vpow2.f32 %v5278_v3 }
 0x8d3   :  { %7009 = vpow2.f32 %v5279_v4 }
 0x8d4   :  { %7011 = vpow2.f32 %v5280_v47 }
 0x8d5   :  { %7013 = vtanh.f32 %v6756_v34 }
 0x8dc   :  { %v7008_v8 = vpop.eup %7007 }
 0x8dd   :  { %v7010_v11 = vpop.eup %7009  ;;  %v2832_v6 = vadd.f32 1.0, %v7008_v8 }
 0x8de   :  { %v2838_v9 = vadd.f32 1.0, %v7010_v11  ;;  %v7012_v28 = vpop.eup %7011 }
 0x8df   :  { %7015 = vrcp.f32 %v2832_v6  ;;  %v7014_v63 = vpop.eup %7013  ;;  %v2845_v54 = vadd.f32 1.0, %v7012_v28 }
 0x8e0   :  { %7017 = vrcp.f32 %v2838_v9 }
 0x8e1   :  { %7019 = vrcp.f32 %v2845_v54 }
 0x8e9   :  { %v7016_v21 = vpop.eup %7015 }
 0x8ea   :  { %v7018_v46 = vpop.eup %7017  ;;  %v2850_v5 = vmul.f32 %v7016_v21, %v7014_v63 }
 0x8eb   :  { %v2849_v37 = vmul.f32 %v7018_v46, %v7965_v62  ;;  %v7020_v50 = vpop.eup %7019  ;;  %v2930_v62 = vld [vmem:[%s8549_s6] sm:$0xf] }
 0x8ec   :  { %v8148_v15 = vrot.slane %v2930_v62, %v379_v22  ;;  %v8152_v58 = vrot.slane %v2930_v62, %v383_v26  ;;  %v8158_v8 = vrot.slane %v2930_v62, %v391_v29  ;;  %v8163_v26 = vrot.slane %v2930_v62, %v387_v48 }
 0x8ed   :  { %v2851_v45 = vadd.f32 %v2850_v5, %v2849_v37 }
 0x8ef   :  { %7021 = vtanh.f32 %v2851_v45 }
 0x8f9   :  { %v7022_v51 = vpop.eup %7021 }
 0x8fa   :  { %v2853_v60 = vmul.f32 %v7022_v51, %v7020_v50 }
 0x8fc   :  { %3059 = vmatmul.mubr.f32.gmra.mrb[30].mxu0 %v2853_v60  ;;  %3172 = vmatmul.mubr.f32.gmra.mrb[30].mxu1 %v2853_v60 }
 0x8fd   :  { %3345 = vmatprep.mubr.f32.mxu0 %v7251_v17  ;;  %3416 = vmatprep.mubr.f32.mxu1 %v7251_v17 }
 0x900   :  { %3346 = vmatmul.mubr.f32.vlgmr.msra.gmra.mrb[16].mxu0 %v7251_v17  ;;  %3417 = vmatmul.mubr.f32.vlgmr.msra.gmra.mrb[16].mxu1 %v7251_v17 }
 0x901   :  { %6257 = vmatpush1.bf16.msra.mxu0 %v8006_v30  ;;  %6289 = vmatpush1.bf16.msra.mxu1 %v8009_v43 }
 0x902   :  { %6259 = vmatprep.subr.bf16.mxu0 %v8014_v10  ;;  %6291 = vmatprep.subr.bf16.mxu1 %v8016_v33 }
 0x903   :  { %3587 = vmatprep.mubr.f32.mxu0 %v7251_v17  ;;  %3658 = vmatprep.mubr.f32.mxu1 %v7251_v17 }
 0x905   :  { %6261 = vmatpush1.bf16.msra.mxu0 %v8018_v44  ;;  %6293 = vmatpush1.bf16.msra.mxu1 %v8021_v39 }
 0x906   :  { %6263 = vmatprep.subr.bf16.mxu0 %v8026_v57  ;;  %6295 = vmatprep.subr.bf16.mxu1 %v8028_v23 }
 0x909   :  { %6265 = vmatpush1.bf16.msra.mxu0 %v8030_v36  ;;  %6297 = vmatpush1.bf16.msra.mxu1 %v8033_v14 }
 0x90a   :  { %6267 = vmatprep.subr.bf16.mxu0 %v8038_v0  ;;  %6299 = vmatprep.subr.bf16.mxu1 %v8040_v2 }
 0x90d   :  { %6269 = vmatpush1.bf16.msra.mxu0 %v8042_v7  ;;  %6301 = vmatpush1.bf16.msra.mxu1 %v8045_v25 }
 0x90e   :  { %6271 = vmatprep.subr.bf16.mxu0 %v8049_v52  ;;  %6303 = vmatprep.subr.bf16.mxu1 %v8051_v31 }
 0x911   :  { %6273 = vmatpush1.bf16.msra.mxu0 %v8054_v13  ;;  %6305 = vmatpush1.bf16.msra.mxu1 %v8058_v61 }
 0x912   :  { %6275 = vmatprep.subr.bf16.mxu0 %v8060_v24  ;;  %6307 = vmatprep.subr.bf16.mxu1 %v8062_v1 }
 0x915   :  { %6277 = vmatpush1.bf16.msra.mxu0 %v8065_v35  ;;  %6309 = vmatpush1.bf16.msra.mxu1 %v8069_v18 }
 0x916   :  { %6279 = vmatprep.subr.bf16.mxu0 %v8071_v56  ;;  %6311 = vmatprep.subr.bf16.mxu1 %v8074_v41 }
 0x919   :  { %6281 = vmatpush1.bf16.msra.mxu0 %v8077_v42  ;;  %6313 = vmatpush1.bf16.msra.mxu1 %v8081_v59 }
 0x91a   :  { %6283 = vmatprep.subr.bf16.mxu0 %v8086_v32  ;;  %6315 = vmatprep.subr.bf16.mxu1 %v8088_v27 }
 0x91d   :  { %6285 = vmatpush1.bf16.msra.mxu0 %v8090_v19  ;;  %6317 = vmatpush1.bf16.msra.mxu1 %v8093_v40 }
 0x91e   :  { %6319 = vmatprep.subr.bf16.mxu0 %v8002_v53  ;;  %6351 = vmatprep.subr.bf16.mxu1 %v8004_v16 }
 0x9d3   :  { %v3347_v38 = vpop.f32.mrb[16].mxu0  ;;  %v3418_v49 = vpop.f32.mrb[16].mxu1 }
 0x9d4   :  { %v6758_v55 = vadd.f32 %v3347_v38, %v8148_v15  ;;  %v3349_v3 = vpop.f32.mrb[17].mxu0  ;;  %v3420_v4 = vpop.f32.mrb[17].mxu1  ;;  %v6774_v6 = vadd.f32 %v3418_v49, %v8163_v26 }
 0x9d5   :  { %v6759_v12 = vadd.f32 %v3349_v3, %v8152_v58  ;;  %v6775_v22 = vadd.f32 %v3420_v4, %v8158_v8 }
 0x9d6   :  { %v5281_v47 = vmul.f32 -1.442695, %v6758_v55 }
 0x9d7   :  { %v5282_v34 = vmul.f32 -1.442695, %v6759_v12  ;;  %v5283_v11 = vmul.f32 -1.442695, %v6775_v22 }
 0x9d8   :  { %7023 = vpow2.f32 %v5281_v47 }
 0x9d9   :  { %7025 = vpow2.f32 %v5282_v34 }
 0x9da   :  { %7027 = vpow2.f32 %v5283_v11 }
 0x9db   :  { %7029 = vtanh.f32 %v6774_v6 }
 0x9e2   :  { %v7024_v9 = vpop.eup %7023 }
 0x9e3   :  { %v7026_v28 = vpop.eup %7025  ;;  %v3430_v63 = vadd.f32 1.0, %v7024_v9 }
 0x9e4   :  { %v3436_v21 = vadd.f32 1.0, %v7026_v28  ;;  %v7028_v29 = vpop.eup %7027 }
 0x9e5   :  { %7031 = vrcp.f32 %v3430_v63  ;;  %v7030_v46 = vpop.eup %7029  ;;  %v3443_v45 = vadd.f32 1.0, %v7028_v29 }
 0x9e6   :  { %7033 = vrcp.f32 %v3436_v21 }
 0x9e7   :  { %7035 = vrcp.f32 %v3443_v45 }
 0x9ef   :  { %v7032_v5 = vpop.eup %7031 }
 0x9f0   :  { %v7034_v54 = vpop.eup %7033  ;;  %v3448_v37 = vmul.f32 %v7032_v5, %v7030_v46 }
 0x9f1   :  { %v3447_v20 = vmul.f32 0.0, %v7034_v54  ;;  %v7036_v50 = vpop.eup %7035 }
 0x9f3   :  { %v8166_v48 = vadd.f32 %v3448_v37, %v3447_v20 }
 0x9f5   :  { %7037 = vtanh.f32 %v8166_v48 }
 0x9ff   :  { %v7038_v51 = vpop.eup %7037 }
 0xa00   :  { %v3451_v60 = vmul.f32 %v7038_v51, %v7036_v50  ;;  %v4185_v51 = vld [vmem:[#allocation11] sm:$0xff] }
 0xa02   :  { %3588 = vmatmul.mubr.f32.vlgmr.msra.gmra.mrb[18].mxu0 %v3451_v60  ;;  %3659 = vmatmul.mubr.f32.vlgmr.msra.gmra.mrb[18].mxu1 %v3451_v60  ;;  %v4189_v60 = vld [vmem:[#allocation11 + $0x20] sm:$0xff] }
 0xa03   :  { %6321 = vmatpush1.bf16.msra.mxu0 %v8006_v30  ;;  %6353 = vmatpush1.bf16.msra.mxu1 %v8009_v43 }
 0xa04   :  { %6323 = vmatprep.subr.bf16.mxu0 %v8014_v10  ;;  %6355 = vmatprep.subr.bf16.mxu1 %v8016_v33 }
 0xa05   :  { %3829 = vmatprep.mubr.f32.mxu0 %v7251_v17  ;;  %3900 = vmatprep.mubr.f32.mxu1 %v7251_v17 }
 0xa07   :  { %6325 = vmatpush1.bf16.msra.mxu0 %v8018_v44  ;;  %6357 = vmatpush1.bf16.msra.mxu1 %v8021_v39 }
 0xa08   :  { %6327 = vmatprep.subr.bf16.mxu0 %v8026_v57  ;;  %6359 = vmatprep.subr.bf16.mxu1 %v8028_v23 }
 0xa0b   :  { %6329 = vmatpush1.bf16.msra.mxu0 %v8030_v36  ;;  %6361 = vmatpush1.bf16.msra.mxu1 %v8033_v14 }
 0xa0c   :  { %6331 = vmatprep.subr.bf16.mxu0 %v8038_v0  ;;  %6363 = vmatprep.subr.bf16.mxu1 %v8040_v2 }
 0xa0f   :  { %6333 = vmatpush1.bf16.msra.mxu0 %v8042_v7  ;;  %6365 = vmatpush1.bf16.msra.mxu1 %v8045_v25 }
 0xa10   :  { %6335 = vmatprep.subr.bf16.mxu0 %v8049_v52  ;;  %6367 = vmatprep.subr.bf16.mxu1 %v8051_v31 }
 0xa13   :  { %6337 = vmatpush1.bf16.msra.mxu0 %v8054_v13  ;;  %6369 = vmatpush1.bf16.msra.mxu1 %v8058_v61 }
 0xa14   :  { %6339 = vmatprep.subr.bf16.mxu0 %v8060_v24  ;;  %6371 = vmatprep.subr.bf16.mxu1 %v8062_v1 }
 0xa17   :  { %6341 = vmatpush1.bf16.msra.mxu0 %v8065_v35  ;;  %6373 = vmatpush1.bf16.msra.mxu1 %v8069_v18 }
 0xa18   :  { %6343 = vmatprep.subr.bf16.mxu0 %v8071_v56  ;;  %6375 = vmatprep.subr.bf16.mxu1 %v8074_v41 }
 0xa1b   :  { %6345 = vmatpush1.bf16.msra.mxu0 %v8077_v42  ;;  %6377 = vmatpush1.bf16.msra.mxu1 %v8081_v59 }
 0xa1c   :  { %6347 = vmatprep.subr.bf16.mxu0 %v8086_v32  ;;  %6379 = vmatprep.subr.bf16.mxu1 %v8088_v27 }
 0xa1f   :  { %6349 = vmatpush1.bf16.msra.mxu0 %v8090_v19  ;;  %6381 = vmatpush1.bf16.msra.mxu1 %v8093_v40 }
 0xa20   :  { %6383 = vmatprep.subr.bf16.mxu0 %v8002_v53  ;;  %6415 = vmatprep.subr.bf16.mxu1 %v8004_v16 }
 0xad5   :  { %v3589_v62 = vpop.f32.mrb[18].mxu0  ;;  %v3660_v38 = vpop.f32.mrb[18].mxu1 }
 0xad6   :  { %v6760_v49 = vadd.f32 %v3589_v62, %v8148_v15  ;;  %v3591_v55 = vpop.f32.mrb[19].mxu0  ;;  %v3662_v3 = vpop.f32.mrb[19].mxu1  ;;  %v6776_v11 = vadd.f32 %v3660_v38, %v8163_v26  ;;  %v8257_v38 = vpack.c.bf16 %v4189_v60, %v4185_v51  ;;  %v4228_v51 = vld [vmem:[#allocation11 + $0x158] sm:$0xff] }
 0xad7   :  { %v6761_v4 = vadd.f32 %v3591_v55, %v8152_v58  ;;  %v6777_v34 = vadd.f32 %v3662_v3, %v8158_v8  ;;  %v4191_v55 = vld [vmem:[#allocation11 + $0x30] sm:$0xff] }
 0xad8   :  { %v5284_v12 = vmul.f32 -1.442695, %v6760_v49  ;;  %v4187_v49 = vld [vmem:[#allocation11 + $0x10] sm:$0xff] }
 0xad9   :  { %v5285_v47 = vmul.f32 -1.442695, %v6761_v4  ;;  %v5286_v22 = vmul.f32 -1.442695, %v6777_v34  ;;  %v8260_v3 = vpack.c.bf16 %v4191_v55, %v4187_v49  ;;  %v4194_v4 = vld [vmem:[#allocation11 + $0x48] sm:$0xff]  ;;  %v4232_v49 = vld [vmem:[#allocation11 + $0x178] sm:$0xff] }
 0xada   :  { %7039 = vpow2.f32 %v5284_v12  ;;  %v4198_v12 = vld [vmem:[#allocation11 + $0x68] sm:$0xff]  ;;  %v4225_v55 = vld [vmem:[#allocation11 + $0x140] sm:$0xff] }
 0xadb   :  { %7041 = vpow2.f32 %v5285_v47  ;;  %v4196_v47 = vld [vmem:[#allocation11 + $0x58] sm:$0xff]  ;;  %v8265_v34 = vpack.c.bf16 %v4198_v12, %v4194_v4  ;;  %v4229_v4 = vld [vmem:[#allocation11 + $0x160] sm:$0xff]  ;;  %v8315_v12 = vpack.c.bf16 %v4232_v49, %v4228_v51 }
 0xadc   :  { %7043 = vpow2.f32 %v5286_v22  ;;  %v4200_v22 = vld [vmem:[#allocation11 + $0x78] sm:$0xff] }
 0xadd   :  { %7045 = vtanh.f32 %v6776_v11  ;;  %v4193_v11 = vld [vmem:[#allocation11 + $0x40] sm:$0xff] }
 0xae4   :  { %v7040_v53 = vpop.eup %7039 }
 0xae5   :  { %v7042_v6 = vpop.eup %7041  ;;  %v3672_v16 = vadd.f32 1.0, %v7040_v53  ;;  %v4197_v53 = vld [vmem:[#allocation11 + $0x60] sm:$0xff] }
 0xae6   :  { %v3678_v9 = vadd.f32 1.0, %v7042_v6  ;;  %v7044_v28 = vpop.eup %7043  ;;  %v8267_v6 = vpack.c.bf16 %v4200_v22, %v4196_v47  ;;  %v8317_v47 = vpack.c.bf16 %v4229_v4, %v4225_v55  ;;  %v4227_v22 = vld [vmem:[#allocation11 + $0x150] sm:$0xff] }
 0xae7   :  { %7047 = vrcp.f32 %v3672_v16  ;;  %v7046_v63 = vpop.eup %7045  ;;  %v3685_v5 = vadd.f32 1.0, %v7044_v28  ;;  %v8269_v16 = vpack.c.bf16 %v4197_v53, %v4193_v11  ;;  %v4199_v28 = vld [vmem:[#allocation11 + $0x70] sm:$0xff]  ;;  %v4234_v53 = vld [vmem:[#allocation11 + $0x188] sm:$0xff] }
 0xae8   :  { %7049 = vrcp.f32 %v3678_v9  ;;  %v4195_v9 = vld [vmem:[#allocation11 + $0x50] sm:$0xff] }
 0xae9   :  { %7051 = vrcp.f32 %v3685_v5  ;;  %v4231_v11 = vld [vmem:[#allocation11 + $0x170] sm:$0xff] }
 0xaf1   :  { %v7048_v21 = vpop.eup %7047 }
 0xaf2   :  { %v7050_v29 = vpop.eup %7049  ;;  %v3690_v46 = vmul.f32 %v7048_v21, %v7046_v63  ;;  %v8272_v63 = vpack.c.bf16 %v4199_v28, %v4195_v9  ;;  %v4202_v21 = vld [vmem:[#allocation11 + $0x88] sm:$0xff]  ;;  %v8320_v9 = vpack.c.bf16 %v4231_v11, %v4227_v22 }
 0xaf3   :  { %v3689_v54 = vmul.f32 %v7050_v29, %v8166_v48  ;;  %v7052_v45 = vpop.eup %7051  ;;  %v4192_v48 = vld [vmem:[#allocation11 + $0x38] sm:$0xff]  ;;  %v4206_v29 = vld [vmem:[#allocation11 + $0xa8] sm:$0xff] }
 0xaf4   :  { %v8277_v5 = vpack.c.bf16 %v4206_v29, %v4202_v21  ;;  %v4238_v28 = vld [vmem:[#allocation11 + $0x1a8] sm:$0xff]  ;;  %v4236_v21 = vld [vmem:[#allocation11 + $0x198] sm:$0xff] }
 0xaf5   :  { %v8208_v37 = vadd.f32 %v3690_v46, %v3689_v54  ;;  %v4204_v46 = vld [vmem:[#allocation11 + $0x98] sm:$0xff] }
 0xaf6   :  { %v4208_v54 = vld [vmem:[#allocation11 + $0xb8] sm:$0xff] }
 0xaf7   :  { %7053 = vtanh.f32 %v8208_v37  ;;  %v4240_v29 = vld [vmem:[#allocation11 + $0x1b8] sm:$0xff] }
 0xb01   :  { %v7054_v20 = vpop.eup %7053 }
 0xb02   :  { %v3693_v50 = vmul.f32 %v7054_v20, %v7052_v45  ;;  %v4205_v45 = vld [vmem:[#allocation11 + $0xa0] sm:$0xff]  ;;  %v8279_v20 = vpack.c.bf16 %v4208_v54, %v4204_v46  ;;  %v8323_v46 = vpack.c.bf16 %v4238_v28, %v4234_v53  ;;  %v8325_v54 = vpack.c.bf16 %v4240_v29, %v4236_v21 }
 0xb04   :  { %3830 = vmatmul.mubr.f32.vlgmr.msra.gmra.mrb[20].mxu0 %v3693_v50  ;;  %3901 = vmatmul.mubr.f32.vlgmr.msra.gmra.mrb[20].mxu1 %v3693_v50 }
 0xb05   :  { %6385 = vmatpush1.bf16.msra.mxu0 %v8006_v30  ;;  %6417 = vmatpush1.bf16.msra.mxu1 %v8009_v43 }
 0xb06   :  { %6387 = vmatprep.subr.bf16.mxu0 %v8014_v10  ;;  %6419 = vmatprep.subr.bf16.mxu1 %v8016_v33 }
 0xb07   :  { %4071 = vmatprep.mubr.f32.mxu0 %v7251_v17  ;;  %4142 = vmatprep.mubr.f32.mxu1 %v7251_v17 }
 0xb09   :  { %6389 = vmatpush1.bf16.msra.mxu0 %v8018_v44  ;;  %6421 = vmatpush1.bf16.msra.mxu1 %v8021_v39 }
 0xb0a   :  { %6391 = vmatprep.subr.bf16.mxu0 %v8026_v57  ;;  %6423 = vmatprep.subr.bf16.mxu1 %v8028_v23 }
 0xb0d   :  { %6393 = vmatpush1.bf16.msra.mxu0 %v8030_v36  ;;  %6425 = vmatpush1.bf16.msra.mxu1 %v8033_v14 }
 0xb0e   :  { %6395 = vmatprep.subr.bf16.mxu0 %v8038_v0  ;;  %6427 = vmatprep.subr.bf16.mxu1 %v8040_v2 }
 0xb11   :  { %6397 = vmatpush1.bf16.msra.mxu0 %v8042_v7  ;;  %6429 = vmatpush1.bf16.msra.mxu1 %v8045_v25 }
 0xb12   :  { %6399 = vmatprep.subr.bf16.mxu0 %v8049_v52  ;;  %6431 = vmatprep.subr.bf16.mxu1 %v8051_v31 }
 0xb15   :  { %6401 = vmatpush1.bf16.msra.mxu0 %v8054_v13  ;;  %6433 = vmatpush1.bf16.msra.mxu1 %v8058_v61 }
 0xb16   :  { %6403 = vmatprep.subr.bf16.mxu0 %v8060_v24  ;;  %6435 = vmatprep.subr.bf16.mxu1 %v8062_v1 }
 0xb19   :  { %6405 = vmatpush1.bf16.msra.mxu0 %v8065_v35  ;;  %6437 = vmatpush1.bf16.msra.mxu1 %v8069_v18 }
 0xb1a   :  { %6407 = vmatprep.subr.bf16.mxu0 %v8071_v56  ;;  %6439 = vmatprep.subr.bf16.mxu1 %v8074_v41 }
 0xb1d   :  { %6409 = vmatpush1.bf16.msra.mxu0 %v8077_v42  ;;  %6441 = vmatpush1.bf16.msra.mxu1 %v8081_v59 }
 0xb1e   :  { %6411 = vmatprep.subr.bf16.mxu0 %v8086_v32  ;;  %6443 = vmatprep.subr.bf16.mxu1 %v8088_v27  ;;  %v4186_v32 = vld [vmem:[#allocation11 + $0x8] sm:$0xff] }
 0xb1f   :  { %v4190_v27 = vld [vmem:[#allocation11 + $0x28] sm:$0xff] }
 0xb21   :  { %6413 = vmatpush1.bf16.msra.mxu0 %v8090_v19  ;;  %6445 = vmatpush1.bf16.msra.mxu1 %v8093_v40  ;;  %v4188_v19 = vld [vmem:[#allocation11 + $0x18] sm:$0xff]  ;;  %v8253_v40 = vpack.c.bf16 %v4190_v27, %v4186_v32  ;;  %v4223_v32 = vld [vmem:[#allocation11 + $0x130] sm:$0xff] }
 0xb22   :  { %v8255_v62 = vpack.c.bf16 %v4192_v48, %v4188_v19  ;;  %v4226_v19 = vld [vmem:[#allocation11 + $0x148] sm:$0xff] }
 0xb23   :  { %6447 = vmatprep.subr.bf16.mxu0 %v8253_v40  ;;  %v4230_v48 = vld [vmem:[#allocation11 + $0x168] sm:$0xff] }
 0xb24   :  { %6479 = vmatprep.subr.bf16.mxu1 %v8255_v62  ;;  %v8312_v60 = vpack.c.bf16 %v4230_v48, %v4226_v19 }
 0xbd7   :  { %v3831_v30 = vpop.f32.mrb[20].mxu0  ;;  %v3902_v43 = vpop.f32.mrb[20].mxu1 }
 0xbd8   :  { %v6762_v10 = vadd.f32 %v3831_v30, %v8148_v15  ;;  %v3833_v33 = vpop.f32.mrb[21].mxu0  ;;  %v3904_v44 = vpop.f32.mrb[21].mxu1  ;;  %v6778_v0 = vadd.f32 %v3902_v43, %v8163_v26  ;;  %v4203_v30 = vld [vmem:[#allocation11 + $0x90] sm:$0xff] }
 0xbd9   :  { %v6763_v39 = vadd.f32 %v3833_v33, %v8152_v58  ;;  %v6779_v36 = vadd.f32 %v3904_v44, %v8158_v8  ;;  %v4207_v43 = vld [vmem:[#allocation11 + $0xb0] sm:$0xff]  ;;  %v4210_v33 = vld [vmem:[#allocation11 + $0xc8] sm:$0xff] }
 0xbda   :  { %v5287_v57 = vmul.f32 -1.442695, %v6762_v10  ;;  %v8284_v10 = vpack.c.bf16 %v4207_v43, %v4203_v30  ;;  %v4214_v44 = vld [vmem:[#allocation11 + $0xe8] sm:$0xff]  ;;  %v4235_v30 = vld [vmem:[#allocation11 + $0x190] sm:$0xff] }
 0xbdb   :  { %v5288_v23 = vmul.f32 -1.442695, %v6763_v39  ;;  %v5289_v14 = vmul.f32 -1.442695, %v6779_v36  ;;  %v4212_v39 = vld [vmem:[#allocation11 + $0xd8] sm:$0xff]  ;;  %v4209_v36 = vld [vmem:[#allocation11 + $0xc0] sm:$0xff] }
 0xbdc   :  { %7055 = vpow2.f32 %v5287_v57  ;;  %v8289_v57 = vpack.c.bf16 %v4214_v44, %v4210_v33  ;;  %v4239_v33 = vld [vmem:[#allocation11 + $0x1b0] sm:$0xff]  ;;  %v4242_v44 = vld [vmem:[#allocation11 + $0x1c8] sm:$0xff] }
 0xbdd   :  { %7057 = vpow2.f32 %v5288_v23  ;;  %v4216_v23 = vld [vmem:[#allocation11 + $0xf8] sm:$0xff] }
 0xbde   :  { %7059 = vpow2.f32 %v5289_v14  ;;  %v4213_v14 = vld [vmem:[#allocation11 + $0xe0] sm:$0xff] }
 0xbdf   :  { %7061 = vtanh.f32 %v6778_v0  ;;  %v8291_v0 = vpack.c.bf16 %v4216_v23, %v4212_v39  ;;  %v4246_v39 = vld [vmem:[#allocation11 + $0x1e8] sm:$0xff]  ;;  %v8332_v23 = vpack.c.bf16 %v4239_v33, %v4235_v30 }
 0xbe6   :  { %v7056_v2 = vpop.eup %7055 }
 0xbe7   :  { %v7058_v7 = vpop.eup %7057  ;;  %v3914_v25 = vadd.f32 1.0, %v7056_v2  ;;  %v8293_v2 = vpack.c.bf16 %v4213_v14, %v4209_v36  ;;  %v8334_v36 = vpack.c.bf16 %v4246_v39, %v4242_v44  ;;  %v4244_v14 = vld [vmem:[#allocation11 + $0x1d8] sm:$0xff] }
 0xbe8   :  { %v3920_v52 = vadd.f32 1.0, %v7058_v7  ;;  %v7060_v31 = vpop.eup %7059  ;;  %v4211_v7 = vld [vmem:[#allocation11 + $0xd0] sm:$0xff] }
 0xbe9   :  { %7063 = vrcp.f32 %v3914_v25  ;;  %v7062_v13 = vpop.eup %7061  ;;  %v3927_v35 = vadd.f32 1.0, %v7060_v31  ;;  %v4215_v25 = vld [vmem:[#allocation11 + $0xf0] sm:$0xff]  ;;  %v4218_v31 = vld [vmem:[#allocation11 + $0x108] sm:$0xff] }
 0xbea   :  { %7065 = vrcp.f32 %v3920_v52  ;;  %v8296_v52 = vpack.c.bf16 %v4215_v25, %v4211_v7  ;;  %v4248_v7 = vld [vmem:[#allocation11 + $0x1f8] sm:$0xff]  ;;  %v4241_v25 = vld [vmem:[#allocation11 + $0x1c0] sm:$0xff] }
 0xbeb   :  { %7067 = vrcp.f32 %v3927_v35  ;;  %v4217_v35 = vld [vmem:[#allocation11 + $0x100] sm:$0xff] }
 0xbf3   :  { %v7064_v61 = vpop.eup %7063 }
 0xbf4   :  { %v7066_v24 = vpop.eup %7065  ;;  %v3932_v1 = vmul.f32 %v7064_v61, %v7062_v13  ;;  %v4222_v13 = vld [vmem:[#allocation11 + $0x128] sm:$0xff]  ;;  %v4220_v61 = vld [vmem:[#allocation11 + $0x118] sm:$0xff] }
 0xbf5   :  { %v3931_v18 = vmul.f32 %v7066_v24, %v8208_v37  ;;  %v7068_v41 = vpop.eup %7067  ;;  %v4201_v37 = vld [vmem:[#allocation11 + $0x80] sm:$0xff]  ;;  %v8301_v24 = vpack.c.bf16 %v4222_v13, %v4218_v31  ;;  %v8337_v31 = vpack.c.bf16 %v4248_v7, %v4244_v14 }
 0xbf6   :  { %v8281_v50 = vpack.c.bf16 %v4205_v45, %v4201_v37  ;;  %v4233_v37 = vld [vmem:[#allocation11 + $0x180] sm:$0xff] }
 0xbf7   :  { %v8248_v56 = vadd.f32 %v3932_v1, %v3931_v18  ;;  %v4224_v1 = vld [vmem:[#allocation11 + $0x138] sm:$0xff]  ;;  %v4221_v18 = vld [vmem:[#allocation11 + $0x120] sm:$0xff] }
 0xbf8   :  { %v4237_v45 = vld [vmem:[#allocation11 + $0x1a0] sm:$0xff] }
 0xbf9   :  { %7069 = vtanh.f32 %v8248_v56  ;;  %v8328_v43 = vpack.c.bf16 %v4237_v45, %v4233_v37  ;;  %v4245_v13 = vld [vmem:[#allocation11 + $0x1e0] sm:$0xff] }
 0xc03   :  { %v7070_v42 = vpop.eup %7069 }
 0xc04   :  { %v3935_v59 = vmul.f32 %v7070_v42, %v7068_v41  ;;  %v8303_v41 = vpack.c.bf16 %v4224_v1, %v4220_v61  ;;  %v8305_v42 = vpack.c.bf16 %v4221_v18, %v4217_v35  ;;  %v4243_v61 = vld [vmem:[#allocation11 + $0x1d0] sm:$0xff]  ;;  %v8340_v35 = vpack.c.bf16 %v4245_v13, %v4241_v25 }
 0xc05   :  { %v4247_v1 = vld [vmem:[#allocation11 + $0x1f0] sm:$0xff] }
 0xc06   :  { %4072 = vmatmul.mubr.f32.vlgmr.msra.gmra.mrb[22].mxu0 %v3935_v59  ;;  %4143 = vmatmul.mubr.f32.vlgmr.msra.gmra.mrb[22].mxu1 %v3935_v59  ;;  %v4219_v59 = vld [vmem:[#allocation11 + $0x110] sm:$0xff]  ;;  %v8344_v18 = vpack.c.bf16 %v4247_v1, %v4243_v61 }
 0xc07   :  { %4313 = vmatprep.mubr.f32.mxu0 %v7251_v17  ;;  %4384 = vmatprep.mubr.f32.mxu1 %v7251_v17  ;;  %v8308_v27 = vpack.c.bf16 %v4223_v32, %v4219_v59 }
 0xc08   :  { %6449 = vmatpush1.bf16.msra.mxu0 %v8257_v38  ;;  %6481 = vmatpush1.bf16.msra.mxu1 %v8260_v3 }
 0xc09   :  { %6451 = vmatprep.subr.bf16.mxu0 %v8265_v34  ;;  %6483 = vmatprep.subr.bf16.mxu1 %v8267_v6 }
 0xc0c   :  { %6453 = vmatpush1.bf16.msra.mxu0 %v8269_v16  ;;  %6485 = vmatpush1.bf16.msra.mxu1 %v8272_v63 }
 0xc0d   :  { %6455 = vmatprep.subr.bf16.mxu0 %v8277_v5  ;;  %6487 = vmatprep.subr.bf16.mxu1 %v8279_v20 }
 0xc10   :  { %6457 = vmatpush1.bf16.msra.mxu0 %v8281_v50  ;;  %6489 = vmatpush1.bf16.msra.mxu1 %v8284_v10 }
 0xc11   :  { %6459 = vmatprep.subr.bf16.mxu0 %v8289_v57  ;;  %6491 = vmatprep.subr.bf16.mxu1 %v8291_v0 }
 0xc14   :  { %6461 = vmatpush1.bf16.msra.mxu0 %v8293_v2  ;;  %6493 = vmatpush1.bf16.msra.mxu1 %v8296_v52 }
 0xc15   :  { %6463 = vmatprep.subr.bf16.mxu0 %v8301_v24  ;;  %6495 = vmatprep.subr.bf16.mxu1 %v8303_v41 }
 0xc18   :  { %6465 = vmatpush1.bf16.msra.mxu0 %v8305_v42  ;;  %6497 = vmatpush1.bf16.msra.mxu1 %v8308_v27 }
 0xc19   :  { %6467 = vmatprep.subr.bf16.mxu0 %v8312_v60  ;;  %6499 = vmatprep.subr.bf16.mxu1 %v8315_v12 }
 0xc1c   :  { %6469 = vmatpush1.bf16.msra.mxu0 %v8317_v47  ;;  %6501 = vmatpush1.bf16.msra.mxu1 %v8320_v9 }
 0xc1d   :  { %6471 = vmatprep.subr.bf16.mxu0 %v8323_v46  ;;  %6503 = vmatprep.subr.bf16.mxu1 %v8325_v54 }
 0xc20   :  { %6473 = vmatpush1.bf16.msra.mxu0 %v8328_v43  ;;  %6505 = vmatpush1.bf16.msra.mxu1 %v8332_v23 }
 0xc21   :  { %6475 = vmatprep.subr.bf16.mxu0 %v8334_v36  ;;  %6507 = vmatprep.subr.bf16.mxu1 %v8337_v31 }
 0xc24   :  { %6477 = vmatpush1.bf16.msra.mxu0 %v8340_v35  ;;  %6509 = vmatpush1.bf16.msra.mxu1 %v8344_v18 }
 0xc25   :  { %6511 = vmatprep.subr.bf16.mxu0 %v8253_v40  ;;  %6543 = vmatprep.subr.bf16.mxu1 %v8255_v62 }
 0xcd9   :  { %v4073_v59 = vpop.f32.mrb[22].mxu0  ;;  %v4144_v32 = vpop.f32.mrb[22].mxu1 }
 0xcda   :  { %v6764_v19 = vadd.f32 %v4073_v59, %v8148_v15  ;;  %v4075_v48 = vpop.f32.mrb[23].mxu0  ;;  %v4146_v51 = vpop.f32.mrb[23].mxu1  ;;  %v6780_v53 = vadd.f32 %v4144_v32, %v8163_v26 }
 0xcdb   :  { %v6765_v49 = vadd.f32 %v4075_v48, %v8152_v58  ;;  %v6781_v22 = vadd.f32 %v4146_v51, %v8158_v8 }
 0xcdc   :  { %v5290_v55 = vmul.f32 -1.442695, %v6764_v19 }
 0xcdd   :  { %v5291_v4 = vmul.f32 -1.442695, %v6765_v49  ;;  %v5292_v11 = vmul.f32 -1.442695, %v6781_v22 }
 0xcde   :  { %7071 = vpow2.f32 %v5290_v55 }
 0xcdf   :  { %7073 = vpow2.f32 %v5291_v4 }
 0xce0   :  { %7075 = vpow2.f32 %v5292_v11 }
 0xce1   :  { %7077 = vtanh.f32 %v6780_v53 }
 0xce8   :  { %v7072_v28 = vpop.eup %7071 }
 0xce9   :  { %v7074_v21 = vpop.eup %7073  ;;  %v4156_v29 = vadd.f32 1.0, %v7072_v28 }
 0xcea   :  { %v4162_v37 = vadd.f32 1.0, %v7074_v21  ;;  %v7076_v45 = vpop.eup %7075 }
 0xceb   :  { %7079 = vrcp.f32 %v4156_v29  ;;  %v7078_v30 = vpop.eup %7077  ;;  %v4169_v14 = vadd.f32 1.0, %v7076_v45 }
 0xcec   :  { %7081 = vrcp.f32 %v4162_v37 }
 0xced   :  { %7083 = vrcp.f32 %v4169_v14 }
 0xcf5   :  { %v7080_v33 = vpop.eup %7079 }
 0xcf6   :  { %v7082_v44 = vpop.eup %7081  ;;  %v4174_v39 = vmul.f32 %v7080_v33, %v7078_v30 }
 0xcf7   :  { %v4173_v7 = vmul.f32 %v7082_v44, %v8248_v56  ;;  %v7084_v13 = vpop.eup %7083 }
 0xcf9   :  { %v8356_v25 = vadd.f32 %v4174_v39, %v4173_v7 }
 0xcfb   :  { %7085 = vtanh.f32 %v8356_v25 }
 0xd05   :  { %v7086_v61 = vpop.eup %7085 }
 0xd06   :  { %v4177_v1 = vmul.f32 %v7086_v61, %v7084_v13 }
 0xd08   :  { %4314 = vmatmul.mubr.f32.vlgmr.msra.gmra.mrb[24].mxu0 %v4177_v1  ;;  %4385 = vmatmul.mubr.f32.vlgmr.msra.gmra.mrb[24].mxu1 %v4177_v1 }
 0xd09   :  { %6513 = vmatpush1.bf16.msra.mxu0 %v8257_v38  ;;  %6545 = vmatpush1.bf16.msra.mxu1 %v8260_v3 }
 0xd0a   :  { %6515 = vmatprep.subr.bf16.mxu0 %v8265_v34  ;;  %6547 = vmatprep.subr.bf16.mxu1 %v8267_v6 }
 0xd0b   :  { %4555 = vmatprep.mubr.f32.mxu0 %v7251_v17  ;;  %4626 = vmatprep.mubr.f32.mxu1 %v7251_v17 }
 0xd0d   :  { %6517 = vmatpush1.bf16.msra.mxu0 %v8269_v16  ;;  %6549 = vmatpush1.bf16.msra.mxu1 %v8272_v63 }
 0xd0e   :  { %6519 = vmatprep.subr.bf16.mxu0 %v8277_v5  ;;  %6551 = vmatprep.subr.bf16.mxu1 %v8279_v20 }
 0xd11   :  { %6521 = vmatpush1.bf16.msra.mxu0 %v8281_v50  ;;  %6553 = vmatpush1.bf16.msra.mxu1 %v8284_v10 }
 0xd12   :  { %6523 = vmatprep.subr.bf16.mxu0 %v8289_v57  ;;  %6555 = vmatprep.subr.bf16.mxu1 %v8291_v0 }
 0xd15   :  { %6525 = vmatpush1.bf16.msra.mxu0 %v8293_v2  ;;  %6557 = vmatpush1.bf16.msra.mxu1 %v8296_v52 }
 0xd16   :  { %6527 = vmatprep.subr.bf16.mxu0 %v8301_v24  ;;  %6559 = vmatprep.subr.bf16.mxu1 %v8303_v41 }
 0xd19   :  { %6529 = vmatpush1.bf16.msra.mxu0 %v8305_v42  ;;  %6561 = vmatpush1.bf16.msra.mxu1 %v8308_v27 }
 0xd1a   :  { %6531 = vmatprep.subr.bf16.mxu0 %v8312_v60  ;;  %6563 = vmatprep.subr.bf16.mxu1 %v8315_v12 }
 0xd1d   :  { %6533 = vmatpush1.bf16.msra.mxu0 %v8317_v47  ;;  %6565 = vmatpush1.bf16.msra.mxu1 %v8320_v9 }
 0xd1e   :  { %6535 = vmatprep.subr.bf16.mxu0 %v8323_v46  ;;  %6567 = vmatprep.subr.bf16.mxu1 %v8325_v54 }
 0xd21   :  { %6537 = vmatpush1.bf16.msra.mxu0 %v8328_v43  ;;  %6569 = vmatpush1.bf16.msra.mxu1 %v8332_v23 }
 0xd22   :  { %6539 = vmatprep.subr.bf16.mxu0 %v8334_v36  ;;  %6571 = vmatprep.subr.bf16.mxu1 %v8337_v31 }
 0xd25   :  { %6541 = vmatpush1.bf16.msra.mxu0 %v8340_v35  ;;  %6573 = vmatpush1.bf16.msra.mxu1 %v8344_v18 }
 0xd26   :  { %6575 = vmatprep.subr.bf16.mxu0 %v8253_v40  ;;  %6607 = vmatprep.subr.bf16.mxu1 %v8255_v62 }
 0xddb   :  { %v4315_v56 = vpop.f32.mrb[24].mxu0  ;;  %v4386_v59 = vpop.f32.mrb[24].mxu1 }
 0xddc   :  { %v6766_v32 = vadd.f32 %v4315_v56, %v8148_v15  ;;  %v4317_v19 = vpop.f32.mrb[25].mxu0  ;;  %v4388_v48 = vpop.f32.mrb[25].mxu1  ;;  %v6782_v11 = vadd.f32 %v4386_v59, %v8163_v26 }
 0xddd   :  { %v6767_v51 = vadd.f32 %v4317_v19, %v8152_v58  ;;  %v6783_v4 = vadd.f32 %v4388_v48, %v8158_v8 }
 0xdde   :  { %v5293_v49 = vmul.f32 -1.442695, %v6766_v32 }
 0xddf   :  { %v5294_v55 = vmul.f32 -1.442695, %v6767_v51  ;;  %v5295_v22 = vmul.f32 -1.442695, %v6783_v4 }
 0xde0   :  { %7087 = vpow2.f32 %v5293_v49 }
 0xde1   :  { %7089 = vpow2.f32 %v5294_v55 }
 0xde2   :  { %7091 = vpow2.f32 %v5295_v22 }
 0xde3   :  { %7093 = vtanh.f32 %v6782_v11 }
 0xdea   :  { %v7088_v53 = vpop.eup %7087 }
 0xdeb   :  { %v7090_v28 = vpop.eup %7089  ;;  %v4398_v21 = vadd.f32 1.0, %v7088_v53 }
 0xdec   :  { %v4404_v29 = vadd.f32 1.0, %v7090_v28  ;;  %v7092_v37 = vpop.eup %7091 }
 0xded   :  { %7095 = vrcp.f32 %v4398_v21  ;;  %v7094_v45 = vpop.eup %7093  ;;  %v4411_v39 = vadd.f32 1.0, %v7092_v37 }
 0xdee   :  { %7097 = vrcp.f32 %v4404_v29 }
 0xdef   :  { %7099 = vrcp.f32 %v4411_v39 }
 0xdf7   :  { %v7096_v30 = vpop.eup %7095 }
 0xdf8   :  { %v7098_v33 = vpop.eup %7097  ;;  %v4416_v44 = vmul.f32 %v7096_v30, %v7094_v45 }
 0xdf9   :  { %v4415_v14 = vmul.f32 %v7098_v33, %v8356_v25  ;;  %v7100_v13 = vpop.eup %7099 }
 0xdfb   :  { %v8398_v7 = vadd.f32 %v4416_v44, %v4415_v14 }
 0xdfd   :  { %7101 = vtanh.f32 %v8398_v7 }
 0xe07   :  { %v7102_v61 = vpop.eup %7101 }
 0xe08   :  { %v4419_v1 = vmul.f32 %v7102_v61, %v7100_v13  ;;  %v5152_v61 = vld [vmem:[%s8550_s7 + $0x18] sm:$0xff] }
 0xe0a   :  { %4556 = vmatmul.mubr.f32.vlgmr.msra.gmra.mrb[26].mxu0 %v4419_v1  ;;  %4627 = vmatmul.mubr.f32.vlgmr.msra.gmra.mrb[26].mxu1 %v4419_v1 }
 0xe0b   :  { %6577 = vmatpush1.bf16.msra.mxu0 %v8257_v38  ;;  %6609 = vmatpush1.bf16.msra.mxu1 %v8260_v3 }
 0xe0c   :  { %6579 = vmatprep.subr.bf16.mxu0 %v8265_v34  ;;  %6611 = vmatprep.subr.bf16.mxu1 %v8267_v6 }
 0xe0d   :  { %4797 = vmatprep.mubr.f32.mxu0 %v7251_v17  ;;  %4868 = vmatprep.mubr.f32.mxu1 %v7251_v17 }
 0xe0f   :  { %6581 = vmatpush1.bf16.msra.mxu0 %v8269_v16  ;;  %6613 = vmatpush1.bf16.msra.mxu1 %v8272_v63 }
 0xe10   :  { %6583 = vmatprep.subr.bf16.mxu0 %v8277_v5  ;;  %6615 = vmatprep.subr.bf16.mxu1 %v8279_v20 }
 0xe13   :  { %6585 = vmatpush1.bf16.msra.mxu0 %v8281_v50  ;;  %6617 = vmatpush1.bf16.msra.mxu1 %v8284_v10 }
 0xe14   :  { %6587 = vmatprep.subr.bf16.mxu0 %v8289_v57  ;;  %6619 = vmatprep.subr.bf16.mxu1 %v8291_v0 }
 0xe17   :  { %6589 = vmatpush1.bf16.msra.mxu0 %v8293_v2  ;;  %6621 = vmatpush1.bf16.msra.mxu1 %v8296_v52 }
 0xe18   :  { %6591 = vmatprep.subr.bf16.mxu0 %v8301_v24  ;;  %6623 = vmatprep.subr.bf16.mxu1 %v8303_v41 }
 0xe1b   :  { %6593 = vmatpush1.bf16.msra.mxu0 %v8305_v42  ;;  %6625 = vmatpush1.bf16.msra.mxu1 %v8308_v27 }
 0xe1c   :  { %6595 = vmatprep.subr.bf16.mxu0 %v8312_v60  ;;  %6627 = vmatprep.subr.bf16.mxu1 %v8315_v12 }
 0xe1f   :  { %6597 = vmatpush1.bf16.msra.mxu0 %v8317_v47  ;;  %6629 = vmatpush1.bf16.msra.mxu1 %v8320_v9 }
 0xe20   :  { %6599 = vmatprep.subr.bf16.mxu0 %v8323_v46  ;;  %6631 = vmatprep.subr.bf16.mxu1 %v8325_v54 }
 0xe23   :  { %6601 = vmatpush1.bf16.msra.mxu0 %v8328_v43  ;;  %6633 = vmatpush1.bf16.msra.mxu1 %v8332_v23 }
 0xe24   :  { %6603 = vmatprep.subr.bf16.mxu0 %v8334_v36  ;;  %6635 = vmatprep.subr.bf16.mxu1 %v8337_v31 }
 0xe27   :  { %6605 = vmatpush1.bf16.msra.mxu0 %v8340_v35  ;;  %6637 = vmatpush1.bf16.msra.mxu1 %v8344_v18 }
 0xe28   :  { %6639 = vmatprep.subr.bf16.mxu0 %v8253_v40  ;;  %6671 = vmatprep.subr.bf16.mxu1 %v8255_v62 }
 0xedd   :  { %v4557_v25 = vpop.f32.mrb[26].mxu0  ;;  %v4628_v56 = vpop.f32.mrb[26].mxu1 }
 0xede   :  { %v6768_v59 = vadd.f32 %v4557_v25, %v8148_v15  ;;  %v4559_v32 = vpop.f32.mrb[27].mxu0  ;;  %v4630_v19 = vpop.f32.mrb[27].mxu1  ;;  %v6784_v22 = vadd.f32 %v4628_v56, %v8163_v26  ;;  %v5153_v25 = vld [vmem:[%s8550_s7 + $0x20] sm:$0xff]  ;;  %v5154_v56 = vld [vmem:[%s8550_s7 + $0x28] sm:$0xff] }
 0xedf   :  { %v6769_v48 = vadd.f32 %v4559_v32, %v8152_v58  ;;  %v6785_v55 = vadd.f32 %v4630_v19, %v8158_v8  ;;  %v5155_v32 = vld [vmem:[%s8550_s7 + $0x30] sm:$0xff]  ;;  %v5156_v19 = vld [vmem:[%s8550_s7 + $0x38] sm:$0xff] }
 0xee0   :  { %v5296_v51 = vmul.f32 -1.442695, %v6768_v59  ;;  %v6709_v59 = vpack.c.bf16 %v5154_v56, %v5153_v25 }
 0xee1   :  { %v5297_v49 = vmul.f32 -1.442695, %v6769_v48  ;;  %v5298_v4 = vmul.f32 -1.442695, %v6785_v55  ;;  %v6712_v48 = vpack.c.bf16 %v5156_v19, %v5155_v32 }
 0xee2   :  { %7103 = vpow2.f32 %v5296_v51  ;;  %v5157_v51 = vld [vmem:[%s8550_s7 + $0x40] sm:$0xff] }
 0xee3   :  { %7105 = vpow2.f32 %v5297_v49  ;;  %v5158_v49 = vld [vmem:[%s8550_s7 + $0x48] sm:$0xff] }
 0xee4   :  { %7107 = vpow2.f32 %v5298_v4  ;;  %v6715_v55 = vpack.c.bf16 %v5158_v49, %v5157_v51  ;;  %v5159_v4 = vld [vmem:[%s8550_s7 + $0x50] sm:$0xff] }
 0xee5   :  { %7109 = vtanh.f32 %v6784_v22  ;;  %v5160_v22 = vld [vmem:[%s8550_s7 + $0x58] sm:$0xff] }
 0xeec   :  { %v7104_v40 = vpop.eup %7103 }
 0xeed   :  { %v7106_v11 = vpop.eup %7105  ;;  %v4640_v62 = vadd.f32 1.0, %v7104_v40  ;;  %v5161_v40 = vld [vmem:[%s8550_s7 + $0x60] sm:$0xff] }
 0xeee   :  { %v4646_v53 = vadd.f32 1.0, %v7106_v11  ;;  %v7108_v28 = vpop.eup %7107  ;;  %v6718_v11 = vpack.c.bf16 %v5160_v22, %v5159_v4 }
 0xeef   :  { %7111 = vrcp.f32 %v4640_v62  ;;  %v7110_v21 = vpop.eup %7109  ;;  %v4653_v30 = vadd.f32 1.0, %v7108_v28  ;;  %v5162_v62 = vld [vmem:[%s8550_s7 + $0x68] sm:$0xff]  ;;  %v5163_v28 = vld [vmem:[%s8550_s7 + $0x70] sm:$0xff] }
 0xef0   :  { %7113 = vrcp.f32 %v4646_v53  ;;  %v6721_v53 = vpack.c.bf16 %v5162_v62, %v5161_v40 }
 0xef1   :  { %7115 = vrcp.f32 %v4653_v30 }
 0xef9   :  { %v7112_v29 = vpop.eup %7111 }
 0xefa   :  { %v7114_v37 = vpop.eup %7113  ;;  %v4658_v45 = vmul.f32 %v7112_v29, %v7110_v21  ;;  %v5164_v21 = vld [vmem:[%s8550_s7 + $0x78] sm:$0xff] }
 0xefb   :  { %v4657_v33 = vmul.f32 %v7114_v37, %v8398_v7  ;;  %v7116_v39 = vpop.eup %7115  ;;  %v5151_v7 = vld [vmem:[%s8550_s7 + $0x10] sm:$0xff]  ;;  %v6724_v29 = vpack.c.bf16 %v5164_v21, %v5163_v28 }
 0xefc   :  { %v6706_v1 = vpack.c.bf16 %v5152_v61, %v5151_v7 }
 0xefd   :  { %v8440_v44 = vadd.f32 %v4658_v45, %v4657_v33 }
 0xeff   :  { %7117 = vtanh.f32 %v8440_v44 }
 0xf09   :  { %v7118_v14 = vpop.eup %7117 }
 0xf0a   :  { %v4661_v13 = vmul.f32 %v7118_v14, %v7116_v39 }
 0xf0c   :  { %4798 = vmatmul.mubr.f32.vlgmr.msra.gmra.mrb[28].mxu0 %v4661_v13  ;;  %4869 = vmatmul.mubr.f32.vlgmr.msra.gmra.mrb[28].mxu1 %v4661_v13 }
 0xf0d   :  { %6641 = vmatpush1.bf16.msra.mxu0 %v8257_v38  ;;  %6673 = vmatpush1.bf16.msra.mxu1 %v8260_v3 }
 0xf0e   :  { %6643 = vmatprep.subr.bf16.mxu0 %v8265_v34  ;;  %6675 = vmatprep.subr.bf16.mxu1 %v8267_v6 }
 0xf0f   :  { %5039 = vmatprep.mubr.f32.mxu0 %v7251_v17  ;;  %5110 = vmatprep.mubr.f32.mxu1 %v7251_v17 }
 0xf11   :  { %6645 = vmatpush1.bf16.msra.mxu0 %v8269_v16  ;;  %6677 = vmatpush1.bf16.msra.mxu1 %v8272_v63 }
 0xf12   :  { %6647 = vmatprep.subr.bf16.mxu0 %v8277_v5  ;;  %6679 = vmatprep.subr.bf16.mxu1 %v8279_v20 }
 0xf15   :  { %6649 = vmatpush1.bf16.msra.mxu0 %v8281_v50  ;;  %6681 = vmatpush1.bf16.msra.mxu1 %v8284_v10 }
 0xf16   :  { %6651 = vmatprep.subr.bf16.mxu0 %v8289_v57  ;;  %6683 = vmatprep.subr.bf16.mxu1 %v8291_v0 }
 0xf19   :  { %6653 = vmatpush1.bf16.msra.mxu0 %v8293_v2  ;;  %6685 = vmatpush1.bf16.msra.mxu1 %v8296_v52 }
 0xf1a   :  { %6655 = vmatprep.subr.bf16.mxu0 %v8301_v24  ;;  %6687 = vmatprep.subr.bf16.mxu1 %v8303_v41 }
 0xf1d   :  { %6657 = vmatpush1.bf16.msra.mxu0 %v8305_v42  ;;  %6689 = vmatpush1.bf16.msra.mxu1 %v8308_v27 }
 0xf1e   :  { %6659 = vmatprep.subr.bf16.mxu0 %v8312_v60  ;;  %6691 = vmatprep.subr.bf16.mxu1 %v8315_v12 }
 0xf21   :  { %6661 = vmatpush1.bf16.msra.mxu0 %v8317_v47  ;;  %6693 = vmatpush1.bf16.msra.mxu1 %v8320_v9 }
 0xf22   :  { %6663 = vmatprep.subr.bf16.mxu0 %v8323_v46  ;;  %6695 = vmatprep.subr.bf16.mxu1 %v8325_v54 }
 0xf25   :  { %6665 = vmatpush1.bf16.msra.mxu0 %v8328_v43  ;;  %6697 = vmatpush1.bf16.msra.mxu1 %v8332_v23 }
 0xf26   :  { %6667 = vmatprep.subr.bf16.mxu0 %v8334_v36  ;;  %6699 = vmatprep.subr.bf16.mxu1 %v8337_v31  ;;  %v5149_v36 = vld [vmem:[%s8550_s7] sm:$0xff]  ;;  %v5150_v31 = vld [vmem:[%s8550_s7 + $0x8] sm:$0xff] }
 0xf29   :  { %6669 = vmatpush1.bf16.msra.mxu0 %v8340_v35  ;;  %6701 = vmatpush1.bf16.msra.mxu1 %v8344_v18  ;;  %v6703_v35 = vpack.c.bf16 %v5150_v31, %v5149_v36  ;;  %v7252_v18 = vmov 0.0|0.0  }
 0xf2a   :  { %6702 = vmatprep.subr.bf16.mxu0 %v7252_v18 }
 0xfdf   :  { %v4799_v38 = vpop.f32.mrb[28].mxu0  ;;  %v4870_v3 = vpop.f32.mrb[28].mxu1 }
 0xfe0   :  { %v6770_v34 = vadd.f32 %v4799_v38, %v8148_v15  ;;  %v4801_v6 = vpop.f32.mrb[29].mxu0  ;;  %v4872_v16 = vpop.f32.mrb[29].mxu1  ;;  %v6786_v57 = vadd.f32 %v4870_v3, %v8163_v26 }
 0xfe1   :  { %v6771_v63 = vadd.f32 %v4801_v6, %v8152_v58  ;;  %v6787_v50 = vadd.f32 %v4872_v16, %v8158_v8 }
 0xfe2   :  { %v5299_v5 = vmul.f32 -1.442695, %v6770_v34 }
 0xfe3   :  { %v5300_v20 = vmul.f32 -1.442695, %v6771_v63  ;;  %v5301_v10 = vmul.f32 -1.442695, %v6787_v50 }
 0xfe4   :  { %7119 = vpow2.f32 %v5299_v5 }
 0xfe5   :  { %7121 = vpow2.f32 %v5300_v20 }
 0xfe6   :  { %7123 = vpow2.f32 %v5301_v10 }
 0xfe7   :  { %7125 = vtanh.f32 %v6786_v57 }
 0xfee   :  { %v7120_v0 = vpop.eup %7119 }
 0xfef   :  { %v7122_v2 = vpop.eup %7121  ;;  %v4882_v52 = vadd.f32 1.0, %v7120_v0 }
 0xff0   :  { %v4888_v24 = vadd.f32 1.0, %v7122_v2  ;;  %v7124_v41 = vpop.eup %7123 }
 0xff1   :  { %7127 = vrcp.f32 %v4882_v52  ;;  %v7126_v42 = vpop.eup %7125  ;;  %v4895_v47 = vadd.f32 1.0, %v7124_v41  ;;  %v5305_v52 = vld [vmem:[%s8551_s8] ss:$0 sm:$0xff] }
 0xff2   :  { %7129 = vrcp.f32 %v4888_v24 }
 0xff3   :  { %7131 = vrcp.f32 %v4895_v47 }
 0xffb   :  { %v7128_v27 = vpop.eup %7127 }
 0xffc   :  { %v7130_v60 = vpop.eup %7129  ;;  %v4900_v12 = vmul.f32 %v7128_v27, %v7126_v42 }
 0xffd   :  { %v4899_v9 = vmul.f32 %v7130_v60, %v8440_v44  ;;  %v7132_v54 = vpop.eup %7131 }
 0xfff   :  { %v8480_v46 = vadd.f32 %v4900_v12, %v4899_v9 }
0x1001   :  { %7133 = vtanh.f32 %v8480_v46 }
0x100b   :  { %v7134_v43 = vpop.eup %7133 }
0x100c   :  { %v4903_v23 = vmul.f32 %v7134_v43, %v7132_v54 }
0x100e   :  { %5040 = vmatmul.mubr.f32.vlgmr.msra.gmra.mrb[30].mxu0 %v4903_v23  ;;  %5111 = vmatmul.mubr.f32.vlgmr.msra.gmra.mrb[30].mxu1 %v4903_v23 }
0x100f   :  { %6704 = vmatpush3.bf16.msra.mxu0 %v6703_v35  ;;  %5355 = vmatprep.mubr.msk.f32.mxu0 %vm7253_vm0, %v7251_v17 }
0x1010   :  { %6705 = vmatprep.subr.bf16.mxu0 %v7252_v18 }
0x1013   :  { %6707 = vmatpush3.bf16.msra.mxu0 %v6706_v1 }
0x1014   :  { %6708 = vmatprep.subr.bf16.mxu0 %v7252_v18 }
0x1017   :  { %6710 = vmatpush3.bf16.msra.mxu0 %v6709_v59 }
0x1018   :  { %6711 = vmatprep.subr.bf16.mxu0 %v7252_v18 }
0x101b   :  { %6713 = vmatpush3.bf16.msra.mxu0 %v6712_v48 }
0x101c   :  { %6714 = vmatprep.subr.bf16.mxu0 %v7252_v18 }
0x101f   :  { %6716 = vmatpush3.bf16.msra.mxu0 %v6715_v55 }
0x1020   :  { %6717 = vmatprep.subr.bf16.mxu0 %v7252_v18 }
0x1023   :  { %6719 = vmatpush3.bf16.msra.mxu0 %v6718_v11 }
0x1024   :  { %6720 = vmatprep.subr.bf16.mxu0 %v7252_v18 }
0x1027   :  { %6722 = vmatpush3.bf16.msra.mxu0 %v6721_v53 }
0x1028   :  { %6723 = vmatprep.subr.bf16.mxu0 %v7252_v18 }
0x102b   :  { %6725 = vmatpush3.bf16.msra.mxu0 %v6724_v29 }
0x10e1   :  { %v5041_v37 = vpop.f32.mrb[30].mxu0  ;;  %v5112_v45 = vpop.f32.mrb[30].mxu1 }
0x10e2   :  { %v6772_v30 = vadd.f32 %v5041_v37, %v8148_v15  ;;  %v5043_v17 = vpop.f32.mrb[31].mxu0  ;;  %v5114_v33 = vpop.f32.mrb[31].mxu1  ;;  %v6788_v3 = vadd.f32 %v5112_v45, %v8163_v26 }
0x10e3   :  { %v6773_v44 = vadd.f32 %v5043_v17, %v8152_v58  ;;  %v6789_v13 = vadd.f32 %v5114_v33, %v8158_v8 }
0x10e4   :  { %v5302_v39 = vmul.f32 -1.442695, %v6772_v30 }
0x10e5   :  { %v5303_v14 = vmul.f32 -1.442695, %v6773_v44  ;;  %v5304_v38 = vmul.f32 -1.442695, %v6789_v13 }
0x10e6   :  { %7135 = vpow2.f32 %v5302_v39 }
0x10e7   :  { %7137 = vpow2.f32 %v5303_v14 }
0x10e8   :  { %7139 = vpow2.f32 %v5304_v38 }
0x10e9   :  { %7141 = vtanh.f32 %v6788_v3 }
0x10f0   :  { %v7136_v34 = vpop.eup %7135 }
0x10f1   :  { %v7138_v6 = vpop.eup %7137  ;;  %v5124_v16 = vadd.f32 1.0, %v7136_v34 }
0x10f2   :  { %v5130_v63 = vadd.f32 1.0, %v7138_v6  ;;  %v7140_v15 = vpop.eup %7139 }
0x10f3   :  { %7143 = vrcp.f32 %v5124_v16  ;;  %v7142_v5 = vpop.eup %7141  ;;  %v5137_v10 = vadd.f32 1.0, %v7140_v15 }
0x10f4   :  { %7145 = vrcp.f32 %v5130_v63 }
0x10f5   :  { %7147 = vrcp.f32 %v5137_v10 }
0x10fd   :  { %v7144_v58 = vpop.eup %7143 }
0x10fe   :  { %v7146_v20 = vpop.eup %7145  ;;  %v5142_v50 = vmul.f32 %v7144_v58, %v7142_v5 }
0x10ff   :  { %v5141_v57 = vmul.f32 %v7146_v20, %v8480_v46  ;;  %v7148_v26 = vpop.eup %7147 }
0x1101   :  { %v5143_v8 = vadd.f32 %v5142_v50, %v5141_v57 }
0x1103   :  { %7149 = vtanh.f32 %v5143_v8 }
0x110d   :  { %v7150_v0 = vpop.eup %7149 }
0x110e   :  { %v5145_v2 = vmul.f32 %v7150_v0, %v7148_v26 }
0x1110   :  { %5356 = vmatmul.mubr.f32.vlgmr.msra.gmra.mrb[32].mxu0 %v5145_v2 }
0x11e3   :  { %v5238_v24 = vpop.f32.mrb[32].mxu0 }
0x11e4   :  { %v5239_v41 = vadd.f32 %v5305_v52, %v5238_v24  ;;  %v5357_v42 = vpop.f32.mrb[33].mxu0 }
0x11e6   :  { %5242 = vst [vmem:[%s8552_s9] sm:$0xff] %v5239_v41 }
0x11e7   :  { %5247 = vsyncpa [#allocation7], 1 }
0x11e8   :  { %5248 = vsyncpa [#allocation9], 1 }
0x11e9   :  { %5249 = vsyncpa [#allocation12], 1 }

</bundles_post_ra>
